<compile_context>
chip_gen: v7x
topology: tpu7x:2x2x1
jax: 0.10.0
libtpu: 0.0.40
codegen_flags: <defaults>
</compile_context>

<pallas_src>
import functools

import jax
import jax.numpy as jnp
from jax.experimental import pallas as pl
from jax.experimental.pallas import tpu as pltpu


def _graph_directed_kernel(e1_ref, w1t_ref, b1_ref, nv2t_ref, out_ref, *, k: int):
    """One (TM, Npad) row tile of the masked adjacency matrix.

    e1_ref  : (TM, dim)   bf16   embedding rows for this tile
    w1t_ref : (dim, dim)  bf16   alpha * W1^T (alpha folded in)
    b1_ref  : (1, dim)    f32    alpha * b1
    nv2t_ref: (dim, Npad) bf16   (alpha * nv2)^T, zero-padded columns
    out_ref : (TM, Npad)  f32
    """
    # nv1 = tanh(alpha * (e1 @ W1^T + b1)); alpha is already folded in.
    nv1 = jnp.tanh(jnp.dot(e1_ref[...], w1t_ref[...],
                           preferred_element_type=jnp.float32) + b1_ref[...])

    # Pre-activation scores s = relu(alpha * nv1 @ nv2^T).  tanh is applied
    # only once, after top-k selection (tanh is strictly monotone and
    # tanh(0) == 0, so relu/tanh commute and the top-k index set is identical).
    s = jnp.maximum(
        jnp.dot(nv1.astype(jnp.bfloat16), nv2t_ref[...],
                preferred_element_type=jnp.float32),
        0.0)

    npad = s.shape[1]
    col = jax.lax.broadcasted_iota(jnp.int32, (1, npad), 1)   # (1, Npad) only

    # Iterative exact top-k per row (k small & static).  Each step selects the
    # lowest column attaining the row max (matching lax.top_k / torch.topk
    # tie-breaking), copies its value into the output accumulator, and knocks
    # it out of `work` with a -1.0 sentinel.  The sentinel is only safe
    # because s >= 0 after the relu.
    work = s
    out_acc = jnp.zeros_like(s)
    for _ in range(k):
        rowmax = jnp.max(work, axis=1, keepdims=True)
        is_max = work == rowmax
        sel_idx = jnp.min(jnp.where(is_max, col, npad), axis=1, keepdims=True)
        sel = col == sel_idx
        out_acc = jnp.where(sel, rowmax, out_acc)
        work = jnp.where(sel, -1.0, work)

    # adj = relu(tanh(alpha*a)) masked to top-k == tanh(kept relu'd scores).
    out_ref[...] = jnp.tanh(out_acc)


# ----------------------- tiling / VMEM heuristics ---------------------------

def _vmem_capacity_bytes() -> int:
    try:
        return int(pltpu.get_tpu_info().vmem_capacity_bytes)
    except Exception:
        return 64 * 1024 * 1024            # conservative (v7x-sized) fallback


def _vmem_budget_bytes(cap: int) -> int:
    # ~48 MiB on v7x (64 MiB/core), ~96 MiB on v5e/v6e (128 MiB).
    return (cap * 3) // 4


def _tile_footprint_bytes(tm: int, dim: int, npad: int) -> int:
    # ~28 B per (tm*npad) element: double-buffered f32 out tile (8 B) plus
    # work / out_acc / compare-select temporaries (~20 B); plus the
    # double-buffered bf16 e1 tile and the (conservatively double-buffered)
    # resident nv2t / W1^T / b1.
    resident = 4 * dim * npad + 8 * dim * dim + (1 << 16)
    return 28 * tm * npad + 4 * tm * dim + resident


def _pick_row_tile(n: int, dim: int, npad: int, requested: int, budget: int) -> int:
    """Row tile: 128-aligned (or full n), floored at 128, fit to the VMEM budget."""
    requested = int(requested)
    if requested >= n:
        tm = n
        # v7x has 2 TensorCores: give the "parallel" row axis >= 2 tiles for
        # medium/large problems so megacore actually shards the grid.
        if n >= 256:
            tm = max(128, (((n + 1) // 2 + 127) // 128) * 128)
    else:
        tm = max(8, (min(requested, n) // 8) * 8)
        if tm >= 256:
            tm = (tm // 128) * 128         # MXU-M / lane-friendly alignment
    # Shrink (never below 128) until the per-tile footprint fits the budget.
    while tm > 128 and _tile_footprint_bytes(tm, dim, npad) > budget:
        tm = max(128, (((tm // 2) + 127) // 128) * 128)
    return tm


def _vmem_limit_bytes(tm: int, dim: int, npad: int, cap: int) -> int:
    est = _tile_footprint_bytes(tm, dim, npad) + (8 << 20)
    lo = 32 * 1024 * 1024
    hi = (cap // 32) * 30                  # ~94% of physical VMEM
    return int(max(lo, min(est, hi)))


# ------------------------------- wrapper ------------------------------------

def graph_directed_forward(idx, emb1_w, emb2_w, w1, b1, w2, b2, *,
                           k: int, alpha: float = 3.0, row_tile: int = 512):
    """Pallas implementation of graph_directed.forward (static_feat=None path)."""
    alpha = float(alpha)
    # Embedding lookups stay as XLA glue.
    e1 = emb1_w[idx]
    e2 = emb2_w[idx]
    n, dim = e1.shape
    k = int(min(k, n))

    # Hoisted, tile-invariant nv2 (tiny N x dim matmul in the wrapper), scaled
    # by alpha, zero-padded to lane-dense Npad columns, transposed to the
    # MXU's natural (K, N) layout and cast to bf16.
    npad = ((n + 127) // 128) * 128
    nv2 = jnp.tanh(alpha * (e2 @ w2.T + b2))
    nv2t = jnp.pad(alpha * nv2, ((0, npad - n), (0, 0))).T.astype(jnp.bfloat16)

    # alpha folded into W1^T / b1; MXU inputs in bf16, bias / accum in f32.
    w1t = (alpha * w1.T).astype(jnp.bfloat16)
    b1r = (alpha * b1).reshape(1, dim).astype(jnp.float32)
    e1b = e1.astype(jnp.bfloat16)

    cap = _vmem_capacity_bytes()
    tm = _pick_row_tile(n, dim, npad, row_tile, _vmem_budget_bytes(cap))
    grid = (pl.cdiv(n, tm),)

    kernel = functools.partial(_graph_directed_kernel, k=k)

    cost = pl.CostEstimate(
        flops=2 * n * npad * dim + 2 * n * dim * dim,
        transcendentals=n * npad + n * dim,
        bytes_accessed=(4 * n * npad          # f32 output tiles
                        + 2 * n * dim         # bf16 e1 tiles
                        + 2 * dim * npad      # bf16 nv2t (resident)
                        + 2 * dim * dim + 4 * dim))

    grid_spec = pltpu.PrefetchScalarGridSpec(
        num_scalar_prefetch=0,
        grid=grid,
        in_specs=[
            pl.BlockSpec((tm, dim), lambda i: (i, 0)),     # e1 row tile
            pl.BlockSpec((dim, dim), lambda i: (0, 0)),    # alpha*W1^T, resident
            pl.BlockSpec((1, dim), lambda i: (0, 0)),      # alpha*b1, resident
            pl.BlockSpec((dim, npad), lambda i: (0, 0)),   # (alpha*nv2)^T, resident
        ],
        out_specs=pl.BlockSpec((tm, npad), lambda i: (i, 0)),
    )

    out = pl.pallas_call(
        kernel,
        out_shape=jax.ShapeDtypeStruct((n, npad), jnp.float32),
        grid_spec=grid_spec,
        compiler_params=pltpu.CompilerParams(
            dimension_semantics=("parallel",),
            vmem_limit_bytes=_vmem_limit_bytes(tm, dim, npad, cap)),
        cost_estimate=cost,
    )(e1b, w1t, b1r, nv2t)

    return out[:, :n]


# ----------------------------- references ----------------------------------

def _reference_f32(idx, emb1_w, emb2_w, w1, b1, w2, b2, *, k, alpha=3.0):
    """Pure-JAX f32 reference mirroring the PyTorch module exactly."""
    e1 = emb1_w[idx]
    e2 = emb2_w[idx]
    nv1 = jnp.tanh(alpha * (e1 @ w1.T + b1))
    nv2 = jnp.tanh(alpha * (e2 @ w2.T + b2))
    adj = jax.nn.relu(jnp.tanh(alpha * (nv1 @ nv2.T)))
    _, inds = jax.lax.top_k(adj, k)
    mask = jnp.zeros_like(adj).at[jnp.arange(adj.shape[0])[:, None], inds].set(1.0)
    return adj * mask


def _reference_matched(idx, emb1_w, emb2_w, w1, b1, w2, b2, *, k, alpha=3.0):
    """Reference mirroring the kernel's bf16-MXU / f32-accumulate precision path."""
    e1 = emb1_w[idx].astype(jnp.bfloat16)
    e2 = emb2_w[idx]
    nv1 = jnp.tanh(jnp.dot(e1, (alpha * w1.T).astype(jnp.bfloat16),
                           preferred_element_type=jnp.float32)
                   + (alpha * b1).astype(jnp.float32))
    nv2 = jnp.tanh(alpha * (e2 @ w2.T + b2))
    nv2t = (alpha * nv2).T.astype(jnp.bfloat16)
    s = jax.nn.relu(jnp.dot(nv1.astype(jnp.bfloat16), nv2t,
                            preferred_element_type=jnp.float32))
    adj = jnp.tanh(s)                       # == relu(tanh(alpha * a))
    _, inds = jax.lax.top_k(s, k)           # same ordering as top_k(adj)
    mask = jnp.zeros_like(adj).at[jnp.arange(adj.shape[0])[:, None], inds].set(1.0)
    return adj * mask, adj


if __name__ == "__main__":
    nnodes, dim, k, alpha = 192, 32, 4, 3.0
    n_idx = 160       # adjacency output is (160, 160); columns padded to 256
    row_tile = 128    # forces a 2-step grid (one full + one partial row tile)

    key = jax.random.PRNGKey(0)
    k1, k2, k3, k4, k5, k6, k7 = jax.random.split(key, 7)
    emb1_w = 0.2 * jax.random.normal(k1, (nnodes, dim), jnp.float32)
    emb2_w = 0.2 * jax.random.normal(k2, (nnodes, dim), jnp.float32)
    w1 = jax.random.normal(k3, (dim, dim), jnp.float32) / jnp.sqrt(dim)
    b1 = 0.1 * jax.random.normal(k4, (dim,), jnp.float32)
    w2 = jax.random.normal(k5, (dim, dim), jnp.float32) / jnp.sqrt(dim)
    b2 = 0.1 * jax.random.normal(k6, (dim,), jnp.float32)
    idx = jax.random.permutation(k7, nnodes)[:n_idx].astype(jnp.int32)

    out = graph_directed_forward(idx, emb1_w, emb2_w, w1, b1, w2, b2,
                                 k=k, alpha=alpha, row_tile=row_tile)
    out = jax.block_until_ready(out)
    assert out.shape == (n_idx, n_idx)

    ref_masked, ref_adj = _reference_matched(idx, emb1_w, emb2_w, w1, b1, w2, b2,
                                             k=k, alpha=alpha)
    ref_f32 = _reference_f32(idx, emb1_w, emb2_w, w1, b1, w2, b2,
                             k=k, alpha=alpha)

    # 1) Kept values per row match the precision-matched reference
    #    (sorting makes this immune to ties at the top-k boundary).
    assert jnp.allclose(jnp.sort(out, axis=1), jnp.sort(ref_masked, axis=1),
                        atol=1e-3, rtol=1e-3), "sorted kept-value mismatch"

    # 2) Kept positions match everywhere except genuinely ambiguous entries
    #    sitting within a hair of the k-th largest value of the row.
    kth = jnp.sort(ref_adj, axis=1)[:, -k][:, None]
    boundary = jnp.abs(ref_adj - kth) <= 1e-3
    assert jnp.allclose(jnp.where(boundary, 0.0, out),
                        jnp.where(boundary, 0.0, ref_masked),
                        atol=1e-3, rtol=1e-3), "position/value mismatch"

    # 3) Fidelity to the full-f32 (PyTorch-precision) reference at bf16-MXU accuracy.
    assert jnp.allclose(jnp.sort(out, axis=1), jnp.sort(ref_f32, axis=1),
                        atol=5e-2, rtol=5e-2), "mismatch vs f32 reference"

    print("KERNEL_OK")
</pallas_src>

<mosaic_0001>
module attributes {stable_mosaic.version = 11 : i64} {
  func.func @_graph_directed_kernel(%arg0: i32, %arg1: memref<128x32xbf16, #tpu.memory_space<vmem>>, %arg2: memref<32x32xbf16, #tpu.memory_space<vmem>>, %arg3: memref<1x32xf32, #tpu.memory_space<vmem>>, %arg4: memref<32x256xbf16, #tpu.memory_space<vmem>>, %arg5: memref<128x256xf32, #tpu.memory_space<vmem>>) attributes {dimension_semantics = [#tpu.dimension_semantics<parallel>], iteration_bounds = array<i64: 2>, scalar_prefetch = 0 : i64, scratch_operands = 0 : i64, tpu.core_type = #tpu.core_type<tc>, window_params = [{transform_indices = @transform_0, window_bounds = array<i64: 128, 32>}, {pipeline_mode = #tpu.pipeline_mode<synchronous>, transform_indices = @transform_1, window_bounds = array<i64: 32, 32>}, {pipeline_mode = #tpu.pipeline_mode<synchronous>, transform_indices = @transform_2, window_bounds = array<i64: 1, 32>}, {pipeline_mode = #tpu.pipeline_mode<synchronous>, transform_indices = @transform_3, window_bounds = array<i64: 32, 256>}, {transform_indices = @transform_4, window_bounds = array<i64: 128, 256>}]} {
    %c0 = arith.constant 0 : index
    %c0_0 = arith.constant 0 : index
    %0 = vector.load %arg1[%c0, %c0_0] : memref<128x32xbf16, #tpu.memory_space<vmem>>, vector<128x32xbf16>
    %c0_1 = arith.constant 0 : index
    %c0_2 = arith.constant 0 : index
    %1 = vector.load %arg2[%c0_1, %c0_2] : memref<32x32xbf16, #tpu.memory_space<vmem>>, vector<32x32xbf16>
    %cst = arith.constant dense<0.000000e+00> : vector<128x32xf32>
    %2 = tpu.matmul %0, %1, %cst {dimension_numbers = #tpu.dot_dimension_numbers<[1], [0], [0], [1], [0, 0, 1, 1], [], []>} : vector<128x32xbf16>, vector<32x32xbf16>, vector<128x32xf32> -> vector<128x32xf32>
    %c0_3 = arith.constant 0 : index
    %c0_4 = arith.constant 0 : index
    %3 = vector.load %arg3[%c0_3, %c0_4] : memref<1x32xf32, #tpu.memory_space<vmem>>, vector<1x32xf32>
    %4 = vector.broadcast %3 : vector<1x32xf32> to vector<128x32xf32>
    %5 = arith.addf %2, %4 : vector<128x32xf32>
    %6 = math.tanh %5 : vector<128x32xf32>
    %7 = arith.truncf %6 : vector<128x32xf32> to vector<128x32xbf16>
    %c0_5 = arith.constant 0 : index
    %c0_6 = arith.constant 0 : index
    %8 = vector.load %arg4[%c0_5, %c0_6] : memref<32x256xbf16, #tpu.memory_space<vmem>>, vector<32x256xbf16>
    %cst_7 = arith.constant dense<0.000000e+00> : vector<128x256xf32>
    %9 = tpu.matmul %7, %8, %cst_7 {dimension_numbers = #tpu.dot_dimension_numbers<[1], [0], [0], [1], [0, 0, 1, 1], [], []>} : vector<128x32xbf16>, vector<32x256xbf16>, vector<128x256xf32> -> vector<128x256xf32>
    %cst_8 = arith.constant 0.000000e+00 : f32
    %10 = vector.broadcast %cst_8 : f32 to vector<128x256xf32>
    %11 = arith.maximumf %9, %10 : vector<128x256xf32>
    %12 = tpu.iota {dimensions = array<i32: 1>} : vector<1x256xi32>
    %cst_9 = arith.constant 0.000000e+00 : f32
    %13 = vector.broadcast %cst_9 : f32 to vector<128x256xf32>
    %cst_10 = arith.constant dense<0xFF800000> : vector<128xf32>
    %14 = vector.multi_reduction <maximumf>, %11, %cst_10 [1] : vector<128x256xf32> to vector<128xf32>
    %15 = vector.shape_cast %14 : vector<128xf32> to vector<128x1xf32>
    %16 = vector.broadcast %15 : vector<128x1xf32> to vector<128x256xf32>
    %17 = arith.cmpf oeq, %11, %16 : vector<128x256xf32>
    %c256_i32 = arith.constant 256 : i32
    %18 = vector.shape_cast %12 : vector<1x256xi32> to vector<1x256xi32>
    %19 = vector.broadcast %18 : vector<1x256xi32> to vector<128x256xi32>
    %20 = vector.broadcast %c256_i32 : i32 to vector<128x256xi32>
    %21 = arith.select %17, %19, %20 : vector<128x256xi1>, vector<128x256xi32>
    %cst_11 = arith.constant dense<2147483647> : vector<128xi32>
    %22 = vector.multi_reduction <minsi>, %21, %cst_11 [1] : vector<128x256xi32> to vector<128xi32>
    %23 = vector.shape_cast %22 : vector<128xi32> to vector<128x1xi32>
    %24 = vector.broadcast %12 : vector<1x256xi32> to vector<128x256xi32>
    %25 = vector.broadcast %23 : vector<128x1xi32> to vector<128x256xi32>
    %26 = arith.cmpi eq, %24, %25 : vector<128x256xi32>
    %27 = vector.shape_cast %15 : vector<128x1xf32> to vector<128x1xf32>
    %28 = vector.broadcast %27 : vector<128x1xf32> to vector<128x256xf32>
    %29 = arith.select %26, %28, %13 : vector<128x256xi1>, vector<128x256xf32>
    %cst_12 = arith.constant -1.000000e+00 : f32
    %30 = vector.broadcast %cst_12 : f32 to vector<128x256xf32>
    %31 = arith.select %26, %30, %11 : vector<128x256xi1>, vector<128x256xf32>
    %cst_13 = arith.constant dense<0xFF800000> : vector<128xf32>
    %32 = vector.multi_reduction <maximumf>, %31, %cst_13 [1] : vector<128x256xf32> to vector<128xf32>
    %33 = vector.shape_cast %32 : vector<128xf32> to vector<128x1xf32>
    %34 = vector.broadcast %33 : vector<128x1xf32> to vector<128x256xf32>
    %35 = arith.cmpf oeq, %31, %34 : vector<128x256xf32>
    %c256_i32_14 = arith.constant 256 : i32
    %36 = vector.shape_cast %12 : vector<1x256xi32> to vector<1x256xi32>
    %37 = vector.broadcast %36 : vector<1x256xi32> to vector<128x256xi32>
    %38 = vector.broadcast %c256_i32_14 : i32 to vector<128x256xi32>
    %39 = arith.select %35, %37, %38 : vector<128x256xi1>, vector<128x256xi32>
    %cst_15 = arith.constant dense<2147483647> : vector<128xi32>
    %40 = vector.multi_reduction <minsi>, %39, %cst_15 [1] : vector<128x256xi32> to vector<128xi32>
    %41 = vector.shape_cast %40 : vector<128xi32> to vector<128x1xi32>
    %42 = vector.broadcast %12 : vector<1x256xi32> to vector<128x256xi32>
    %43 = vector.broadcast %41 : vector<128x1xi32> to vector<128x256xi32>
    %44 = arith.cmpi eq, %42, %43 : vector<128x256xi32>
    %45 = vector.shape_cast %33 : vector<128x1xf32> to vector<128x1xf32>
    %46 = vector.broadcast %45 : vector<128x1xf32> to vector<128x256xf32>
    %47 = arith.select %44, %46, %29 : vector<128x256xi1>, vector<128x256xf32>
    %cst_16 = arith.constant -1.000000e+00 : f32
    %48 = vector.broadcast %cst_16 : f32 to vector<128x256xf32>
    %49 = arith.select %44, %48, %31 : vector<128x256xi1>, vector<128x256xf32>
    %cst_17 = arith.constant dense<0xFF800000> : vector<128xf32>
    %50 = vector.multi_reduction <maximumf>, %49, %cst_17 [1] : vector<128x256xf32> to vector<128xf32>
    %51 = vector.shape_cast %50 : vector<128xf32> to vector<128x1xf32>
    %52 = vector.broadcast %51 : vector<128x1xf32> to vector<128x256xf32>
    %53 = arith.cmpf oeq, %49, %52 : vector<128x256xf32>
    %c256_i32_18 = arith.constant 256 : i32
    %54 = vector.shape_cast %12 : vector<1x256xi32> to vector<1x256xi32>
    %55 = vector.broadcast %54 : vector<1x256xi32> to vector<128x256xi32>
    %56 = vector.broadcast %c256_i32_18 : i32 to vector<128x256xi32>
    %57 = arith.select %53, %55, %56 : vector<128x256xi1>, vector<128x256xi32>
    %cst_19 = arith.constant dense<2147483647> : vector<128xi32>
    %58 = vector.multi_reduction <minsi>, %57, %cst_19 [1] : vector<128x256xi32> to vector<128xi32>
    %59 = vector.shape_cast %58 : vector<128xi32> to vector<128x1xi32>
    %60 = vector.broadcast %12 : vector<1x256xi32> to vector<128x256xi32>
    %61 = vector.broadcast %59 : vector<128x1xi32> to vector<128x256xi32>
    %62 = arith.cmpi eq, %60, %61 : vector<128x256xi32>
    %63 = vector.shape_cast %51 : vector<128x1xf32> to vector<128x1xf32>
    %64 = vector.broadcast %63 : vector<128x1xf32> to vector<128x256xf32>
    %65 = arith.select %62, %64, %47 : vector<128x256xi1>, vector<128x256xf32>
    %cst_20 = arith.constant -1.000000e+00 : f32
    %66 = vector.broadcast %cst_20 : f32 to vector<128x256xf32>
    %67 = arith.select %62, %66, %49 : vector<128x256xi1>, vector<128x256xf32>
    %cst_21 = arith.constant dense<0xFF800000> : vector<128xf32>
    %68 = vector.multi_reduction <maximumf>, %67, %cst_21 [1] : vector<128x256xf32> to vector<128xf32>
    %69 = vector.shape_cast %68 : vector<128xf32> to vector<128x1xf32>
    %70 = vector.broadcast %69 : vector<128x1xf32> to vector<128x256xf32>
    %71 = arith.cmpf oeq, %67, %70 : vector<128x256xf32>
    %c256_i32_22 = arith.constant 256 : i32
    %72 = vector.shape_cast %12 : vector<1x256xi32> to vector<1x256xi32>
    %73 = vector.broadcast %72 : vector<1x256xi32> to vector<128x256xi32>
    %74 = vector.broadcast %c256_i32_22 : i32 to vector<128x256xi32>
    %75 = arith.select %71, %73, %74 : vector<128x256xi1>, vector<128x256xi32>
    %cst_23 = arith.constant dense<2147483647> : vector<128xi32>
    %76 = vector.multi_reduction <minsi>, %75, %cst_23 [1] : vector<128x256xi32> to vector<128xi32>
    %77 = vector.shape_cast %76 : vector<128xi32> to vector<128x1xi32>
    %78 = vector.broadcast %12 : vector<1x256xi32> to vector<128x256xi32>
    %79 = vector.broadcast %77 : vector<128x1xi32> to vector<128x256xi32>
    %80 = arith.cmpi eq, %78, %79 : vector<128x256xi32>
    %81 = vector.shape_cast %69 : vector<128x1xf32> to vector<128x1xf32>
    %82 = vector.broadcast %81 : vector<128x1xf32> to vector<128x256xf32>
    %83 = arith.select %80, %82, %65 : vector<128x256xi1>, vector<128x256xf32>
    %84 = math.tanh %83 : vector<128x256xf32>
    %c0_24 = arith.constant 0 : index
    %c0_25 = arith.constant 0 : index
    %85 = vector.load %arg5[%c0_24, %c0_25] : memref<128x256xf32, #tpu.memory_space<vmem>>, vector<128x256xf32>
    tpu.vector_store %arg5[%c0_24, %c0_25], %84 {strides = array<i32>} : memref<128x256xf32, #tpu.memory_space<vmem>>, vector<128x256xf32>,
    return
  }
  func.func @transform_0(%arg0: i32) -> (i32, i32) {
    %c0_i32 = arith.constant 0 : i32
    %c0_i32_0 = arith.constant 0 : i32
    return %arg0, %c0_i32 : i32, i32
  }
  func.func @transform_1(%arg0: i32) -> (i32, i32) {
    %c0_i32 = arith.constant 0 : i32
    %c0_i32_0 = arith.constant 0 : i32
    %c0_i32_1 = arith.constant 0 : i32
    return %c0_i32, %c0_i32_0 : i32, i32
  }
  func.func @transform_2(%arg0: i32) -> (i32, i32) {
    %c0_i32 = arith.constant 0 : i32
    %c0_i32_0 = arith.constant 0 : i32
    %c0_i32_1 = arith.constant 0 : i32
    return %c0_i32, %c0_i32_0 : i32, i32
  }
  func.func @transform_3(%arg0: i32) -> (i32, i32) {
    %c0_i32 = arith.constant 0 : i32
    %c0_i32_0 = arith.constant 0 : i32
    %c0_i32_1 = arith.constant 0 : i32
    return %c0_i32, %c0_i32_0 : i32, i32
  }
  func.func @transform_4(%arg0: i32) -> (i32, i32) {
    %c0_i32 = arith.constant 0 : i32
    %c0_i32_0 = arith.constant 0 : i32
    return %arg0, %c0_i32 : i32, i32
  }
}

</mosaic_0001>

<bundles_post_ra>
// kernel: tpu_custom_call.1
= control target key start
LH: loop header
LB: loop body
LE: loop exit
PB: predicated region body
PF: predicated region fallthrough
CT: control target
= control target key end

     0   :  { %9 = vsyncpa [#allocation3], 0  ;;  %s5671_s0 = inlined_call_operand.vmem [shape: bf16[160,32], index: 0, kind: input, shape index: {}]   ;;  %s5672_s1 = inlined_call_operand.vmem [shape: bf16[32,32], index: 1, kind: input, shape index: {}]   ;;  %s5673_s2 = inlined_call_operand.vmem [shape: f32[1,32], index: 2, kind: input, shape index: {}]   ;;  %s5674_s3 = inlined_call_operand.vmem [shape: bf16[32,256], index: 3, kind: input, shape index: {}]   ;;  %s5675_s4 = inlined_call_operand.hbm [shape: f32[160,256], index: 4, kind: output, shape index: {}]  }
   0x1   :  { %11 = vsyncpa [#allocation3 + $0x1], 0  ;;  %s2950_s15 = smov 0   ;;  %s2952_s16 = smov 0  }
   0x2   :  { %s2954_s17 = smov 0   ;;  %s2956_s18 = smov 0  }
   0x3 LB: > { %s2971_s19 = sadd.s32 4294967295, %s2919_s18   ;;  %s2618_s20 = sadd.s32 4294967294, %s2919_s18   ;;  %s2919_s18 = sphi %s2956_s18, %s6211_s18   ;;  %s2915_s17 = sphi %s2954_s17, %s6210_s17   ;;  %s2911_s16 = sphi %s2952_s16, %s6209_s16   ;;  %s2907_s15 = sphi %s2950_s15, %s6208_s15  }
   0x4   : > { %s2975_s21 = sadd.s32 1, %s2919_s18   ;;  %s113_s22 = sadd.s32 1, %s2915_s17 }
   0x5   : > { %s110_s23 = ssub.s32 %s2919_s18, %s2975_s21  ;;  %p123_p0 = scmp.ne.s32.totalorder %s2915_s17, %s2911_s16 }
   0x6   : > { %p111_p1 = scmp.eq.s32.totalorder %s110_s23, 0  ;;  %p124_p2 = scmp.eq.s32.totalorder %s2971_s19, 1 }
   0x7   : > { %p129_p3 = scmp.ne.s32.totalorder %s2911_s16, %s2907_s15  ;;  %p130_p4 = scmp.eq.s32.totalorder %s2618_s20, 1 }
   0x8   : > { %s2986_s24 = scalar_select %p111_p1, %s2915_s17, %s113_s22  }
   0x9   : > { %p2988_p5 = por %p124_p2, %p123_p0  ;;  %p2992_p6 = por %p130_p4, %p129_p3 }
   0xa   : > { %p2621_p7 = scmp.ge.s32.totalorder %s2919_s18, 1  ;;  %p174_p8 = scmp.lt.s32.totalorder %s2919_s18, 3 }
   0xc   : > { %p175_p9 = pnand %p2621_p7, %p174_p8 }
   0xe   : > { %178 = sbr.rel (%p175_p9) target bundleno = 2343 (0x927), region = 36 }
  0x15   : > { %v2745_v0 = vld [vmem:[%s5672_s1] sm:$0xff]   ;;  %s3002_s29 = sshll.u32 %s2971_s19, 4  ;;  %v2746_v1 = vld [vmem:[%s5672_s1 + $0x8] sm:$0xff]   ;;  %vm304_vm0 = vcmask 261120   ;;  %v2760_v12 = vld [vmem:[%s5674_s3 + $0x14] ss:$8 sps:$4 sm:$0xff]  }
  0x16   : > { %p209_p10 = scmp.lt.s32.totalorder %s3002_s29, 19  ;;  %2680 = vmatprep.subr.bf16.mxu0 %v2745_v0  ;;  %v2755_v10 = vld [vmem:[%s5674_s3] ss:$8 sps:$4 sm:$0xff]   ;;  %v2757_v11 = vld [vmem:[%s5674_s3 + $0x4] ss:$8 sps:$4 sm:$0xff]   ;;  %v2921_v14 = vmov 0  }
  0x17   : > { %2681 = vmatpush3.bf16.msra.mxu0 %v2745_v0  ;;  %2700 = vmatprep.subr.bf16.mxu1 %v2757_v11  ;;  %v2758_v13 = vld [vmem:[%s5674_s3 + $0x10] ss:$8 sps:$4 sm:$0xff]   ;;  %v3037_v15 = vld [vmem:[%s5673_s2] ss:$0 sm:$0xff]  ;;  %s201_s5 = sand.u32 1, %s2911_s16   ;;  %s2543_s9 = ssub.s32 (%p2988_p5), 20, %s3002_s29 }
  0x18   : > { %s210_s6 = scalar_select %p209_p10, %s3002_s29, 19  ;;  %2682 = vmatprep.subr.bf16.mxu0 %v2746_v1  ;;  %2702 = vmatpush1.bf16.msra.mxu1 %v2755_v10 }
  0x19   : > { %2701 = vmatprep.subr.bf16.mxu1 %v2760_v12  ;;  %550 = vmatprep.mubr.bf16.mxu1 %v2921_v14  ;;  %s5610_s8 = scalar_lea.sflag [#allocation3], %s201_s5  ;;  %p2544_p11 = scmp.lt.s32.totalorder (%p2988_p5), %s2543_s9, 16 }
  0x1a   : > { %s2624_s7 = sshll.u32 %s210_s6, 2  ;;  %s2622_s6 = sshll.u32 %s201_s5, 8 }
  0x1b   : > { %s212_s10 = scalar_lea.vmem %s5671_s0, %s2624_s7  ;;  %2683 = vmatpush3.bf16.msra.mxu0 %v2746_v1  ;;  %s5487_s7 = scalar_lea.vmem [#allocation2], %s2622_s6 }
  0x1c   : > { %v2747_v2 = vld [vmem:[%s212_s10] sm:$0xff]   ;;  %v2748_v3 = vld [vmem:[%s212_s10 + $0x8] sm:$0xff]   ;;  %v2749_v4 = vld [vmem:[%s212_s10 + $0x10] sm:$0xff]   ;;  %498 = vmatprep.subr.bf16.mxu0 %v2757_v11  ;;  %2703 = vmatpush1.bf16.msra.mxu1 %v2758_v13 }
  0x1d   : > { %2684 = vmatprep.mubr.msk.bf16.mxu0 %vm304_vm0, %v2747_v2  ;;  %v2750_v5 = vld [vmem:[%s212_s10 + $0x18] sm:$0xff]   ;;  %v2751_v6 = vld [vmem:[%s212_s10 + $0x20] sm:$0xff]   ;;  %v2752_v7 = vld [vmem:[%s212_s10 + $0x28] sm:$0xff]  }
  0x1e   : > { %2685 = vmatmul.mubr.msk.bf16.vlgmr.msra.gmra.mrb[0].mxu0 %vm304_vm0, %v2748_v3  ;;  %v2753_v8 = vld [vmem:[%s212_s10 + $0x30] sm:$0xff]   ;;  %v2754_v9 = vld [vmem:[%s212_s10 + $0x38] sm:$0xff]  }
  0x1f   : > { %2688 = vmatprep.mubr.msk.bf16.mxu0 %vm304_vm0, %v2749_v4  ;;  %499 = vmatpush1.bf16.msra.mxu0 %v2755_v10 }
  0x20   : > { %500 = vmatprep.subr.bf16.mxu0 %v2760_v12 }
  0x23   : > { %501 = vmatpush1.bf16.msra.mxu0 %v2758_v13 }
  0x26   : > { %2689 = vmatmul.mubr.msk.bf16.gmra.mrb[4].mxu0 %vm304_vm0, %v2750_v5 }
  0x27   : > { %2692 = vmatprep.mubr.msk.bf16.mxu0 %vm304_vm0, %v2751_v6 }
  0x2e   : > { %2693 = vmatmul.mubr.msk.bf16.gmra.mrb[8].mxu0 %vm304_vm0, %v2752_v7 }
  0x2f   : > { %2696 = vmatprep.mubr.msk.bf16.mxu0 %vm304_vm0, %v2753_v8 }
  0x36   : > { %2697 = vmatmul.mubr.msk.bf16.gmra.mrb[12].mxu0 %vm304_vm0, %v2754_v9 }
  0x37   : > { %530 = vmatprep.mubr.bf16.mxu0 %v2921_v14 }
  0xf1   : > { %v2686_v16 = vpop.f32.mrb[0].mxu0 }
  0xf2   : > { %v372_v17 = vadd.f32 %v2686_v16, %v3037_v15  ;;  %v363_v18 = vpop.f32.mrb[1].mxu0 }
  0xf3   : > { %v364_v19 = vadd.f32 %v3037_v15, %v363_v18  ;;  %v2687_v20 = vpop.f32.mrb[2].mxu0 }
  0xf4   : > { %2761 = vtanh.f32 %v372_v17  ;;  %v375_v21 = vadd.f32 %v2687_v20, %v3037_v15  ;;  %v366_v22 = vpop.f32.mrb[3].mxu0 }
  0xf5   : > { %2763 = vtanh.f32 %v364_v19  ;;  %v367_v23 = vadd.f32 %v3037_v15, %v366_v22 }
  0xf6   : > { %2765 = vtanh.f32 %v375_v21 }
  0xf7   : > { %2767 = vtanh.f32 %v367_v23 }
  0xf9   : > { %v2690_v24 = vpop.f32.mrb[4].mxu0 }
  0xfa   : > { %v388_v25 = vadd.f32 %v2690_v24, %v3037_v15  ;;  %v379_v26 = vpop.f32.mrb[5].mxu0 }
  0xfb   : > { %v380_v27 = vadd.f32 %v3037_v15, %v379_v26  ;;  %v2691_v28 = vpop.f32.mrb[6].mxu0 }
  0xfc   : > { %2769 = vtanh.f32 %v388_v25  ;;  %v391_v29 = vadd.f32 %v2691_v28, %v3037_v15  ;;  %v382_v30 = vpop.f32.mrb[7].mxu0 }
  0xfd   : > { %2771 = vtanh.f32 %v380_v27  ;;  %v383_v31 = vadd.f32 %v3037_v15, %v382_v30 }
  0xfe   : > { %v2762_v32 = vpop.eup %2761  ;;  %2773 = vtanh.f32 %v391_v29 }
  0xff   : > { %v2764_v33 = vpop.eup %2763  ;;  %2775 = vtanh.f32 %v383_v31 }
 0x100   : > { %v2766_v34 = vpop.eup %2765 }
 0x101   : > { %v2768_v35 = vpop.eup %2767  ;;  %v2694_v36 = vpop.f32.mrb[8].mxu0  ;;  %v443_v37 = vpack.c.bf16 %v2766_v34, %v2762_v32 }
 0x102   : > { %v442_v38 = vpack.c.bf16 %v2768_v35, %v2764_v33  ;;  %v404_v39 = vadd.f32 %v2694_v36, %v3037_v15  ;;  %v395_v40 = vpop.f32.mrb[9].mxu0 }
 0x103   : > { %v396_v41 = vadd.f32 %v3037_v15, %v395_v40  ;;  %v2695_v42 = vpop.f32.mrb[10].mxu0 }
 0x104   : > { %2648 = vmatmul.mubr.msk.bf16.vlgmr.msra.gmra.mrb[16].mxu0 %vm304_vm0, %v442_v38  ;;  %2777 = vtanh.f32 %v404_v39  ;;  %v407_v43 = vadd.f32 %v2695_v42, %v3037_v15  ;;  %v398_v44 = vpop.f32.mrb[11].mxu0 }
 0x105   : > { %2779 = vtanh.f32 %v396_v41  ;;  %v399_v45 = vadd.f32 %v3037_v15, %v398_v44  ;;  %540 = vmatprep.mubr.bf16.mxu0 %v2921_v14 }
 0x106   : > { %v2770_v46 = vpop.eup %2769  ;;  %2781 = vtanh.f32 %v407_v43 }
 0x107   : > { %v2772_v47 = vpop.eup %2771  ;;  %2783 = vtanh.f32 %v399_v45 }
 0x108   : > { %v2774_v48 = vpop.eup %2773 }
 0x109   : > { %v2776_v49 = vpop.eup %2775  ;;  %v445_v50 = vpack.c.bf16 %v2774_v48, %v2770_v46  ;;  %v2698_v51 = vpop.f32.mrb[12].mxu0 }
 0x10a   : > { %v444_v52 = vpack.c.bf16 %v2776_v49, %v2772_v47  ;;  %v420_v53 = vadd.f32 %v2698_v51, %v3037_v15  ;;  %v411_v54 = vpop.f32.mrb[13].mxu0 }
 0x10b   : > { %v412_v55 = vadd.f32 %v3037_v15, %v411_v54  ;;  %v2699_v56 = vpop.f32.mrb[14].mxu0 }
 0x10c   : > { %2649 = vmatmul.mubr.msk.bf16.gmra.mrb[20].mxu0 %vm304_vm0, %v443_v37  ;;  %2650 = vmatmul.mubr.msk.bf16.vlgmr.msra.gmra.mrb[0].mxu1 %vm304_vm0, %v444_v52  ;;  %2785 = vtanh.f32 %v420_v53  ;;  %v423_v57 = vadd.f32 %v2699_v56, %v3037_v15  ;;  %v414_v58 = vpop.f32.mrb[15].mxu0 }
 0x10d   : > { %560 = vmatprep.mubr.bf16.mxu1 %v2921_v14  ;;  %2787 = vtanh.f32 %v412_v55  ;;  %v415_v59 = vadd.f32 %v3037_v15, %v414_v58 }
 0x10e   : > { %v2778_v60 = vpop.eup %2777  ;;  %2789 = vtanh.f32 %v423_v57 }
 0x10f   : > { %v2780_v61 = vpop.eup %2779  ;;  %2791 = vtanh.f32 %v415_v59 }
 0x110   : > { %v2782_v62 = vpop.eup %2781 }
 0x111   : > { %v2784_v63 = vpop.eup %2783  ;;  %v447_v0 = vpack.c.bf16 %v2782_v62, %v2778_v60 }
 0x112   : > { %v446_v1 = vpack.c.bf16 %v2784_v63, %v2780_v61 }
 0x114   : > { %2651 = vmatmul.mubr.msk.bf16.gmra.mrb[4].mxu1 %vm304_vm0, %v445_v50 }
 0x115   : > { %570 = vmatprep.mubr.bf16.mxu1 %v2921_v14 }
 0x116   : > { %v2786_v2 = vpop.eup %2785 }
 0x117   : > { %v2788_v3 = vpop.eup %2787 }
 0x118   : > { %v2790_v4 = vpop.eup %2789 }
 0x119   : > { %v2792_v5 = vpop.eup %2791  ;;  %v449_v6 = vpack.c.bf16 %v2790_v4, %v2786_v2 }
 0x11a   : > { %v448_v7 = vpack.c.bf16 %v2792_v5, %v2788_v3 }
 0x11c   : > { %2652 = vmatmul.mubr.msk.bf16.gmra.mrb[8].mxu1 %vm304_vm0, %v446_v1 }
 0x11d   : > { %580 = vmatprep.mubr.bf16.mxu1 %v2921_v14 }
 0x124   : > { %2653 = vmatmul.mubr.msk.bf16.gmra.mrb[12].mxu1 %vm304_vm0, %v447_v0 }
 0x125   : > { %590 = vmatprep.mubr.bf16.mxu1 %v2921_v14 }
 0x12c   : > { %2654 = vmatmul.mubr.msk.bf16.gmra.mrb[16].mxu1 %vm304_vm0, %v448_v7 }
 0x12d   : > { %600 = vmatprep.mubr.bf16.mxu1 %v2921_v14 }
 0x134   : > { %2655 = vmatmul.mubr.msk.bf16.gmra.mrb[20].mxu1 %vm304_vm0, %v449_v6 }
 0x1d7   : > { %v532_v8 = vpop.f32.mrb[16].mxu0 }
 0x1d8   : > { %v3069_v9 = vmax.f32 %v532_v8, 0.0  ;;  %v534_v10 = vpop.f32.mrb[17].mxu0 }
 0x1d9   : > { %v3071_v11 = vmax.f32 %v534_v10, 0.0  ;;  %v536_v12 = vpop.f32.mrb[18].mxu0 }
 0x1da   : > { %v538_v13 = vpop.f32.mrb[19].mxu0  ;;  %v3073_v15 = vmax.f32 %v536_v12, 0.0 }
 0x1db   : > { %v3075_v16 = vmax.f32 %v538_v13, 0.0  ;;  %v646_v17 = vmax.f32 %v3069_v9, %v3071_v11 }
 0x1dd   : > { %647 = vmax.xlane.f32.xlu0 %v646_v17  ;;  %v649_v19 = vmax.f32 %v3073_v15, %v3075_v16 }
 0x1df   : > { %v542_v18 = vpop.f32.mrb[20].mxu0  ;;  %v552_v14 = vpop.f32.mrb[0].mxu1 }
 0x1e0   : > { %v3081_v20 = vmax.f32 %v542_v18, 0.0  ;;  %v3083_v21 = vmax.f32 %v552_v14, 0.0  ;;  %v544_v22 = vpop.f32.mrb[21].mxu0  ;;  %v554_v23 = vpop.f32.mrb[1].mxu1 }
 0x1e1   : > { %v3085_v24 = vmax.f32 %v544_v22, 0.0  ;;  %v3087_v25 = vmax.f32 %v554_v23, 0.0  ;;  %v556_v26 = vpop.f32.mrb[2].mxu1  ;;  %650 = vmax.xlane.f32.xlu0 %v649_v19  ;;  %v546_v27 = vpop.f32.mrb[22].mxu0 }
 0x1e2   : > { %v548_v28 = vpop.f32.mrb[23].mxu0  ;;  %v558_v29 = vpop.f32.mrb[3].mxu1  ;;  %v3089_v30 = vmax.f32 %v546_v27, 0.0  ;;  %v3097_v34 = vmax.f32 %v556_v26, 0.0 }
 0x1e3   : > { %v3091_v31 = vmax.f32 %v548_v28, 0.0  ;;  %v658_v32 = vmax.f32 %v3083_v21, %v3087_v25  ;;  %v652_v33 = vmax.f32 %v3081_v20, %v3085_v24  ;;  %v3099_v35 = vmax.f32 %v558_v29, 0.0 }
 0x1e5   : > { %659 = vmax.xlane.f32.xlu0 %v658_v32  ;;  %653 = vmax.xlane.f32.xlu1 %v652_v33  ;;  %v655_v37 = vmax.f32 %v3089_v30, %v3091_v31  ;;  %v661_v46 = vmax.f32 %v3097_v34, %v3099_v35 }
 0x1e7   : > { %v562_v36 = vpop.f32.mrb[4].mxu1 }
 0x1e8   : > { %v3103_v38 = vmax.f32 %v562_v36, 0.0  ;;  %v564_v39 = vpop.f32.mrb[5].mxu1  ;;  %v643_v36 = vlaneseq }
 0x1e9   : > { %v3105_v40 = vmax.f32 %v564_v39, 0.0  ;;  %v566_v41 = vpop.f32.mrb[6].mxu1  ;;  %656 = vmax.xlane.f32.xlu1 %v655_v37 }
 0x1ea   : > { %v568_v42 = vpop.f32.mrb[7].mxu1  ;;  %v3107_v43 = vmax.f32 %v566_v41, 0.0  ;;  %v3165_v37 = vand.u32 127, %v643_v36 }
 0x1eb   : > { %v3109_v44 = vmax.f32 %v568_v42, 0.0  ;;  %v664_v45 = vmax.f32 %v3103_v38, %v3105_v40 }
 0x1ec   : > { %v3168_v39 = vadd.s32 128, %v3165_v37 }
 0x1ed   : > { %665 = vmax.xlane.f32.xlu0 %v664_v45  ;;  %662 = vmax.xlane.f32.xlu1 %v661_v46  ;;  %v667_v48 = vmax.f32 %v3107_v43, %v3109_v44 }
 0x1ef   : > { %v572_v47 = vpop.f32.mrb[8].mxu1 }
 0x1f0   : > { %v3117_v49 = vmax.f32 %v572_v47, 0.0  ;;  %v574_v50 = vpop.f32.mrb[9].mxu1 }
 0x1f1   : > { %v3119_v51 = vmax.f32 %v574_v50, 0.0  ;;  %v576_v52 = vpop.f32.mrb[10].mxu1  ;;  %668 = vmax.xlane.f32.xlu1 %v667_v48 }
 0x1f2   : > { %v3121_v53 = vmax.f32 %v576_v52, 0.0  ;;  %v578_v54 = vpop.f32.mrb[11].mxu1 }
 0x1f3   : > { %v3123_v55 = vmax.f32 %v578_v54, 0.0  ;;  %v670_v56 = vmax.f32 %v3117_v49, %v3119_v51 }
 0x1f5   : > { %671 = vmax.xlane.f32.xlu0 %v670_v56  ;;  %v673_v57 = vmax.f32 %v3121_v53, %v3123_v55 }
 0x1f7   : > { %v582_v58 = vpop.f32.mrb[12].mxu1  ;;  %674 = vmax.xlane.f32.xlu1 %v673_v57 }
 0x1f8   : > { %v3129_v59 = vmax.f32 %v582_v58, 0.0  ;;  %v584_v60 = vpop.f32.mrb[13].mxu1 }
 0x1f9   : > { %v3131_v61 = vmax.f32 %v584_v60, 0.0  ;;  %v586_v62 = vpop.f32.mrb[14].mxu1 }
 0x1fa   : > { %5872 = vst [vmem:[#allocation5_spill] sm:$0xff] %v3129_v59  ;;  %v3133_v63 = vmax.f32 %v586_v62, 0.0  ;;  %v588_v0 = vpop.f32.mrb[15].mxu1 }
 0x1fb   : > { %5873 = vst [vmem:[#allocation6_spill] sm:$0xff] %v3131_v61  ;;  %v3135_v1 = vmax.f32 %v588_v0, 0.0  ;;  %v676_v2 = vmax.f32 %v3129_v59, %v3131_v61 }
 0x1fc   : > { %5874 = vst [vmem:[#allocation7_spill] sm:$0xff] %v3133_v63 }
 0x1fd   : > { %5875 = vst [vmem:[#allocation8_spill] sm:$0xff] %v3135_v1  ;;  %677 = vmax.xlane.f32.xlu0 %v676_v2  ;;  %v679_v3 = vmax.f32 %v3133_v63, %v3135_v1 }
 0x1ff   : > { %v592_v4 = vpop.f32.mrb[16].mxu1  ;;  %680 = vmax.xlane.f32.xlu1 %v679_v3 }
 0x200   : > { %v3141_v5 = vmax.f32 %v592_v4, 0.0  ;;  %v594_v6 = vpop.f32.mrb[17].mxu1 }
 0x201   : > { %v3143_v7 = vmax.f32 %v594_v6, 0.0  ;;  %v596_v8 = vpop.f32.mrb[18].mxu1 }
 0x202   : > { %5876 = vst [vmem:[#allocation9_spill] sm:$0xff] %v3141_v5  ;;  %v3145_v10 = vmax.f32 %v596_v8, 0.0  ;;  %v598_v12 = vpop.f32.mrb[19].mxu1 }
 0x203   : > { %5877 = vst [vmem:[#allocation10_spill] sm:$0xff] %v3143_v7  ;;  %v3147_v13 = vmax.f32 %v598_v12, 0.0  ;;  %v682_v17 = vmax.f32 %v3141_v5, %v3143_v7 }
 0x204   : > { %5878 = vst [vmem:[#allocation11_spill] sm:$0xff] %v3145_v10 }
 0x205   : > { %5879 = vst [vmem:[#allocation12_spill] sm:$0xff] %v3147_v13  ;;  %683 = vmax.xlane.f32.xlu0 %v682_v17  ;;  %v685_v18 = vmax.f32 %v3145_v10, %v3147_v13 }
 0x207   : > { %v602_v14 = vpop.f32.mrb[20].mxu1  ;;  %686 = vmax.xlane.f32.xlu1 %v685_v18 }
 0x208   : > { %v3153_v19 = vmax.f32 %v602_v14, 0.0  ;;  %v604_v22 = vpop.f32.mrb[21].mxu1 }
 0x209   : > { %v3155_v23 = vmax.f32 %v604_v22, 0.0  ;;  %v606_v26 = vpop.f32.mrb[22].mxu1 }
 0x20a   : > { %5880 = vst [vmem:[#allocation13_spill] sm:$0xff] %v3153_v19  ;;  %v3157_v27 = vmax.f32 %v606_v26, 0.0  ;;  %v608_v28 = vpop.f32.mrb[23].mxu1 }
 0x20b   : > { %5881 = vst [vmem:[#allocation14_spill] sm:$0xff] %v3155_v23  ;;  %v3159_v29 = vmax.f32 %v608_v28, 0.0  ;;  %v688_v32 = vmax.f32 %v3153_v19, %v3155_v23 }
 0x20c   : > { %5882 = vst [vmem:[#allocation15_spill] sm:$0xff] %v3157_v27 }
 0x20d   : > { %5883 = vst [vmem:[#allocation16_spill] sm:$0xff] %v3159_v29  ;;  %689 = vmax.xlane.f32.xlu0 %v688_v32  ;;  %v691_v33 = vmax.f32 %v3157_v27, %v3159_v29 }
 0x20f   : > { %692 = vmax.xlane.f32.xlu1 %v691_v33 }
 0x26a   : > { %v3170_v41 = vpop.xlane.xlu0 %647 }
 0x26b   : > { %5884 = vst [vmem:[#allocation17_spill] sm:$0xff] %v3170_v41  ;;  %vm694_vm1 = vcmp.eq.f32.partialorder %v3069_v9, %v3170_v41  ;;  %vm695_vm2 = vcmp.eq.f32.partialorder %v3071_v11, %v3170_v41 }
 0x26c   : > { %v726_v42 = vsel %vm694_vm1, %v3165_v37, 256  ;;  %v727_v45 = vsel %vm695_vm2, %v3168_v39, 256 }
 0x26d   : > { %vm758_vm3 = vcmp.lt.s32.totalorder %v726_v42, %v727_v45 }
 0x26e   : > { %v3178_v46 = vpop.xlane.xlu0 %650  ;;  %v3180_v47 = vsel %vm758_vm3, %v726_v42, %v727_v45 }
 0x26f   : > { %5885 = vst [vmem:[#allocation18_spill] sm:$0xff] %v3178_v46  ;;  %v761_v48 = vshra.s32 %v3180_v47, 16  ;;  %vm696_vm4 = vcmp.eq.f32.partialorder %v3073_v15, %v3178_v46  ;;  %vm697_vm5 = vcmp.eq.f32.partialorder %v3075_v16, %v3178_v46 }
 0x270   : > { %v728_v50 = vsel %vm696_vm4, %v3165_v37, 256  ;;  %v729_v52 = vsel %vm697_vm5, %v3168_v39, 256 }
 0x271   : > { %v3189_v54 = vcvt.s32.f32 %v761_v48  ;;  %vm774_vm6 = vcmp.lt.s32.totalorder %v728_v50, %v729_v52 }
 0x272   : > { %v3191_v56 = vpop.xlane.xlu0 %659  ;;  %v3193_v57 = vpop.xlane.xlu1 %653  ;;  %v3195_v58 = vsel %vm774_vm6, %v728_v50, %v729_v52 }
 0x273   : > { %5886 = vst [vmem:[#allocation19_spill] sm:$0xff] %v3191_v56  ;;  %5887 = vst [vmem:[#allocation20_spill] sm:$0xff] %v3193_v57  ;;  %764 = vmin.xlane.f32.xlu0 %v3189_v54  ;;  %v777_v60 = vshra.s32 %v3195_v58, 16  ;;  %vm698_vm7 = vcmp.eq.f32.partialorder %v3081_v20, %v3193_v57  ;;  %vm699_vm8 = vcmp.eq.f32.partialorder %v3085_v24, %v3193_v57 }
 0x274   : > { %vm702_vm9 = vcmp.eq.f32.partialorder %v3083_v21, %v3191_v56  ;;  %v730_v62 = vsel %vm698_vm7, %v3165_v37, 256  ;;  %v731_v0 = vsel %vm699_vm8, %v3168_v39, 256  ;;  %vm703_vm10 = vcmp.eq.f32.partialorder %v3087_v25, %v3191_v56 }
 0x275   : > { %v734_v2 = vsel %vm702_vm9, %v3165_v37, 256  ;;  %v3210_v3 = vcvt.s32.f32 %v777_v60  ;;  %vm790_vm11 = vcmp.lt.s32.totalorder %v730_v62, %v731_v0  ;;  %v735_v4 = vsel %vm703_vm10, %v3168_v39, 256 }
 0x276   : > { %v3213_v6 = vpop.xlane.xlu1 %656  ;;  %v3215_v8 = vsel %vm790_vm11, %v730_v62, %v731_v0  ;;  %vm822_vm12 = vcmp.lt.s32.totalorder %v734_v2, %v735_v4 }
 0x277   : > { %5888 = vst [vmem:[#allocation21_spill] sm:$0xff] %v3213_v6  ;;  %780 = vmin.xlane.f32.xlu1 %v3210_v3  ;;  %v793_v12 = vshra.s32 %v3215_v8, 16  ;;  %v3219_v17 = vsel %vm822_vm12, %v734_v2, %v735_v4  ;;  %vm700_vm13 = vcmp.eq.f32.partialorder %v3089_v30, %v3213_v6  ;;  %vm701_vm14 = vcmp.eq.f32.partialorder %v3091_v31, %v3213_v6 }
 0x278   : > { %v732_v18 = vsel %vm700_vm13, %v3165_v37, 256  ;;  %v733_v14 = vsel %vm701_vm14, %v3168_v39, 256  ;;  %v825_v26 = vshra.s32 %v3219_v17, 16 }
 0x279   : > { %v3227_v22 = vcvt.s32.f32 %v793_v12  ;;  %vm806_vm15 = vcmp.lt.s32.totalorder %v732_v18, %v733_v14 }
 0x27a   : > { %v3230_v28 = vpop.xlane.xlu0 %665  ;;  %v3232_v32 = vpop.xlane.xlu1 %662  ;;  %v3234_v33 = vsel %vm806_vm15, %v732_v18, %v733_v14  ;;  %v3249_v50 = vcvt.s32.f32 %v825_v26 }
 0x27b   : > { %5889 = vst [vmem:[#allocation22_spill] sm:$0xff] %v3230_v28  ;;  %5890 = vst [vmem:[#allocation23_spill] sm:$0xff] %v3232_v32  ;;  %796 = vmin.xlane.f32.xlu0 %v3227_v22  ;;  %v809_v36 = vshra.s32 %v3234_v33, 16  ;;  %vm706_vm0 = vcmp.eq.f32.partialorder %v3103_v38, %v3230_v28  ;;  %vm707_vm1 = vcmp.eq.f32.partialorder %v3105_v40, %v3230_v28 }
 0x27c   : > { %vm704_vm2 = vcmp.eq.f32.partialorder %v3097_v34, %v3232_v32  ;;  %v738_v42 = vsel %vm706_vm0, %v3165_v37, 256  ;;  %v739_v45 = vsel %vm707_vm1, %v3168_v39, 256  ;;  %vm705_vm3 = vcmp.eq.f32.partialorder %v3099_v35, %v3232_v32 }
 0x27d   : > { %v736_v48 = vsel %vm704_vm2, %v3165_v37, 256  ;;  %v3251_v52 = vcvt.s32.f32 %v809_v36  ;;  %vm854_vm4 = vcmp.lt.s32.totalorder %v738_v42, %v739_v45  ;;  %v737_v60 = vsel %vm705_vm3, %v3168_v39, 256 }
 0x27e   : > { %v3254_v62 = vpop.xlane.xlu1 %668  ;;  %v3256_v0 = vsel %vm854_vm4, %v738_v42, %v739_v45  ;;  %vm838_vm5 = vcmp.lt.s32.totalorder %v736_v48, %v737_v60 }
 0x27f   : > { %5891 = vst [vmem:[#allocation24_spill] sm:$0xff] %v3254_v62  ;;  %828 = vmin.xlane.f32.xlu0 %v3249_v50  ;;  %812 = vmin.xlane.f32.xlu1 %v3251_v52  ;;  %v857_v2 = vshra.s32 %v3256_v0, 16  ;;  %v3261_v4 = vsel %vm838_vm5, %v736_v48, %v737_v60  ;;  %vm708_vm6 = vcmp.eq.f32.partialorder %v3107_v43, %v3254_v62 }
 0x280   : > { %vm709_vm7 = vcmp.eq.f32.partialorder %v3109_v44, %v3254_v62  ;;  %v841_v12 = vshra.s32 %v3261_v4, 16  ;;  %v740_v18 = vsel %vm708_vm6, %v3165_v37, 256 }
 0x281   : > { %v741_v14 = vsel %vm709_vm7, %v3168_v39, 256  ;;  %v3270_v26 = vcvt.s32.f32 %v857_v2 }
 0x282   : > { %vm870_vm8 = vcmp.lt.s32.totalorder %v740_v18, %v741_v14  ;;  %v3272_v36 = vpop.xlane.xlu0 %671  ;;  %v3274_v42 = vcvt.s32.f32 %v841_v12 }
 0x283   : > { %5892 = vst [vmem:[#allocation25_spill] sm:$0xff] %v3272_v36  ;;  %v3276_v45 = vsel %vm870_vm8, %v740_v18, %v741_v14  ;;  %860 = vmin.xlane.f32.xlu0 %v3270_v26  ;;  %vm710_vm9 = vcmp.eq.f32.partialorder %v3117_v49, %v3272_v36  ;;  %vm711_vm10 = vcmp.eq.f32.partialorder %v3119_v51, %v3272_v36 }
 0x284   : > { %v873_v48 = vshra.s32 %v3276_v45, 16  ;;  %844 = vmin.xlane.f32.xlu1 %v3274_v42  ;;  %v3285_v60 = vpop.xlane.xlu1 %674  ;;  %v742_v2 = vsel %vm710_vm9, %v3165_v37, 256  ;;  %v743_v12 = vsel %vm711_vm10, %v3168_v39, 256 }
 0x285   : > { %5893 = vst [vmem:[#allocation26_spill] sm:$0xff] %v3285_v60  ;;  %vm886_vm11 = vcmp.lt.s32.totalorder %v742_v2, %v743_v12  ;;  %vm712_vm12 = vcmp.eq.f32.partialorder %v3121_v53, %v3285_v60  ;;  %vm713_vm13 = vcmp.eq.f32.partialorder %v3123_v55, %v3285_v60 }
 0x286   : > { %v3289_v18 = vcvt.s32.f32 %v873_v48  ;;  %v3295_v14 = vsel %vm886_vm11, %v742_v2, %v743_v12  ;;  %v744_v36 = vsel %vm712_vm12, %v3165_v37, 256  ;;  %v745_v62 = vsel %vm713_vm13, %v3168_v39, 256 }
 0x287   : > { %v889_v32 = vshra.s32 %v3295_v14, 16  ;;  %vm902_vm14 = vcmp.lt.s32.totalorder %v744_v36, %v745_v62 }
 0x288   : > { %876 = vmin.xlane.f32.xlu1 %v3289_v18  ;;  %v3301_v48 = vsel %vm902_vm14, %v744_v36, %v745_v62 }
 0x289   : > { %v3303_v28 = vcvt.s32.f32 %v889_v32  ;;  %v905_v6 = vshra.s32 %v3301_v48, 16 }
 0x28a   : > { %v3306_v56 = vpop.xlane.xlu0 %677 }
 0x28b   : > { %5894 = vst [vmem:[#allocation27_spill] sm:$0xff] %v3306_v56  ;;  %892 = vmin.xlane.f32.xlu0 %v3303_v28  ;;  %v3309_v2 = vcvt.s32.f32 %v905_v6  ;;  %vm714_vm15 = vcmp.eq.f32.partialorder %v3129_v59, %v3306_v56  ;;  %vm715_vm0 = vcmp.eq.f32.partialorder %v3131_v61, %v3306_v56  ;;  %v808_v59 = vand.u32 65535, %v3234_v33 }
 0x28c   : > { %v3315_v12 = vpop.xlane.xlu1 %680  ;;  %v746_v62 = vsel %vm714_vm15, %v3165_v37, 256  ;;  %v747_v32 = vsel %vm715_vm0, %v3168_v39, 256 }
 0x28d   : > { %5895 = vst [vmem:[#allocation28_spill] sm:$0xff] %v3315_v12  ;;  %908 = vmin.xlane.f32.xlu1 %v3309_v2  ;;  %vm918_vm1 = vcmp.lt.s32.totalorder %v746_v62, %v747_v32  ;;  %vm716_vm2 = vcmp.eq.f32.partialorder %v3133_v63, %v3315_v12  ;;  %vm717_vm3 = vcmp.eq.f32.partialorder %v3135_v1, %v3315_v12 }
 0x28e   : > { %v3324_v6 = vsel %vm918_vm1, %v746_v62, %v747_v32  ;;  %v748_v36 = vsel %vm716_vm2, %v3165_v37, 256  ;;  %v749_v56 = vsel %vm717_vm3, %v3168_v39, 256 }
 0x28f   : > { %v921_v60 = vshra.s32 %v3324_v6, 16  ;;  %vm934_vm4 = vcmp.lt.s32.totalorder %v748_v36, %v749_v56 }
 0x290   : > { %v3329_v57 = vsel %vm934_vm4, %v748_v36, %v749_v56 }
 0x291   : > { %v3331_v46 = vcvt.s32.f32 %v921_v60  ;;  %v937_v41 = vshra.s32 %v3329_v57, 16 }
 0x292   : > { %v3334_v61 = vpop.xlane.xlu0 %683 }
 0x293   : > { %5896 = vst [vmem:[#allocation29_spill] sm:$0xff] %v3334_v61  ;;  %924 = vmin.xlane.f32.xlu0 %v3331_v46  ;;  %v3337_v12 = vcvt.s32.f32 %v937_v41  ;;  %vm718_vm5 = vcmp.eq.f32.partialorder %v3141_v5, %v3334_v61  ;;  %vm719_vm6 = vcmp.eq.f32.partialorder %v3143_v7, %v3334_v61 }
 0x294   : > { %v3343_v62 = vpop.xlane.xlu1 %686  ;;  %v750_v56 = vsel %vm718_vm5, %v3165_v37, 256  ;;  %v751_v60 = vsel %vm719_vm6, %v3168_v39, 256 }
 0x295   : > { %5897 = vst [vmem:[#allocation30_spill] sm:$0xff] %v3343_v62  ;;  %940 = vmin.xlane.f32.xlu1 %v3337_v12  ;;  %vm950_vm7 = vcmp.lt.s32.totalorder %v750_v56, %v751_v60  ;;  %vm720_vm8 = vcmp.eq.f32.partialorder %v3145_v10, %v3343_v62  ;;  %vm721_vm9 = vcmp.eq.f32.partialorder %v3147_v13, %v3343_v62 }
 0x296   : > { %v3352_v41 = vsel %vm950_vm7, %v750_v56, %v751_v60  ;;  %v752_v32 = vsel %vm720_vm8, %v3165_v37, 256  ;;  %v753_v36 = vsel %vm721_vm9, %v3168_v39, 256 }
 0x297   : > { %v953_v61 = vshra.s32 %v3352_v41, 16  ;;  %vm966_vm10 = vcmp.lt.s32.totalorder %v752_v32, %v753_v36 }
 0x298   : > { %v3357_v7 = vsel %vm966_vm10, %v752_v32, %v753_v36 }
 0x299   : > { %v3359_v5 = vcvt.s32.f32 %v953_v61  ;;  %v969_v1 = vshra.s32 %v3357_v7, 16 }
 0x29a   : > { %v3362_v63 = vpop.xlane.xlu0 %689 }
 0x29b   : > { %5898 = vst [vmem:[#allocation31_spill] sm:$0xff] %v3362_v63  ;;  %956 = vmin.xlane.f32.xlu0 %v3359_v5  ;;  %v3365_v62 = vcvt.s32.f32 %v969_v1  ;;  %vm722_vm11 = vcmp.eq.f32.partialorder %v3153_v19, %v3362_v63  ;;  %vm723_vm12 = vcmp.eq.f32.partialorder %v3155_v23, %v3362_v63 }
 0x29c   : > { %v3371_v56 = vpop.xlane.xlu1 %692  ;;  %v754_v60 = vsel %vm722_vm11, %v3165_v37, 256  ;;  %v755_v61 = vsel %vm723_vm12, %v3168_v39, 256 }
 0x29d   : > { %5899 = vst [vmem:[#allocation32_spill] sm:$0xff] %v3371_v56  ;;  %972 = vmin.xlane.f32.xlu1 %v3365_v62  ;;  %vm982_vm13 = vcmp.lt.s32.totalorder %v754_v60, %v755_v61  ;;  %vm724_vm14 = vcmp.eq.f32.partialorder %v3157_v27, %v3371_v56  ;;  %vm725_vm15 = vcmp.eq.f32.partialorder %v3159_v29, %v3371_v56  ;;  %v776_v29 = vand.u32 65535, %v3195_v58 }
 0x29e   : > { %v3380_v1 = vsel %vm982_vm13, %v754_v60, %v755_v61  ;;  %v756_v32 = vsel %vm724_vm14, %v3165_v37, 256  ;;  %v757_v36 = vsel %vm725_vm15, %v3168_v39, 256  ;;  %v760_v60 = vand.u32 65535, %v3180_v47 }
 0x29f   : > { %v985_v63 = vshra.s32 %v3380_v1, 16  ;;  %vm998_vm0 = vcmp.lt.s32.totalorder %v756_v32, %v757_v36  ;;  %v824_v58 = vand.u32 65535, %v3219_v17  ;;  %v840_v17 = vand.u32 65535, %v3261_v4 }
 0x2a0   : > { %v3385_v23 = vsel %vm998_vm0, %v756_v32, %v757_v36  ;;  %v762_v56 = vcvt.s32.f32 %v760_v60  ;;  %v778_v36 = vcvt.s32.f32 %v776_v29  ;;  %v888_v4 = vand.u32 65535, %v3295_v14 }
 0x2a1   : > { %v3387_v19 = vcvt.s32.f32 %v985_v63  ;;  %v1001_v13 = vshra.s32 %v3385_v23, 16 }
 0x2a3   : > { %988 = vmin.xlane.f32.xlu0 %v3387_v19  ;;  %v3391_v27 = vcvt.s32.f32 %v1001_v13  ;;  %v792_v13 = vand.u32 65535, %v3215_v8 }
 0x2a5   : > { %1004 = vmin.xlane.f32.xlu1 %v3391_v27  ;;  %v794_v60 = vcvt.s32.f32 %v792_v13 }
 0x300   : > { %v3395_v61 = vpop.xlane.xlu0 %764 }
 0x301   : > { %vm766_vm1 = vcmp.eq.f32.partialorder %v3189_v54, %v3395_v61 }
 0x302   : > { %v767_v63 = vsel %vm766_vm1, %v762_v56, inf  ;;  %v826_v56 = vcvt.s32.f32 %v824_v58 }
 0x303   : > { %768 = vmin.xlane.f32.xlu0 %v767_v63 }
 0x304   : > { %v3400_v32 = vpop.xlane.xlu1 %780 }
 0x305   : > { %vm782_vm2 = vcmp.eq.f32.partialorder %v3210_v3, %v3400_v32  ;;  %v810_v3 = vcvt.s32.f32 %v808_v59  ;;  %v842_v59 = vcvt.s32.f32 %v840_v17 }
 0x306   : > { %v783_v10 = vsel %vm782_vm2, %v778_v36, inf }
 0x307   : > { %784 = vmin.xlane.f32.xlu1 %v783_v10  ;;  %v856_v10 = vand.u32 65535, %v3256_v0 }
 0x308   : > { %v3405_v47 = vpop.xlane.xlu0 %796 }
 0x309   : > { %vm798_vm3 = vcmp.eq.f32.partialorder %v3227_v22, %v3405_v47  ;;  %v858_v36 = vcvt.s32.f32 %v856_v10 }
 0x30a   : > { %v799_v54 = vsel %vm798_vm3, %v794_v60, inf }
 0x30b   : > { %800 = vmin.xlane.f32.xlu0 %v799_v54 }
 0x30c   : > { %v3411_v29 = vpop.xlane.xlu0 %828  ;;  %v3413_v8 = vpop.xlane.xlu1 %812 }
 0x30d   : > { %vm830_vm4 = vcmp.eq.f32.partialorder %v3249_v50, %v3411_v29  ;;  %vm814_vm5 = vcmp.eq.f32.partialorder %v3251_v52, %v3413_v8  ;;  %v872_v50 = vand.u32 65535, %v3276_v45 }
 0x30e   : > { %v831_v33 = vsel %vm830_vm4, %v826_v56, inf  ;;  %v815_v22 = vsel %vm814_vm5, %v810_v3, inf  ;;  %v890_v56 = vcvt.s32.f32 %v888_v4 }
 0x30f   : > { %832 = vmin.xlane.f32.xlu0 %v831_v33  ;;  %816 = vmin.xlane.f32.xlu1 %v815_v22  ;;  %v874_v58 = vcvt.s32.f32 %v872_v50 }
 0x310   : > { %v3421_v63 = vpop.xlane.xlu0 %860 }
 0x311   : > { %v3423_v13 = vpop.xlane.xlu1 %844  ;;  %vm862_vm6 = vcmp.eq.f32.partialorder %v3270_v26, %v3421_v63  ;;  %v904_v26 = vand.u32 65535, %v3301_v48  ;;  %v936_v48 = vand.u32 65535, %v3329_v57  ;;  %v968_v57 = vand.u32 65535, %v3357_v7 }
 0x312   : > { %v863_v0 = vsel %vm862_vm6, %v858_v36, inf  ;;  %vm846_vm7 = vcmp.eq.f32.partialorder %v3274_v42, %v3423_v13  ;;  %v1000_v7 = vand.u32 65535, %v3385_v23  ;;  %v787_v23 = vcvt.f32.s32 %v3400_v32 }
 0x313   : > { %864 = vmin.xlane.f32.xlu0 %v863_v0  ;;  %v847_v52 = vsel %vm846_vm7, %v842_v59, inf  ;;  %v906_v14 = vcvt.s32.f32 %v904_v26  ;;  %v938_v36 = vcvt.s32.f32 %v936_v48  ;;  %v803_v48 = vcvt.f32.s32 %v3405_v47 }
 0x314   : > { %848 = vmin.xlane.f32.xlu1 %v847_v52  ;;  %v970_v52 = vcvt.s32.f32 %v968_v57 }
 0x315   : > { %v3431_v60 = vpop.xlane.xlu1 %876 }
 0x316   : > { %vm878_vm8 = vcmp.eq.f32.partialorder %v3289_v18, %v3431_v60  ;;  %v920_v18 = vand.u32 65535, %v3324_v6  ;;  %v952_v6 = vand.u32 65535, %v3352_v41  ;;  %v984_v41 = vand.u32 65535, %v3380_v1 }
 0x317   : > { %v879_v54 = vsel %vm878_vm8, %v874_v58, inf  ;;  %v771_v1 = vcvt.f32.s32 %v3395_v61 }
 0x318   : > { %880 = vmin.xlane.f32.xlu1 %v879_v54  ;;  %v3436_v45 = vpop.xlane.xlu0 %892  ;;  %v922_v33 = vcvt.s32.f32 %v920_v18  ;;  %v954_v50 = vcvt.s32.f32 %v952_v6  ;;  %v986_v58 = vcvt.s32.f32 %v984_v41  ;;  %v1002_v54 = vcvt.s32.f32 %v1000_v7 }
 0x319   : > { %vm894_vm9 = vcmp.eq.f32.partialorder %v3303_v28, %v3436_v45  ;;  %v804_v6 = vshll.u32 %v803_v48, 16 }
 0x31a   : > { %v3440_v42 = vpop.xlane.xlu1 %908  ;;  %v895_v3 = vsel %vm894_vm9, %v890_v56, inf }
 0x31b   : > { %896 = vmin.xlane.f32.xlu0 %v895_v3  ;;  %vm910_vm10 = vcmp.eq.f32.partialorder %v3309_v2, %v3440_v42  ;;  %v772_v3 = vshll.u32 %v771_v1, 16 }
 0x31c   : > { %v911_v10 = vsel %vm910_vm10, %v906_v14, inf }
 0x31d   : > { %912 = vmin.xlane.f32.xlu1 %v911_v10 }
 0x320   : > { %v3446_v17 = vpop.xlane.xlu0 %924 }
 0x321   : > { %vm926_vm11 = vcmp.eq.f32.partialorder %v3331_v46, %v3446_v17 }
 0x322   : > { %v3450_v28 = vpop.xlane.xlu1 %940  ;;  %v927_v22 = vsel %vm926_vm11, %v922_v33, inf }
 0x323   : > { %928 = vmin.xlane.f32.xlu0 %v927_v22  ;;  %vm942_vm12 = vcmp.eq.f32.partialorder %v3337_v12, %v3450_v28  ;;  %v835_v22 = vcvt.f32.s32 %v3411_v29 }
 0x324   : > { %v943_v2 = vsel %vm942_vm12, %v938_v36, inf  ;;  %v819_v36 = vcvt.f32.s32 %v3413_v8 }
 0x325   : > { %944 = vmin.xlane.f32.xlu1 %v943_v2 }
 0x328   : > { %v3456_v59 = vpop.xlane.xlu0 %956 }
 0x329   : > { %vm958_vm13 = vcmp.eq.f32.partialorder %v3359_v5, %v3456_v59 }
 0x32a   : > { %v3460_v46 = vpop.xlane.xlu1 %972  ;;  %v959_v0 = vsel %vm958_vm13, %v954_v50, inf  ;;  %v836_v50 = vshll.u32 %v835_v22, 16 }
 0x32b   : > { %960 = vmin.xlane.f32.xlu0 %v959_v0  ;;  %vm974_vm14 = vcmp.eq.f32.partialorder %v3365_v62, %v3460_v46  ;;  %v820_v0 = vshll.u32 %v819_v36, 16 }
 0x32c   : > { %v975_v12 = vsel %vm974_vm14, %v970_v52, inf  ;;  %v867_v52 = vcvt.f32.s32 %v3421_v63 }
 0x32d   : > { %976 = vmin.xlane.f32.xlu1 %v975_v12  ;;  %v851_v12 = vcvt.f32.s32 %v3423_v13 }
 0x32f   : > { %v852_v1 = vshll.u32 %v851_v12, 16 }
 0x330   : > { %v3466_v4 = vpop.xlane.xlu0 %988 }
 0x331   : > { %vm990_vm15 = vcmp.eq.f32.partialorder %v3387_v19, %v3466_v4  ;;  %v788_v19 = vshll.u32 %v787_v23, 16 }
 0x332   : > { %v3470_v5 = vpop.xlane.xlu1 %1004  ;;  %v991_v26 = vsel %vm990_vm15, %v986_v58, inf }
 0x333   : > { %992 = vmin.xlane.f32.xlu0 %v991_v26  ;;  %vm1006_vm0 = vcmp.eq.f32.partialorder %v3391_v27, %v3470_v5 }
 0x334   : > { %v1007_v62 = vsel %vm1006_vm0, %v1002_v54, inf }
 0x335   : > { %1008 = vmin.xlane.f32.xlu1 %v1007_v62  ;;  %v868_v62 = vshll.u32 %v867_v52, 16 }
 0x390   : > { %v769_v56 = vpop.xlane.xlu0 %768 }
 0x391   : > { %v770_v14 = vcvt.f32.s32 %v769_v56 }
 0x393   : > { %v3476_v10 = vadd.s32 %v772_v3, %v770_v14 }
 0x394   : > { %v785_v18 = vpop.xlane.xlu1 %784 }
 0x395   : > { %v786_v33 = vcvt.f32.s32 %v785_v18  ;;  %vm1014_vm1 = vcmp.eq.s32.totalorder %v3165_v37, %v3476_v10  ;;  %vm1015_vm2 = vcmp.eq.s32.totalorder %v3168_v39, %v3476_v10 }
 0x396   : > { %v3487_v27 = vsel %vm1014_vm1, -1.0, %v3069_v9  ;;  %v3493_v61 = vsel %vm1015_vm2, -1.0, %v3071_v11 }
 0x397   : > { %v3495_v32 = vadd.s32 %v788_v19, %v786_v33  ;;  %v1110_v47 = vmax.f32 %v3487_v27, %v3493_v61  ;;  %v899_v33 = vcvt.f32.s32 %v3436_v45 }
 0x398   : > { %v801_v2 = vpop.xlane.xlu0 %800 }
 0x399   : > { %v802_v57 = vcvt.f32.s32 %v801_v2  ;;  %1111 = vmax.xlane.f32.xlu0 %v1110_v47  ;;  %vm1016_vm3 = vcmp.eq.s32.totalorder %v3165_v37, %v3495_v32  ;;  %vm1017_vm4 = vcmp.eq.s32.totalorder %v3168_v39, %v3495_v32  ;;  %v915_v2 = vcvt.f32.s32 %v3440_v42 }
 0x39a   : > { %v3509_v9 = vsel %vm1016_vm3, -1.0, %v3073_v15  ;;  %v3515_v11 = vsel %vm1017_vm4, -1.0, %v3075_v16 }
 0x39b   : > { %v3517_v29 = vadd.s32 %v804_v6, %v802_v57  ;;  %v1113_v8 = vmax.f32 %v3509_v9, %v3515_v11 }
 0x39c   : > { %v833_v41 = vpop.xlane.xlu0 %832  ;;  %v817_v15 = vpop.xlane.xlu1 %816 }
 0x39d   : > { %v834_v7 = vcvt.f32.s32 %v833_v41  ;;  %v818_v58 = vcvt.f32.s32 %v817_v15  ;;  %1114 = vmax.xlane.f32.xlu1 %v1113_v8  ;;  %vm1018_vm5 = vcmp.eq.s32.totalorder %v3165_v37, %v3517_v29  ;;  %vm1019_vm6 = vcmp.eq.s32.totalorder %v3168_v39, %v3517_v29 }
 0x39e   : > { %v3531_v16 = vsel %vm1018_vm5, -1.0, %v3081_v20  ;;  %v3537_v63 = vsel %vm1019_vm6, -1.0, %v3085_v24  ;;  %v883_v20 = vcvt.f32.s32 %v3431_v60  ;;  %v900_v8 = vshll.u32 %v899_v33, 16 }
 0x39f   : > { %v3539_v13 = vadd.s32 %v836_v50, %v834_v7  ;;  %v3541_v26 = vadd.s32 %v820_v0, %v818_v58  ;;  %v1116_v54 = vmax.f32 %v3531_v16, %v3537_v63  ;;  %v931_v15 = vcvt.f32.s32 %v3446_v17 }
 0x3a0   : > { %v865_v23 = vpop.xlane.xlu0 %864  ;;  %v947_v17 = vcvt.f32.s32 %v3450_v28 }
 0x3a1   : > { %v866_v56 = vcvt.f32.s32 %v865_v23  ;;  %v849_v3 = vpop.xlane.xlu1 %848  ;;  %1117 = vmax.xlane.f32.xlu0 %v1116_v54  ;;  %vm1022_vm7 = vcmp.eq.s32.totalorder %v3165_v37, %v3539_v13  ;;  %vm1023_vm8 = vcmp.eq.s32.totalorder %v3168_v39, %v3539_v13  ;;  %vm1020_vm9 = vcmp.eq.s32.totalorder %v3165_v37, %v3541_v26 }
 0x3a2   : > { %v850_v24 = vcvt.f32.s32 %v849_v3  ;;  %v3556_v14 = vsel %vm1022_vm7, -1.0, %v3083_v21  ;;  %v3562_v19 = vsel %vm1023_vm8, -1.0, %v3087_v25  ;;  %vm1021_vm10 = vcmp.eq.s32.totalorder %v3168_v39, %v3541_v26 }
 0x3a3   : > { %v3564_v18 = vadd.s32 %v868_v62, %v866_v56  ;;  %v1122_v48 = vmax.f32 %v3556_v14, %v3562_v19  ;;  %v3576_v21 = vsel %vm1020_vm9, -1.0, %v3089_v30  ;;  %v3582_v25 = vsel %vm1021_vm10, -1.0, %v3091_v31 }
 0x3a4   : > { %v3570_v60 = vadd.s32 %v852_v1, %v850_v24  ;;  %5900 = vst [vmem:[#allocation33_spill] sm:$0xff] %v3576_v21  ;;  %5901 = vst [vmem:[#allocation34_spill] sm:$0xff] %v3582_v25  ;;  %v1119_v22 = vmax.f32 %v3576_v21, %v3582_v25  ;;  %v884_v30 = vshll.u32 %v883_v20, 16  ;;  %v932_v28 = vshll.u32 %v931_v15, 16 }
 0x3a5   : > { %v881_v47 = vpop.xlane.xlu1 %880  ;;  %1123 = vmax.xlane.f32.xlu0 %v1122_v48  ;;  %vm5740_vm11 = vcmp.eq.s32.totalorder %v3165_v37, %v3564_v18  ;;  %vm5749_vm12 = vcmp.eq.s32.totalorder %v3168_v39, %v3564_v18  ;;  %v948_v20 = vshll.u32 %v947_v17, 16  ;;  %v995_v17 = vcvt.f32.s32 %v3466_v4 }
 0x3a6   : > { %v882_v36 = vcvt.f32.s32 %v881_v47  ;;  %v3595_v31 = vsel %vm5740_vm11, -1.0, %v3103_v38  ;;  %v3601_v45 = vsel %vm5749_vm12, -1.0, %v3105_v40  ;;  %1120 = vmax.xlane.f32.xlu1 %v1119_v22  ;;  %vm5720_vm13 = vcmp.eq.s32.totalorder %v3165_v37, %v3570_v60  ;;  %v5917_v22 = vld [vmem:[#allocation6_spill] sm:$0xff] }
 0x3a7   : > { %5902 = vst [vmem:[#allocation35_spill] sm:$0xff] %v3595_v31  ;;  %5903 = vst [vmem:[#allocation36_spill] sm:$0xff] %v3601_v45  ;;  %v1128_v6 = vmax.f32 %v3595_v31, %v3601_v45  ;;  %vm5723_vm14 = vcmp.eq.s32.totalorder %v3168_v39, %v3570_v60  ;;  %v3616_v40 = vsel %vm5720_vm13, -1.0, %v3097_v34  ;;  %v916_v34 = vshll.u32 %v915_v2, 16 }
 0x3a8   : > { %v3610_v38 = vadd.s32 %v884_v30, %v882_v36  ;;  %v897_v57 = vpop.xlane.xlu0 %896  ;;  %5904 = vst [vmem:[#allocation37_spill] sm:$0xff] %v3616_v40  ;;  %v3622_v42 = vsel %vm5723_vm14, -1.0, %v3099_v35  ;;  %v1011_v4 = vcvt.f32.s32 %v3470_v5 }
 0x3a9   : > { %5905 = vst [vmem:[#allocation38_spill] sm:$0xff] %v3622_v42  ;;  %v898_v50 = vcvt.f32.s32 %v897_v57  ;;  %1129 = vmax.xlane.f32.xlu0 %v1128_v6  ;;  %v1125_v0 = vmax.f32 %v3616_v40, %v3622_v42  ;;  %v5919_v6 = vld [vmem:[#allocation7_spill] sm:$0xff] }
 0x3aa   : > { %v913_v52 = vpop.xlane.xlu1 %912  ;;  %vm5721_vm15 = vcmp.eq.s32.totalorder %v3165_v37, %v3610_v38  ;;  %vm5722_vm0 = vcmp.eq.s32.totalorder %v3168_v39, %v3610_v38 }
 0x3ab   : > { %v3630_v12 = vadd.s32 %v900_v8, %v898_v50  ;;  %1126 = vmax.xlane.f32.xlu1 %v1125_v0  ;;  %v914_v41 = vcvt.f32.s32 %v913_v52  ;;  %v3636_v35 = vsel %vm5721_vm15, -1.0, %v3107_v43  ;;  %v3643_v7 = vsel %vm5722_vm0, -1.0, %v3109_v44  ;;  %v5921_v8 = vld [vmem:[#allocation8_spill] sm:$0xff] }
 0x3ac   : > { %5906 = vst [vmem:[#allocation39_spill] sm:$0xff] %v3636_v35  ;;  %5907 = vst [vmem:[#allocation40_spill] sm:$0xff] %v3643_v7  ;;  %v1131_v54 = vmax.f32 %v3636_v35, %v3643_v7 }
 0x3ad   : > { %v3645_v58 = vadd.s32 %v916_v34, %v914_v41  ;;  %vm5726_vm13 = vcmp.eq.s32.totalorder %v3165_v37, %v3630_v12  ;;  %vm5727_vm15 = vcmp.eq.s32.totalorder %v3168_v39, %v3630_v12 }
 0x3ae   : > { %v3657_v43 = vsel %vm5726_vm13, -1.0, %v3117_v49  ;;  %v3663_v44 = vsel %vm5727_vm15, -1.0, %v3119_v51 }
 0x3af   : > { %5908 = vst [vmem:[#allocation41_spill] sm:$0xff] %v3645_v58  ;;  %5909 = vst [vmem:[#allocation42_spill] sm:$0xff] %v3657_v43  ;;  %1132 = vmax.xlane.f32.xlu1 %v1131_v54  ;;  %v1134_v62 = vmax.f32 %v3657_v43, %v3663_v44  ;;  %vm5724_vm0 = vcmp.eq.s32.totalorder %v3165_v37, %v3645_v58  ;;  %vm5725_vm14 = vcmp.eq.s32.totalorder %v3168_v39, %v3645_v58 }
 0x3b0   : > { %5910 = vst [vmem:[#allocation43_spill] sm:$0xff] %v3663_v44  ;;  %v929_v49 = vpop.xlane.xlu0 %928  ;;  %v3676_v1 = vsel %vm5724_vm0, -1.0, %v3121_v53  ;;  %v3682_v51 = vsel %vm5725_vm14, -1.0, %v3123_v55  ;;  %v963_v53 = vcvt.f32.s32 %v3456_v59  ;;  %v5915_v55 = vld [vmem:[#allocation5_spill] sm:$0xff]  ;;  %v979_v59 = vcvt.f32.s32 %v3460_v46 }
 0x3b1   : > { %5911 = vst [vmem:[#allocation44_spill] sm:$0xff] %v3676_v1  ;;  %5912 = vst [vmem:[#allocation45_spill] sm:$0xff] %v3682_v51  ;;  %v930_v23 = vcvt.f32.s32 %v929_v49  ;;  %1135 = vmax.xlane.f32.xlu0 %v1134_v62  ;;  %v1137_v56 = vmax.f32 %v3676_v1, %v3682_v51  ;;  %v5925_v49 = vld [vmem:[#allocation9_spill] sm:$0xff] }
 0x3b2   : > { %v945_v3 = vpop.xlane.xlu1 %944  ;;  %v964_v50 = vshll.u32 %v963_v53, 16  ;;  %v980_v41 = vshll.u32 %v979_v59, 16 }
 0x3b3   : > { %v3686_v24 = vadd.s32 %v932_v28, %v930_v23  ;;  %v946_v48 = vcvt.f32.s32 %v945_v3  ;;  %1138 = vmax.xlane.f32.xlu1 %v1137_v56  ;;  %v5927_v23 = vld [vmem:[#allocation10_spill] sm:$0xff] }
 0x3b5   : > { %5913 = vst [vmem:[#allocation46_spill] sm:$0xff] %v3686_v24  ;;  %v3689_v33 = vadd.s32 %v948_v20, %v946_v48  ;;  %vm5730_vm0 = vcmp.eq.s32.totalorder %v3165_v37, %v3686_v24  ;;  %vm5731_vm14 = vcmp.eq.s32.totalorder %v3168_v39, %v3686_v24  ;;  %v5929_v48 = vld [vmem:[#allocation11_spill] sm:$0xff] }
 0x3b6   : > { %v3699_v47 = vsel %vm5730_vm0, -1.0, %v5915_v55  ;;  %v3705_v30 = vsel %vm5731_vm14, -1.0, %v5917_v22  ;;  %v5931_v55 = vld [vmem:[#allocation12_spill] sm:$0xff]  ;;  %v996_v22 = vshll.u32 %v995_v17, 16 }
 0x3b7   : > { %5914 = vst [vmem:[#allocation47_spill] sm:$0xff] %v3689_v33  ;;  %5916 = vst [vmem:[#allocation5_spill] sm:$0xff] %v3699_v47  ;;  %v1140_v36 = vmax.f32 %v3699_v47, %v3705_v30  ;;  %vm5728_vm13 = vcmp.eq.s32.totalorder %v3165_v37, %v3689_v33  ;;  %vm5729_vm15 = vcmp.eq.s32.totalorder %v3168_v39, %v3689_v33 }
 0x3b8   : > { %5918 = vst [vmem:[#allocation6_spill] sm:$0xff] %v3705_v30  ;;  %v961_v2 = vpop.xlane.xlu0 %960  ;;  %v3718_v57 = vsel %vm5728_vm13, -1.0, %v5919_v6  ;;  %v3724_v46 = vsel %vm5729_vm15, -1.0, %v5921_v8  ;;  %v1012_v6 = vshll.u32 %v1011_v4, 16  ;;  %v5941_v4 = vld [vmem:[#allocation16_spill] sm:$0xff] }
 0x3b9   : > { %5920 = vst [vmem:[#allocation7_spill] sm:$0xff] %v3718_v57  ;;  %5922 = vst [vmem:[#allocation8_spill] sm:$0xff] %v3724_v46  ;;  %v962_v0 = vcvt.f32.s32 %v961_v2  ;;  %1141 = vmax.xlane.f32.xlu0 %v1140_v36  ;;  %v1143_v52 = vmax.f32 %v3718_v57, %v3724_v46 }
 0x3ba   : > { %v977_v34 = vpop.xlane.xlu1 %976 }
 0x3bb   : > { %v3728_v15 = vadd.s32 %v964_v50, %v962_v0  ;;  %v978_v54 = vcvt.f32.s32 %v977_v34  ;;  %1144 = vmax.xlane.f32.xlu1 %v1143_v52  ;;  %v5935_v52 = vld [vmem:[#allocation13_spill] sm:$0xff] }
 0x3bd   : > { %5923 = vst [vmem:[#allocation48_spill] sm:$0xff] %v3728_v15  ;;  %v3731_v62 = vadd.s32 %v980_v41, %v978_v54  ;;  %vm5734_vm13 = vcmp.eq.s32.totalorder %v3165_v37, %v3728_v15  ;;  %vm5735_vm15 = vcmp.eq.s32.totalorder %v3168_v39, %v3728_v15  ;;  %v5937_v41 = vld [vmem:[#allocation14_spill] sm:$0xff] }
 0x3be   : > { %v3741_v28 = vsel %vm5734_vm13, -1.0, %v5925_v49  ;;  %v3747_v56 = vsel %vm5735_vm15, -1.0, %v5927_v23  ;;  %v5939_v49 = vld [vmem:[#allocation15_spill] sm:$0xff] }
 0x3bf   : > { %5924 = vst [vmem:[#allocation49_spill] sm:$0xff] %v3731_v62  ;;  %5926 = vst [vmem:[#allocation9_spill] sm:$0xff] %v3741_v28  ;;  %v1146_v3 = vmax.f32 %v3741_v28, %v3747_v56  ;;  %vm5732_vm0 = vcmp.eq.s32.totalorder %v3165_v37, %v3731_v62  ;;  %vm5733_vm14 = vcmp.eq.s32.totalorder %v3168_v39, %v3731_v62 }
 0x3c0   : > { %5928 = vst [vmem:[#allocation10_spill] sm:$0xff] %v3747_v56  ;;  %v993_v20 = vpop.xlane.xlu0 %992  ;;  %v3760_v53 = vsel %vm5732_vm0, -1.0, %v5929_v48  ;;  %v3766_v5 = vsel %vm5733_vm14, -1.0, %v5931_v55 }
 0x3c1   : > { %5930 = vst [vmem:[#allocation11_spill] sm:$0xff] %v3760_v53  ;;  %5932 = vst [vmem:[#allocation12_spill] sm:$0xff] %v3766_v5  ;;  %v994_v59 = vcvt.f32.s32 %v993_v20  ;;  %1147 = vmax.xlane.f32.xlu0 %v1146_v3  ;;  %v1149_v36 = vmax.f32 %v3760_v53, %v3766_v5 }
 0x3c2   : > { %v1009_v2 = vpop.xlane.xlu1 %1008 }
 0x3c3   : > { %v3770_v8 = vadd.s32 %v996_v22, %v994_v59  ;;  %v1010_v50 = vcvt.f32.s32 %v1009_v2  ;;  %1150 = vmax.xlane.f32.xlu1 %v1149_v36 }
 0x3c5   : > { %5933 = vst [vmem:[#allocation50_spill] sm:$0xff] %v3770_v8  ;;  %v3772_v0 = vadd.s32 %v1012_v6, %v1010_v50  ;;  %vm5736_vm0 = vcmp.eq.s32.totalorder %v3165_v37, %v3770_v8  ;;  %vm5738_vm14 = vcmp.eq.s32.totalorder %v3168_v39, %v3770_v8 }
 0x3c6   : > { %v3782_v34 = vsel %vm5736_vm0, -1.0, %v5935_v52  ;;  %v3788_v54 = vsel %vm5738_vm14, -1.0, %v5937_v41 }
 0x3c7   : > { %5934 = vst [vmem:[#allocation51_spill] sm:$0xff] %v3772_v0  ;;  %5936 = vst [vmem:[#allocation13_spill] sm:$0xff] %v3782_v34  ;;  %v1152_v17 = vmax.f32 %v3782_v34, %v3788_v54  ;;  %vm5737_vm13 = vcmp.eq.s32.totalorder %v3165_v37, %v3772_v0  ;;  %vm5739_vm15 = vcmp.eq.s32.totalorder %v3168_v39, %v3772_v0 }
 0x3c8   : > { %5938 = vst [vmem:[#allocation14_spill] sm:$0xff] %v3788_v54  ;;  %v3800_v23 = vsel %vm5737_vm13, -1.0, %v5939_v49  ;;  %v3806_v3 = vsel %vm5739_vm15, -1.0, %v5941_v4 }
 0x3c9   : > { %5940 = vst [vmem:[#allocation15_spill] sm:$0xff] %v3800_v23  ;;  %5942 = vst [vmem:[#allocation16_spill] sm:$0xff] %v3806_v3  ;;  %1153 = vmax.xlane.f32.xlu0 %v1152_v17  ;;  %v1155_v20 = vmax.f32 %v3800_v23, %v3806_v3 }
 0x3cb   : > { %1156 = vmax.xlane.f32.xlu1 %v1155_v20 }
 0x426   : > { %v3810_v48 = vpop.xlane.xlu0 %1111 }
 0x427   : > { %vm1158_vm0 = vcmp.eq.f32.partialorder %v3487_v27, %v3810_v48  ;;  %vm1159_vm13 = vcmp.eq.f32.partialorder %v3493_v61, %v3810_v48 }
 0x428   : > { %v1190_v55 = vsel %vm1158_vm0, %v3165_v37, 256  ;;  %v1191_v22 = vsel %vm1159_vm13, %v3168_v39, 256 }
 0x429   : > { %vm1222_vm14 = vcmp.lt.s32.totalorder %v1190_v55, %v1191_v22 }
 0x42a   : > { %v3818_v59 = vpop.xlane.xlu1 %1114  ;;  %v3820_v36 = vsel %vm1222_vm14, %v1190_v55, %v1191_v22 }
 0x42b   : > { %v1225_v2 = vshra.s32 %v3820_v36, 16  ;;  %vm1160_vm15 = vcmp.eq.f32.partialorder %v3509_v9, %v3818_v59  ;;  %vm1161_vm11 = vcmp.eq.f32.partialorder %v3515_v11, %v3818_v59 }
 0x42c   : > { %v1192_v6 = vsel %vm1160_vm15, %v3165_v37, 256  ;;  %v1193_v50 = vsel %vm1161_vm11, %v3168_v39, 256 }
 0x42d   : > { %v3829_v52 = vcvt.s32.f32 %v1225_v2  ;;  %vm1238_vm13 = vcmp.lt.s32.totalorder %v1192_v6, %v1193_v50 }
 0x42e   : > { %v3831_v41 = vpop.xlane.xlu0 %1117  ;;  %v3833_v17 = vsel %vm1238_vm13, %v1192_v6, %v1193_v50 }
 0x42f   : > { %1228 = vmin.xlane.f32.xlu0 %v3829_v52  ;;  %v1241_v49 = vshra.s32 %v3833_v17, 16  ;;  %vm1162_vm14 = vcmp.eq.f32.partialorder %v3531_v16, %v3831_v41  ;;  %vm1163_vm0 = vcmp.eq.f32.partialorder %v3537_v63, %v3831_v41 }
 0x430   : > { %v1194_v4 = vsel %vm1162_vm14, %v3165_v37, 256  ;;  %v1195_v20 = vsel %vm1163_vm0, %v3168_v39, 256 }
 0x431   : > { %v3843_v55 = vcvt.s32.f32 %v1241_v49  ;;  %vm1254_vm11 = vcmp.lt.s32.totalorder %v1194_v4, %v1195_v20 }
 0x432   : > { %v3845_v22 = vpop.xlane.xlu0 %1123  ;;  %v3847_v2 = vsel %vm1254_vm11, %v1194_v4, %v1195_v20 }
 0x433   : > { %1244 = vmin.xlane.f32.xlu1 %v3843_v55  ;;  %v1257_v6 = vshra.s32 %v3847_v2, 16  ;;  %vm1166_vm15 = vcmp.eq.f32.partialorder %v3556_v14, %v3845_v22  ;;  %vm1167_vm13 = vcmp.eq.f32.partialorder %v3562_v19, %v3845_v22  ;;  %v3855_v50 = vpop.xlane.xlu1 %1120 }
 0x434   : > { %5943 = vst [vmem:[#allocation52_spill] sm:$0xff] %v3855_v50  ;;  %v1198_v49 = vsel %vm1166_vm15, %v3165_v37, 256  ;;  %v1199_v0 = vsel %vm1167_vm13, %v3168_v39, 256  ;;  %vm1164_vm0 = vcmp.eq.f32.partialorder %v3576_v21, %v3855_v50  ;;  %vm1165_vm11 = vcmp.eq.f32.partialorder %v3582_v25, %v3855_v50 }
 0x435   : > { %v3859_v8 = vcvt.s32.f32 %v1257_v6  ;;  %vm1286_vm14 = vcmp.lt.s32.totalorder %v1198_v49, %v1199_v0  ;;  %v1196_v62 = vsel %vm1164_vm0, %v3165_v37, 256  ;;  %v1197_v15 = vsel %vm1165_vm11, %v3168_v39, 256 }
 0x436   : > { %v3865_v4 = vpop.xlane.xlu0 %1129  ;;  %v3867_v20 = vsel %vm1286_vm14, %v1198_v49, %v1199_v0  ;;  %vm1270_vm15 = vcmp.lt.s32.totalorder %v1196_v62, %v1197_v15 }
 0x437   : > { %5944 = vst [vmem:[#allocation53_spill] sm:$0xff] %v3865_v4  ;;  %1260 = vmin.xlane.f32.xlu0 %v3859_v8  ;;  %v1289_v6 = vshra.s32 %v3867_v20, 16  ;;  %vm1170_vm13 = vcmp.eq.f32.partialorder %v3595_v31, %v3865_v4  ;;  %vm1171_vm12 = vcmp.eq.f32.partialorder %v3601_v45, %v3865_v4  ;;  %v3879_v24 = vsel %vm1270_vm15, %v1196_v62, %v1197_v15 }
 0x438   : > { %v3877_v33 = vpop.xlane.xlu1 %1126  ;;  %v1202_v0 = vsel %vm1170_vm13, %v3165_v37, 256  ;;  %v1203_v49 = vsel %vm1171_vm12, %v3168_v39, 256  ;;  %v1273_v25 = vshra.s32 %v3879_v24, 16 }
 0x439   : > { %5945 = vst [vmem:[#allocation54_spill] sm:$0xff] %v3877_v33  ;;  %v3883_v58 = vcvt.s32.f32 %v1289_v6  ;;  %vm1318_vm14 = vcmp.lt.s32.totalorder %v1202_v0, %v1203_v49  ;;  %vm1168_vm0 = vcmp.eq.f32.partialorder %v3616_v40, %v3877_v33  ;;  %vm1169_vm11 = vcmp.eq.f32.partialorder %v3622_v42, %v3877_v33 }
 0x43a   : > { %v3888_v31 = vsel %vm1318_vm14, %v1202_v0, %v1203_v49  ;;  %v1200_v15 = vsel %vm1168_vm0, %v3165_v37, 256  ;;  %v3894_v62 = vcvt.s32.f32 %v1273_v25  ;;  %v1201_v45 = vsel %vm1169_vm11, %v3168_v39, 256 }
 0x43b   : > { %1292 = vmin.xlane.f32.xlu0 %v3883_v58  ;;  %v1321_v6 = vshra.s32 %v3888_v31, 16  ;;  %vm1302_vm12 = vcmp.lt.s32.totalorder %v1200_v15, %v1201_v45 }
 0x43c   : > { %v3898_v4 = vpop.xlane.xlu1 %1132  ;;  %1276 = vmin.xlane.f32.xlu1 %v3894_v62  ;;  %v3903_v49 = vsel %vm1302_vm12, %v1200_v15, %v1201_v45 }
 0x43d   : > { %5946 = vst [vmem:[#allocation55_spill] sm:$0xff] %v3898_v4  ;;  %v3901_v0 = vcvt.s32.f32 %v1321_v6  ;;  %vm1172_vm15 = vcmp.eq.f32.partialorder %v3636_v35, %v3898_v4  ;;  %vm1173_vm13 = vcmp.eq.f32.partialorder %v3643_v7, %v3898_v4  ;;  %v1305_v42 = vshra.s32 %v3903_v49, 16 }
 0x43e   : > { %v3909_v25 = vpop.xlane.xlu0 %1135  ;;  %v1204_v40 = vsel %vm1172_vm15, %v3165_v37, 256  ;;  %v1205_v33 = vsel %vm1173_vm13, %v3168_v39, 256 }
 0x43f   : > { %5947 = vst [vmem:[#allocation56_spill] sm:$0xff] %v3909_v25  ;;  %1324 = vmin.xlane.f32.xlu0 %v3901_v0  ;;  %vm1334_vm14 = vcmp.lt.s32.totalorder %v1204_v40, %v1205_v33  ;;  %vm1174_vm0 = vcmp.eq.f32.partialorder %v3657_v43, %v3909_v25  ;;  %vm1175_vm11 = vcmp.eq.f32.partialorder %v3663_v44, %v3909_v25  ;;  %v3919_v45 = vcvt.s32.f32 %v1305_v42 }
 0x440   : > { %v3921_v15 = vpop.xlane.xlu1 %1138  ;;  %v3923_v6 = vsel %vm1334_vm14, %v1204_v40, %v1205_v33  ;;  %v1206_v7 = vsel %vm1174_vm0, %v3165_v37, 256  ;;  %v1207_v35 = vsel %vm1175_vm11, %v3168_v39, 256 }
 0x441   : > { %5948 = vst [vmem:[#allocation57_spill] sm:$0xff] %v3921_v15  ;;  %v1337_v4 = vshra.s32 %v3923_v6, 16  ;;  %vm1350_vm12 = vcmp.lt.s32.totalorder %v1206_v7, %v1207_v35  ;;  %vm1176_vm15 = vcmp.eq.f32.partialorder %v3676_v1, %v3921_v15  ;;  %vm1177_vm13 = vcmp.eq.f32.partialorder %v3682_v51, %v3921_v15  ;;  %1308 = vmin.xlane.f32.xlu1 %v3919_v45 }
 0x442   : > { %v3933_v42 = vsel %vm1350_vm12, %v1206_v7, %v1207_v35  ;;  %v1208_v40 = vsel %vm1176_vm15, %v3165_v37, 256  ;;  %v1209_v33 = vsel %vm1177_vm13, %v3168_v39, 256 }
 0x443   : > { %v3937_v44 = vcvt.s32.f32 %v1337_v4  ;;  %v1353_v43 = vshra.s32 %v3933_v42, 16  ;;  %vm1366_vm14 = vcmp.lt.s32.totalorder %v1208_v40, %v1209_v33 }
 0x444   : > { %v3940_v25 = vsel %vm1366_vm14, %v1208_v40, %v1209_v33 }
 0x445   : > { %v3942_v21 = vcvt.s32.f32 %v1353_v43  ;;  %v1369_v1 = vshra.s32 %v3940_v25, 16  ;;  %1340 = vmin.xlane.f32.xlu1 %v3937_v44 }
 0x446   : > { %v3946_v51 = vpop.xlane.xlu0 %1141 }
 0x447   : > { %5949 = vst [vmem:[#allocation58_spill] sm:$0xff] %v3946_v51  ;;  %1356 = vmin.xlane.f32.xlu0 %v3942_v21  ;;  %v3949_v35 = vcvt.s32.f32 %v1369_v1  ;;  %vm1178_vm0 = vcmp.eq.f32.partialorder %v3699_v47, %v3946_v51  ;;  %vm1179_vm11 = vcmp.eq.f32.partialorder %v3705_v30, %v3946_v51 }
 0x448   : > { %v3955_v7 = vpop.xlane.xlu1 %1144  ;;  %v1210_v43 = vsel %vm1178_vm0, %v3165_v37, 256  ;;  %v1211_v4 = vsel %vm1179_vm11, %v3168_v39, 256 }
 0x449   : > { %5950 = vst [vmem:[#allocation59_spill] sm:$0xff] %v3955_v7  ;;  %vm1382_vm12 = vcmp.lt.s32.totalorder %v1210_v43, %v1211_v4  ;;  %vm1180_vm15 = vcmp.eq.f32.partialorder %v3718_v57, %v3955_v7  ;;  %vm1181_vm13 = vcmp.eq.f32.partialorder %v3724_v46, %v3955_v7  ;;  %1372 = vmin.xlane.f32.xlu1 %v3949_v35 }
 0x44a   : > { %v3964_v1 = vsel %vm1382_vm12, %v1210_v43, %v1211_v4  ;;  %v1212_v40 = vsel %vm1180_vm15, %v3165_v37, 256  ;;  %v1213_v33 = vsel %vm1181_vm13, %v3168_v39, 256 }
 0x44b   : > { %v1385_v30 = vshra.s32 %v3964_v1, 16  ;;  %vm1398_vm14 = vcmp.lt.s32.totalorder %v1212_v40, %v1213_v33 }
 0x44c   : > { %v3969_v47 = vsel %vm1398_vm14, %v1212_v40, %v1213_v33 }
 0x44d   : > { %v3971_v51 = vcvt.s32.f32 %v1385_v30  ;;  %v1401_v57 = vshra.s32 %v3969_v47, 16 }
 0x44e   : > { %v3974_v15 = vpop.xlane.xlu0 %1147 }
 0x44f   : > { %5951 = vst [vmem:[#allocation60_spill] sm:$0xff] %v3974_v15  ;;  %1388 = vmin.xlane.f32.xlu0 %v3971_v51  ;;  %v3977_v46 = vcvt.s32.f32 %v1401_v57  ;;  %vm1182_vm0 = vcmp.eq.f32.partialorder %v3741_v28, %v3974_v15  ;;  %vm1183_vm11 = vcmp.eq.f32.partialorder %v3747_v56, %v3974_v15 }
 0x450   : > { %v3983_v43 = vpop.xlane.xlu1 %1150  ;;  %v1214_v4 = vsel %vm1182_vm0, %v3165_v37, 256  ;;  %v1215_v30 = vsel %vm1183_vm11, %v3168_v39, 256 }
 0x451   : > { %5952 = vst [vmem:[#allocation61_spill] sm:$0xff] %v3983_v43  ;;  %1404 = vmin.xlane.f32.xlu1 %v3977_v46  ;;  %vm1414_vm12 = vcmp.lt.s32.totalorder %v1214_v4, %v1215_v30  ;;  %vm1184_vm15 = vcmp.eq.f32.partialorder %v3760_v53, %v3983_v43  ;;  %vm1185_vm13 = vcmp.eq.f32.partialorder %v3766_v5, %v3983_v43 }
 0x452   : > { %v3992_v57 = vsel %vm1414_vm12, %v1214_v4, %v1215_v30  ;;  %v1216_v40 = vsel %vm1184_vm15, %v3165_v37, 256  ;;  %v1217_v33 = vsel %vm1185_vm13, %v3168_v39, 256 }
 0x453   : > { %v1417_v56 = vshra.s32 %v3992_v57, 16  ;;  %vm1430_vm14 = vcmp.lt.s32.totalorder %v1216_v40, %v1217_v33 }
 0x454   : > { %v3997_v28 = vsel %vm1430_vm14, %v1216_v40, %v1217_v33 }
 0x455   : > { %v3999_v15 = vcvt.s32.f32 %v1417_v56  ;;  %v1433_v7 = vshra.s32 %v3997_v28, 16 }
 0x456   : > { %v4002_v50 = vpop.xlane.xlu0 %1153 }
 0x457   : > { %5953 = vst [vmem:[#allocation62_spill] sm:$0xff] %v4002_v50  ;;  %1420 = vmin.xlane.f32.xlu0 %v3999_v15  ;;  %v4005_v5 = vcvt.s32.f32 %v1433_v7  ;;  %vm1186_vm0 = vcmp.eq.f32.partialorder %v3782_v34, %v4002_v50  ;;  %vm1187_vm11 = vcmp.eq.f32.partialorder %v3788_v54, %v4002_v50 }
 0x458   : > { %v4011_v4 = vpop.xlane.xlu1 %1156  ;;  %v1218_v30 = vsel %vm1186_vm0, %v3165_v37, 256  ;;  %v1219_v56 = vsel %vm1187_vm11, %v3168_v39, 256 }
 0x459   : > { %5954 = vst [vmem:[#allocation63_spill] sm:$0xff] %v4011_v4  ;;  %1436 = vmin.xlane.f32.xlu1 %v4005_v5  ;;  %vm1446_vm12 = vcmp.lt.s32.totalorder %v1218_v30, %v1219_v56  ;;  %vm1188_vm15 = vcmp.eq.f32.partialorder %v3800_v23, %v4011_v4  ;;  %vm1189_vm13 = vcmp.eq.f32.partialorder %v3806_v3, %v4011_v4  ;;  %v1240_v4 = vand.u32 65535, %v3833_v17 }
 0x45a   : > { %v4020_v7 = vsel %vm1446_vm12, %v1218_v30, %v1219_v56  ;;  %v1220_v40 = vsel %vm1188_vm15, %v3165_v37, 256  ;;  %v1221_v33 = vsel %vm1189_vm13, %v3168_v39, 256  ;;  %v1224_v30 = vand.u32 65535, %v3820_v36 }
 0x45b   : > { %v1449_v54 = vshra.s32 %v4020_v7, 16  ;;  %vm1462_vm14 = vcmp.lt.s32.totalorder %v1220_v40, %v1221_v33  ;;  %v1288_v17 = vand.u32 65535, %v3867_v20 }
 0x45c   : > { %v4025_v34 = vsel %vm1462_vm14, %v1220_v40, %v1221_v33  ;;  %v1226_v3 = vcvt.s32.f32 %v1224_v30  ;;  %v1242_v33 = vcvt.s32.f32 %v1240_v4 }
 0x45d   : > { %v4027_v50 = vcvt.s32.f32 %v1449_v54  ;;  %v1465_v53 = vshra.s32 %v4025_v34, 16 }
 0x45f   : > { %1452 = vmin.xlane.f32.xlu0 %v4027_v50  ;;  %v4031_v23 = vcvt.s32.f32 %v1465_v53  ;;  %v1256_v53 = vand.u32 65535, %v3847_v2  ;;  %v1290_v2 = vcvt.s32.f32 %v1288_v17  ;;  %v1336_v17 = vand.u32 65535, %v3923_v6 }
 0x461   : > { %1468 = vmin.xlane.f32.xlu1 %v4031_v23  ;;  %v1258_v30 = vcvt.s32.f32 %v1256_v53 }
 0x4bc   : > { %v4035_v56 = vpop.xlane.xlu0 %1228 }
 0x4bd   : > { %vm1230_vm0 = vcmp.eq.f32.partialorder %v3829_v52, %v4035_v56  ;;  %v1272_v52 = vand.u32 65535, %v3879_v24 }
 0x4be   : > { %v1231_v54 = vsel %vm1230_vm0, %v1226_v3, inf }
 0x4bf   : > { %1232 = vmin.xlane.f32.xlu0 %v1231_v54  ;;  %v1320_v54 = vand.u32 65535, %v3888_v31 }
 0x4c0   : > { %v4040_v40 = vpop.xlane.xlu1 %1244 }
 0x4c1   : > { %vm1246_vm11 = vcmp.eq.f32.partialorder %v3843_v55, %v4040_v40  ;;  %v1322_v53 = vcvt.s32.f32 %v1320_v54 }
 0x4c2   : > { %v1247_v43 = vsel %vm1246_vm11, %v1242_v33, inf  ;;  %v1274_v33 = vcvt.s32.f32 %v1272_v52  ;;  %v1338_v52 = vcvt.s32.f32 %v1336_v17 }
 0x4c3   : > { %1248 = vmin.xlane.f32.xlu1 %v1247_v43 }
 0x4c4   : > { %v4045_v36 = vpop.xlane.xlu0 %1260 }
 0x4c5   : > { %vm1262_vm12 = vcmp.eq.f32.partialorder %v3859_v8, %v4045_v36  ;;  %v1304_v8 = vand.u32 65535, %v3903_v49 }
 0x4c6   : > { %v1263_v3 = vsel %vm1262_vm12, %v1258_v30, inf }
 0x4c7   : > { %1264 = vmin.xlane.f32.xlu0 %v1263_v3  ;;  %v1306_v30 = vcvt.s32.f32 %v1304_v8 }
 0x4c8   : > { %v4051_v4 = vpop.xlane.xlu0 %1292 }
 0x4c9   : > { %vm1294_vm15 = vcmp.eq.f32.partialorder %v3883_v58, %v4051_v4  ;;  %v4056_v55 = vpop.xlane.xlu1 %1276 }
 0x4ca   : > { %v1295_v43 = vsel %vm1294_vm15, %v1290_v2, inf  ;;  %vm1278_vm13 = vcmp.eq.f32.partialorder %v3894_v62, %v4056_v55  ;;  %v1352_v62 = vand.u32 65535, %v3933_v42  ;;  %v1368_v2 = vand.u32 65535, %v3940_v25 }
 0x4cb   : > { %1296 = vmin.xlane.f32.xlu0 %v1295_v43  ;;  %v1279_v24 = vsel %vm1278_vm13, %v1274_v33, inf  ;;  %v1384_v25 = vand.u32 65535, %v3964_v1  ;;  %v1416_v1 = vand.u32 65535, %v3992_v57  ;;  %v1448_v57 = vand.u32 65535, %v4020_v7 }
 0x4cc   : > { %v4061_v20 = vpop.xlane.xlu0 %1324  ;;  %1280 = vmin.xlane.f32.xlu1 %v1279_v24  ;;  %v1354_v54 = vcvt.s32.f32 %v1352_v62  ;;  %v1370_v42 = vcvt.s32.f32 %v1368_v2  ;;  %v1235_v7 = vcvt.f32.s32 %v4035_v56 }
 0x4cd   : > { %vm1326_vm14 = vcmp.eq.f32.partialorder %v3901_v0, %v4061_v20  ;;  %v1386_v24 = vcvt.s32.f32 %v1384_v25  ;;  %v1418_v17 = vcvt.s32.f32 %v1416_v1  ;;  %v1450_v2 = vcvt.s32.f32 %v1448_v57 }
 0x4ce   : > { %v1327_v31 = vsel %vm1326_vm14, %v1322_v53, inf  ;;  %v4065_v58 = vpop.xlane.xlu1 %1308 }
 0x4cf   : > { %1328 = vmin.xlane.f32.xlu0 %v1327_v31  ;;  %vm1310_vm0 = vcmp.eq.f32.partialorder %v3919_v45, %v4065_v58 }
 0x4d0   : > { %v1311_v49 = vsel %vm1310_vm0, %v1306_v30, inf }
 0x4d1   : > { %1312 = vmin.xlane.f32.xlu1 %v1311_v49 }
 0x4d2   : > { %v4071_v3 = vpop.xlane.xlu1 %1340 }
 0x4d3   : > { %vm1342_vm11 = vcmp.eq.f32.partialorder %v3937_v44, %v4071_v3  ;;  %v1400_v44 = vand.u32 65535, %v3969_v47  ;;  %v1432_v47 = vand.u32 65535, %v3997_v28  ;;  %v1464_v28 = vand.u32 65535, %v4025_v34 }
 0x4d4   : > { %v4076_v0 = vpop.xlane.xlu0 %1356  ;;  %v1343_v43 = vsel %vm1342_vm11, %v1338_v52, inf  ;;  %v1236_v34 = vshll.u32 %v1235_v7, 16 }
 0x4d5   : > { %vm1358_vm12 = vcmp.eq.f32.partialorder %v3942_v21, %v4076_v0  ;;  %1344 = vmin.xlane.f32.xlu1 %v1343_v43  ;;  %v1402_v31 = vcvt.s32.f32 %v1400_v44  ;;  %v1434_v49 = vcvt.s32.f32 %v1432_v47  ;;  %v1466_v43 = vcvt.s32.f32 %v1464_v28  ;;  %v5959_v47 = vld [vmem:[#allocation21_spill] sm:$0xff] }
 0x4d6   : > { %v1359_v45 = vsel %vm1358_vm12, %v1354_v54, inf  ;;  %v4080_v6 = vpop.xlane.xlu1 %1372  ;;  %v4162_v29 = vsel %vm1020_vm9, %v5959_v47, 0.0 }
 0x4d7   : > { %1360 = vmin.xlane.f32.xlu0 %v1359_v45  ;;  %vm1374_vm15 = vcmp.eq.f32.partialorder %v3949_v35, %v4080_v6 }
 0x4d8   : > { %v1375_v33 = vsel %vm1374_vm15, %v1370_v42, inf  ;;  %v1251_v42 = vcvt.f32.s32 %v4040_v40 }
 0x4d9   : > { %1376 = vmin.xlane.f32.xlu1 %v1375_v33  ;;  %v5955_v33 = vld [vmem:[#allocation17_spill] sm:$0xff] }
 0x4da   : > { %v1047_v44 = vsel %vm1015_vm2, %v5955_v33, 0.0 }
 0x4dc   : > { %v4086_v8 = vpop.xlane.xlu0 %1388 }
 0x4dd   : > { %vm1390_vm13 = vcmp.eq.f32.partialorder %v3971_v51, %v4086_v8 }
 0x4de   : > { %v4090_v21 = vpop.xlane.xlu1 %1404  ;;  %v1391_v53 = vsel %vm1390_vm13, %v1386_v24, inf  ;;  %v5957_v24 = vld [vmem:[#allocation20_spill] sm:$0xff]  ;;  %vm5970_vm13 = vcmp.eq.s32.totalorder %v3168_v39, %v3630_v12 }
 0x4df   : > { %1392 = vmin.xlane.f32.xlu0 %v1391_v53  ;;  %vm1406_vm14 = vcmp.eq.f32.partialorder %v3977_v46, %v4090_v21  ;;  %v1051_v53 = vsel %vm1019_vm6, %v5957_v24, 0.0  ;;  %v1050_v10 = vsel %vm1018_vm5, %v5957_v24, 0.0  ;;  %vm5964_vm5 = vcmp.eq.s32.totalorder %v3168_v39, %v3570_v60 }
 0x4e0   : > { %v1407_v35 = vsel %vm1406_vm14, %v1402_v31, inf  ;;  %v5958_v31 = vld [vmem:[#allocation19_spill] sm:$0xff]  ;;  %vm5965_vm6 = vcmp.eq.s32.totalorder %v3165_v37, %v3570_v60  ;;  %v1283_v24 = vcvt.f32.s32 %v4056_v55 }
 0x4e1   : > { %1408 = vmin.xlane.f32.xlu1 %v1407_v35  ;;  %v4144_v35 = vsel %vm1023_vm8, %v5958_v31, 0.0  ;;  %v4150_v32 = vsel %vm1022_vm7, %v5958_v31, 0.0  ;;  %vm5967_vm7 = vcmp.eq.s32.totalorder %v3168_v39, %v3610_v38 }
 0x4e4   : > { %v4096_v30 = vpop.xlane.xlu0 %1420 }
 0x4e5   : > { %vm1422_vm0 = vcmp.eq.f32.partialorder %v3999_v15, %v4096_v30 }
 0x4e6   : > { %v4100_v51 = vpop.xlane.xlu1 %1436  ;;  %v1423_v62 = vsel %vm1422_vm0, %v1418_v17, inf  ;;  %v4156_v17 = vsel %vm1021_vm10, %v5959_v47, 0.0  ;;  %vm5968_vm10 = vcmp.eq.s32.totalorder %v3165_v37, %v3610_v38  ;;  %v1347_v38 = vcvt.f32.s32 %v4071_v3 }
 0x4e7   : > { %1424 = vmin.xlane.f32.xlu0 %v1423_v62  ;;  %vm1438_vm11 = vcmp.eq.f32.partialorder %v4005_v5, %v4100_v51  ;;  %v1267_v62 = vcvt.f32.s32 %v4045_v36  ;;  %v5960_v36 = vld [vmem:[#allocation22_spill] sm:$0xff]  ;;  %v1284_v3 = vshll.u32 %v1283_v24, 16  ;;  %v5971_v24 = vld [vmem:[#allocation52_spill] sm:$0xff] }
 0x4e8   : > { %v1439_v46 = vsel %vm1438_vm11, %v1434_v49, inf }
 0x4e9   : > { %1440 = vmin.xlane.f32.xlu1 %v1439_v46  ;;  %v1252_v46 = vshll.u32 %v1251_v42, 16 }
 0x4ec   : > { %v4106_v52 = vpop.xlane.xlu0 %1452 }
 0x4ed   : > { %vm1454_vm12 = vcmp.eq.f32.partialorder %v4027_v50, %v4106_v52  ;;  %v1046_v50 = vsel %vm1014_vm1, %v5955_v33, 0.0 }
 0x4ee   : > { %v4110_v15 = vpop.xlane.xlu1 %1468  ;;  %v1455_v54 = vsel %vm1454_vm12, %v1450_v2, inf }
 0x4ef   : > { %1456 = vmin.xlane.f32.xlu0 %v1455_v54  ;;  %vm1470_vm15 = vcmp.eq.f32.partialorder %v4031_v23, %v4110_v15  ;;  %v5956_v23 = vld [vmem:[#allocation18_spill] sm:$0xff] }
 0x4f0   : > { %v1471_v5 = vsel %vm1470_vm15, %v1466_v43, inf  ;;  %v1049_v56 = vsel %vm1017_vm4, %v5956_v23, 0.0  ;;  %v1048_v40 = vsel %vm1016_vm3, %v5956_v23, 0.0  ;;  %vm5961_vm3 = vcmp.eq.s32.totalorder %v3168_v39, %v3564_v18 }
 0x4f1   : > { %1472 = vmin.xlane.f32.xlu1 %v1471_v5  ;;  %v4183_v54 = vsel %vm5961_vm3, %v5960_v36, 0.0  ;;  %vm5962_vm4 = vcmp.eq.s32.totalorder %v3165_v37, %v3564_v18  ;;  %v5963_v5 = vld [vmem:[#allocation23_spill] sm:$0xff] }
 0x4f2   : > { %v4189_v43 = vsel %vm5962_vm4, %v5960_v36, 0.0  ;;  %v4203_v7 = vsel %vm5965_vm6, %v5963_v5, 0.0  ;;  %vm5989_vm6 = vcmp.eq.s32.totalorder %v3165_v37, %v3630_v12 }
 0x54c   : > { %v1233_v45 = vpop.xlane.xlu0 %1232 }
 0x54d   : > { %v1234_v25 = vcvt.f32.s32 %v1233_v45  ;;  %v5966_v45 = vld [vmem:[#allocation24_spill] sm:$0xff] }
 0x54e   : > { %v4209_v18 = vsel %vm5967_vm7, %v5966_v45, 0.0 }
 0x54f   : > { %v1237_v1 = vadd.s32 %v1236_v34, %v1234_v25  ;;  %v1268_v34 = vshll.u32 %v1267_v62, 16  ;;  %v1299_v25 = vcvt.f32.s32 %v4051_v4  ;;  %v4230_v4 = vsel %vm5968_vm10, %v5966_v45, 0.0 }
 0x550   : > { %v1249_v49 = vpop.xlane.xlu1 %1248  ;;  %v1363_v45 = vcvt.f32.s32 %v4076_v0 }
 0x551   : > { %v1250_v57 = vcvt.f32.s32 %v1249_v49  ;;  %vm1478_vm1 = vcmp.eq.s32.totalorder %v3165_v37, %v1237_v1  ;;  %vm1479_vm2 = vcmp.eq.s32.totalorder %v3168_v39, %v1237_v1  ;;  %v1300_v47 = vshll.u32 %v1299_v25, 16 }
 0x552   : > { %v4168_v13 = vsel %vm1479_vm2, %v3810_v48, %v1047_v44  ;;  %v4171_v28 = vsel %vm1478_vm1, -1.0, %v3487_v27  ;;  %v4174_v2 = vsel %vm1479_vm2, -1.0, %v3493_v61  ;;  %v4177_v26 = vsel %vm1478_vm1, %v3810_v48, %v1046_v50 }
 0x553   : > { %v1253_v27 = vadd.s32 %v1252_v46, %v1250_v57  ;;  %v1574_v61 = vmax.f32 %v4171_v28, %v4174_v2  ;;  %v4197_v48 = vsel %vm5964_vm5, %v5963_v5, 0.0 }
 0x554   : > { %v1265_v42 = vpop.xlane.xlu0 %1264 }
 0x555   : > { %v1266_v33 = vcvt.f32.s32 %v1265_v42  ;;  %1575 = vmax.xlane.f32.xlu0 %v1574_v61  ;;  %vm1480_vm8 = vcmp.eq.s32.totalorder %v3165_v37, %v1253_v27  ;;  %vm1481_vm9 = vcmp.eq.s32.totalorder %v3168_v39, %v1253_v27 }
 0x556   : > { %v4215_v60 = vsel %vm1481_vm9, %v3818_v59, %v1049_v56  ;;  %v4218_v50 = vsel %vm1480_vm8, -1.0, %v3509_v9  ;;  %v4221_v44 = vsel %vm1481_vm9, -1.0, %v3515_v11  ;;  %v4224_v23 = vsel %vm1480_vm8, %v3818_v59, %v1048_v40  ;;  %v5969_v9 = vld [vmem:[#allocation25_spill] sm:$0xff] }
 0x557   : > { %v1269_v31 = vadd.s32 %v1268_v34, %v1266_v33  ;;  %v1577_v56 = vmax.f32 %v4218_v50, %v4221_v44  ;;  %v4239_v11 = vsel %vm5970_vm13, %v5969_v9, 0.0  ;;  %v1331_v59 = vcvt.f32.s32 %v4061_v20 }
 0x558   : > { %v1315_v40 = vcvt.f32.s32 %v4065_v58  ;;  %v1297_v1 = vpop.xlane.xlu0 %1296 }
 0x559   : > { %vm1482_vm14 = vcmp.eq.s32.totalorder %v3165_v37, %v1269_v31  ;;  %vm1483_vm0 = vcmp.eq.s32.totalorder %v3168_v39, %v1269_v31  ;;  %v1298_v55 = vcvt.f32.s32 %v1297_v1  ;;  %1578 = vmax.xlane.f32.xlu1 %v1577_v56  ;;  %v1281_v46 = vpop.xlane.xlu1 %1280  ;;  %v1332_v61 = vshll.u32 %v1331_v59, 16  ;;  %v5975_v59 = vld [vmem:[#allocation34_spill] sm:$0xff] }
 0x55a   : > { %v4247_v62 = vsel %vm1482_vm14, %v3831_v41, %v1050_v10  ;;  %v4250_v49 = vsel %vm1483_vm0, %v3831_v41, %v1051_v53  ;;  %v4253_v20 = vsel %vm1482_vm14, -1.0, %v3531_v16  ;;  %v4256_v58 = vsel %vm1483_vm0, -1.0, %v3537_v63 }
 0x55b   : > { %v1301_v57 = vadd.s32 %v1300_v47, %v1298_v55  ;;  %v1282_v36 = vcvt.f32.s32 %v1281_v46  ;;  %v1580_v27 = vmax.f32 %v4253_v20, %v4256_v58  ;;  %v1316_v5 = vshll.u32 %v1315_v40, 16 }
 0x55c   : > { %v1348_v10 = vshll.u32 %v1347_v38, 16  ;;  %v1329_v41 = vpop.xlane.xlu0 %1328  ;;  %v1364_v56 = vshll.u32 %v1363_v45, 16  ;;  %v1379_v55 = vcvt.f32.s32 %v4080_v6  ;;  %v1395_v46 = vcvt.f32.s32 %v4086_v8  ;;  %v5984_v6 = vld [vmem:[#allocation54_spill] sm:$0xff] }
 0x55d   : > { %vm1486_vm11 = vcmp.eq.s32.totalorder %v3165_v37, %v1301_v57  ;;  %vm1487_vm12 = vcmp.eq.s32.totalorder %v3168_v39, %v1301_v57  ;;  %v1285_v16 = vadd.s32 %v1284_v3, %v1282_v36  ;;  %v1330_v53 = vcvt.f32.s32 %v1329_v41  ;;  %1581 = vmax.xlane.f32.xlu0 %v1580_v27  ;;  %v5980_v57 = vld [vmem:[#allocation35_spill] sm:$0xff]  ;;  %v5982_v27 = vld [vmem:[#allocation36_spill] sm:$0xff] }
 0x55e   : > { %v4265_v63 = vsel %vm1486_vm11, %v3845_v22, %v4150_v32  ;;  %v4269_v34 = vsel %vm1487_vm12, %v3845_v22, %v4144_v35  ;;  %v4272_v42 = vsel %vm1486_vm11, -1.0, %v3556_v14  ;;  %v4275_v0 = vsel %vm1487_vm12, -1.0, %v3562_v19  ;;  %v1313_v33 = vpop.xlane.xlu1 %1312  ;;  %v5973_v19 = vld [vmem:[#allocation33_spill] sm:$0xff] }
 0x55f   : > { %vm1484_vm15 = vcmp.eq.s32.totalorder %v3165_v37, %v1285_v16  ;;  %vm1485_vm1 = vcmp.eq.s32.totalorder %v3168_v39, %v1285_v16  ;;  %v1333_v25 = vadd.s32 %v1332_v61, %v1330_v53  ;;  %v1586_v32 = vmax.f32 %v4272_v42, %v4275_v0  ;;  %v5987_v16 = vld [vmem:[#allocation37_spill] sm:$0xff] }
 0x560   : > { %v4283_v31 = vsel %vm1484_vm15, %v5971_v24, %v4162_v29  ;;  %v4287_v14 = vsel %vm1485_vm1, %v5971_v24, %v4156_v17  ;;  %v1314_v22 = vcvt.f32.s32 %v1313_v33  ;;  %v4290_v35 = vsel %vm1484_vm15, -1.0, %v5973_v19  ;;  %v5977_v29 = vld [vmem:[#allocation53_spill] sm:$0xff]  ;;  %v5990_v33 = vld [vmem:[#allocation26_spill] sm:$0xff] }
 0x561   : > { %5972 = vst [vmem:[#allocation17_spill] sm:$0xff] %v4287_v14  ;;  %5974 = vst [vmem:[#allocation18_spill] sm:$0xff] %v4290_v35  ;;  %vm1490_vm2 = vcmp.eq.s32.totalorder %v3165_v37, %v1333_v25  ;;  %vm1491_vm3 = vcmp.eq.s32.totalorder %v3168_v39, %v1333_v25  ;;  %1587 = vmax.xlane.f32.xlu0 %v1586_v32  ;;  %v4295_v40 = vsel %vm1485_vm1, -1.0, %v5975_v59  ;;  %v1062_v25 = vsel %vm5989_vm6, %v5969_v9, 0.0  ;;  %v5991_v32 = vld [vmem:[#allocation41_spill] sm:$0xff] }
 0x562   : > { %5976 = vst [vmem:[#allocation20_spill] sm:$0xff] %v4295_v40  ;;  %v4299_v38 = vsel %vm1490_vm2, %v5977_v29, %v4189_v43  ;;  %v4303_v17 = vsel %vm1491_vm3, %v5977_v29, %v4183_v54  ;;  %v1317_v1 = vadd.s32 %v1316_v5, %v1314_v22  ;;  %v1583_v47 = vmax.f32 %v4290_v35, %v4295_v40  ;;  %v1345_v3 = vpop.xlane.xlu1 %1344  ;;  %v5993_v22 = vld [vmem:[#allocation38_spill] sm:$0xff] }
 0x563   : > { %5978 = vst [vmem:[#allocation19_spill] sm:$0xff] %v4299_v38  ;;  %5979 = vst [vmem:[#allocation21_spill] sm:$0xff] %v4303_v17  ;;  %v4310_v36 = vsel %vm1490_vm2, -1.0, %v5980_v57  ;;  %v4313_v61 = vsel %vm1491_vm3, -1.0, %v5982_v27  ;;  %v1346_v54 = vcvt.f32.s32 %v1345_v3  ;;  %vm5992_vm7 = vcmp.eq.s32.totalorder %v3168_v39, %v5991_v32 }
 0x564   : > { %5981 = vst [vmem:[#allocation22_spill] sm:$0xff] %v4310_v36  ;;  %5983 = vst [vmem:[#allocation23_spill] sm:$0xff] %v4313_v61  ;;  %vm1488_vm4 = vcmp.eq.s32.totalorder %v3165_v37, %v1317_v1  ;;  %vm1489_vm5 = vcmp.eq.s32.totalorder %v3168_v39, %v1317_v1  ;;  %1584 = vmax.xlane.f32.xlu1 %v1583_v47  ;;  %v1361_v43 = vpop.xlane.xlu0 %1360  ;;  %v1592_v5 = vmax.f32 %v4310_v36, %v4313_v61  ;;  %v5996_v47 = vld [vmem:[#allocation55_spill] sm:$0xff] }
 0x565   : > { %v4321_v8 = vsel %vm1488_vm4, %v5984_v6, %v4203_v7  ;;  %v4325_v45 = vsel %vm1489_vm5, %v5984_v6, %v4197_v48  ;;  %v1362_v41 = vcvt.f32.s32 %v1361_v43  ;;  %v4328_v53 = vsel %vm1488_vm4, -1.0, %v5987_v16  ;;  %v6006_v6 = vld [vmem:[#allocation42_spill] sm:$0xff]  ;;  %v6008_v16 = vld [vmem:[#allocation43_spill] sm:$0xff] }
 0x566   : > { %5985 = vst [vmem:[#allocation24_spill] sm:$0xff] %v4321_v8  ;;  %5986 = vst [vmem:[#allocation25_spill] sm:$0xff] %v4325_v45  ;;  %v1065_v24 = vsel %vm5992_vm7, %v5990_v33, 0.0  ;;  %v1349_v7 = vadd.s32 %v1348_v10, %v1346_v54  ;;  %1593 = vmax.xlane.f32.xlu0 %v1592_v5  ;;  %v4339_v19 = vsel %vm1489_vm5, -1.0, %v5993_v22  ;;  %vm5995_vm8 = vcmp.eq.s32.totalorder %v3165_v37, %v5991_v32  ;;  %v1377_v9 = vpop.xlane.xlu1 %1376  ;;  %v6002_v54 = vld [vmem:[#allocation39_spill] sm:$0xff]  ;;  %v6010_v32 = vld [vmem:[#allocation57_spill] sm:$0xff] }
 0x567   : > { %5988 = vst [vmem:[#allocation52_spill] sm:$0xff] %v4328_v53  ;;  %5994 = vst [vmem:[#allocation33_spill] sm:$0xff] %v4339_v19  ;;  %v1064_v48 = vsel %vm5995_vm8, %v5990_v33, 0.0  ;;  %v1380_v59 = vshll.u32 %v1379_v55, 16  ;;  %v1365_v29 = vadd.s32 %v1364_v56, %v1362_v41  ;;  %v1589_v12 = vmax.f32 %v4328_v53, %v4339_v19  ;;  %v5999_v56 = vld [vmem:[#allocation56_spill] sm:$0xff] }
 0x568   : > { %v1396_v1 = vshll.u32 %v1395_v46, 16  ;;  %vm1492_vm9 = vcmp.eq.s32.totalorder %v3165_v37, %v1349_v7  ;;  %vm1493_vm10 = vcmp.eq.s32.totalorder %v3168_v39, %v1349_v7  ;;  %v1378_v10 = vcvt.f32.s32 %v1377_v9 }
 0x569   : > { %v4351_v3 = vsel %vm1492_vm9, %v5996_v47, %v4230_v4  ;;  %v4355_v57 = vsel %vm1493_vm10, %v5996_v47, %v4209_v18  ;;  %vm1494_vm13 = vcmp.eq.s32.totalorder %v3165_v37, %v1365_v29  ;;  %vm1495_vm14 = vcmp.eq.s32.totalorder %v3168_v39, %v1365_v29  ;;  %1590 = vmax.xlane.f32.xlu1 %v1589_v12  ;;  %v6004_v18 = vld [vmem:[#allocation40_spill] sm:$0xff] }
 0x56a   : > { %5997 = vst [vmem:[#allocation34_spill] sm:$0xff] %v4351_v3  ;;  %5998 = vst [vmem:[#allocation53_spill] sm:$0xff] %v4355_v57  ;;  %v4360_v55 = vsel %vm1494_vm13, %v5999_v56, %v1062_v25  ;;  %v4364_v46 = vsel %vm1495_vm14, %v5999_v56, %v4239_v11  ;;  %v1381_v27 = vadd.s32 %v1380_v59, %v1378_v10  ;;  %v4367_v4 = vsel %vm1492_vm9, -1.0, %v6002_v54  ;;  %v6013_v29 = vld [vmem:[#allocation44_spill] sm:$0xff]  ;;  %v6015_v10 = vld [vmem:[#allocation45_spill] sm:$0xff] }
 0x56b   : > { %6000 = vst [vmem:[#allocation35_spill] sm:$0xff] %v4360_v55  ;;  %6001 = vst [vmem:[#allocation36_spill] sm:$0xff] %v4364_v46  ;;  %v1411_v43 = vcvt.f32.s32 %v4090_v21  ;;  %v4371_v5 = vsel %vm1493_vm10, -1.0, %v6004_v18  ;;  %v4374_v41 = vsel %vm1494_vm13, -1.0, %v6006_v6  ;;  %v4377_v33 = vsel %vm1495_vm14, -1.0, %v6008_v16  ;;  %v6017_v18 = vld [vmem:[#allocation27_spill] sm:$0xff] }
 0x56c   : > { %6003 = vst [vmem:[#allocation54_spill] sm:$0xff] %v4367_v4  ;;  %6005 = vst [vmem:[#allocation37_spill] sm:$0xff] %v4371_v5  ;;  %vm1496_vm0 = vcmp.eq.s32.totalorder %v3165_v37, %v1381_v27  ;;  %vm1497_vm11 = vcmp.eq.s32.totalorder %v3168_v39, %v1381_v27  ;;  %v1595_v11 = vmax.f32 %v4367_v4, %v4371_v5  ;;  %v1393_v25 = vpop.xlane.xlu0 %1392 }
 0x56d   : > { %6007 = vst [vmem:[#allocation26_spill] sm:$0xff] %v4374_v41  ;;  %6009 = vst [vmem:[#allocation41_spill] sm:$0xff] %v4377_v33  ;;  %v1598_v21 = vmax.f32 %v4374_v41, %v4377_v33  ;;  %v4386_v7 = vsel %vm1496_vm0, %v6010_v32, %v1064_v48  ;;  %v4389_v22 = vsel %vm1497_vm11, %v6010_v32, %v1065_v24  ;;  %v1394_v59 = vcvt.f32.s32 %v1393_v25  ;;  %v6018_v24 = vld [vmem:[#allocation46_spill] sm:$0xff]  ;;  %v6022_v25 = vld [vmem:[#allocation47_spill] sm:$0xff] }
 0x56e   : > { %6011 = vst [vmem:[#allocation38_spill] sm:$0xff] %v4386_v7  ;;  %6012 = vst [vmem:[#allocation55_spill] sm:$0xff] %v4389_v22  ;;  %v4392_v12 = vsel %vm1496_vm0, -1.0, %v6013_v29  ;;  %1596 = vmax.xlane.f32.xlu1 %v1595_v11  ;;  %v1409_v9 = vpop.xlane.xlu1 %1408  ;;  %v4395_v47 = vsel %vm1497_vm11, -1.0, %v6015_v10  ;;  %v1412_v56 = vshll.u32 %v1411_v43, 16  ;;  %vm6019_vm12 = vcmp.eq.s32.totalorder %v3168_v39, %v6018_v24  ;;  %v6021_v11 = vld [vmem:[#allocation28_spill] sm:$0xff] }
 0x56f   : > { %6014 = vst [vmem:[#allocation56_spill] sm:$0xff] %v4392_v12  ;;  %1599 = vmax.xlane.f32.xlu0 %v1598_v21  ;;  %6016 = vst [vmem:[#allocation39_spill] sm:$0xff] %v4395_v47  ;;  %v1397_v27 = vadd.s32 %v1396_v1, %v1394_v59  ;;  %v1410_v54 = vcvt.f32.s32 %v1409_v9  ;;  %v1601_v48 = vmax.f32 %v4392_v12, %v4395_v47  ;;  %v1067_v6 = vsel %vm6019_vm12, %v6017_v18, 0.0  ;;  %v6025_v59 = vld [vmem:[#allocation58_spill] sm:$0xff]  ;;  %v6028_v10 = vld [vmem:[#allocation5_spill] sm:$0xff] }
 0x570   : > { %vm6020_vm15 = vcmp.eq.s32.totalorder %v3165_v37, %v6018_v24  ;;  %vm6023_vm1 = vcmp.eq.s32.totalorder %v3168_v39, %v6022_v25  ;;  %vm6024_vm2 = vcmp.eq.s32.totalorder %v3165_v37, %v6022_v25  ;;  %v1427_v21 = vcvt.f32.s32 %v4096_v30  ;;  %v6030_v24 = vld [vmem:[#allocation6_spill] sm:$0xff] }
 0x571   : > { %v1066_v16 = vsel %vm6020_vm15, %v6017_v18, 0.0  ;;  %v1069_v43 = vsel %vm6023_vm1, %v6021_v11, 0.0  ;;  %v1068_v1 = vsel %vm6024_vm2, %v6021_v11, 0.0  ;;  %vm1498_vm3 = vcmp.eq.s32.totalorder %v3165_v37, %v1397_v27  ;;  %v6052_v22 = vld [vmem:[#allocation10_spill] sm:$0xff] }
 0x572   : > { %vm1499_vm4 = vcmp.eq.s32.totalorder %v3168_v39, %v1397_v27  ;;  %v1413_v32 = vadd.s32 %v1412_v56, %v1410_v54  ;;  %v4419_v29 = vsel %vm1498_vm3, %v6025_v59, %v1066_v16  ;;  %1602 = vmax.xlane.f32.xlu1 %v1601_v48  ;;  %v4425_v18 = vsel %vm1498_vm3, -1.0, %v6028_v10  ;;  %v6032_v27 = vld [vmem:[#allocation59_spill] sm:$0xff] }
 0x573   : > { %6026 = vst [vmem:[#allocation40_spill] sm:$0xff] %v4419_v29  ;;  %v4422_v9 = vsel %vm1499_vm4, %v6025_v59, %v1067_v6  ;;  %6029 = vst [vmem:[#allocation43_spill] sm:$0xff] %v4425_v18  ;;  %v4428_v25 = vsel %vm1499_vm4, -1.0, %v6030_v24  ;;  %v1443_v30 = vcvt.f32.s32 %v4100_v51  ;;  %v6035_v16 = vld [vmem:[#allocation7_spill] sm:$0xff]  ;;  %v6037_v59 = vld [vmem:[#allocation8_spill] sm:$0xff]  ;;  %v1428_v51 = vshll.u32 %v1427_v21, 16 }
 0x574   : > { %6027 = vst [vmem:[#allocation42_spill] sm:$0xff] %v4422_v9  ;;  %6031 = vst [vmem:[#allocation57_spill] sm:$0xff] %v4428_v25  ;;  %vm1500_vm5 = vcmp.eq.s32.totalorder %v3165_v37, %v1413_v32  ;;  %vm1501_vm6 = vcmp.eq.s32.totalorder %v3168_v39, %v1413_v32  ;;  %v1604_v56 = vmax.f32 %v4425_v18, %v4428_v25  ;;  %v1425_v6 = vpop.xlane.xlu0 %1424 }
 0x575   : > { %v4436_v54 = vsel %vm1500_vm5, %v6032_v27, %v1068_v1  ;;  %v4439_v48 = vsel %vm1501_vm6, %v6032_v27, %v1069_v43  ;;  %v4442_v11 = vsel %vm1500_vm5, -1.0, %v6035_v16  ;;  %v4445_v10 = vsel %vm1501_vm6, -1.0, %v6037_v59  ;;  %v6039_v43 = vld [vmem:[#allocation29_spill] sm:$0xff]  ;;  %v6040_v27 = vld [vmem:[#allocation48_spill] sm:$0xff] }
 0x576   : > { %6033 = vst [vmem:[#allocation44_spill] sm:$0xff] %v4436_v54  ;;  %6034 = vst [vmem:[#allocation45_spill] sm:$0xff] %v4439_v48  ;;  %v1426_v24 = vcvt.f32.s32 %v1425_v6  ;;  %1605 = vmax.xlane.f32.xlu0 %v1604_v56  ;;  %v1607_v32 = vmax.f32 %v4442_v11, %v4445_v10  ;;  %v1441_v9 = vpop.xlane.xlu1 %1440  ;;  %v1444_v29 = vshll.u32 %v1443_v30, 16  ;;  %vm6041_vm7 = vcmp.eq.s32.totalorder %v3168_v39, %v6040_v27  ;;  %v6043_v6 = vld [vmem:[#allocation30_spill] sm:$0xff]  ;;  %v6044_v56 = vld [vmem:[#allocation49_spill] sm:$0xff] }
 0x577   : > { %6036 = vst [vmem:[#allocation27_spill] sm:$0xff] %v4442_v11  ;;  %6038 = vst [vmem:[#allocation46_spill] sm:$0xff] %v4445_v10  ;;  %v1442_v54 = vcvt.f32.s32 %v1441_v9  ;;  %v1071_v16 = vsel %vm6041_vm7, %v6039_v43, 0.0  ;;  %vm6042_vm8 = vcmp.eq.s32.totalorder %v3165_v37, %v6040_v27  ;;  %vm6045_vm9 = vcmp.eq.s32.totalorder %v3168_v39, %v6044_v56  ;;  %v6050_v27 = vld [vmem:[#allocation9_spill] sm:$0xff] }
 0x578   : > { %v1429_v1 = vadd.s32 %v1428_v51, %v1426_v24  ;;  %1608 = vmax.xlane.f32.xlu1 %v1607_v32  ;;  %v1070_v21 = vsel %vm6042_vm8, %v6039_v43, 0.0  ;;  %v1073_v59 = vsel %vm6045_vm9, %v6043_v6, 0.0  ;;  %vm6046_vm10 = vcmp.eq.s32.totalorder %v3165_v37, %v6044_v56  ;;  %v6047_v24 = vld [vmem:[#allocation60_spill] sm:$0xff] }
 0x579   : > { %v1072_v9 = vsel %vm6046_vm10, %v6043_v6, 0.0  ;;  %v1459_v30 = vcvt.f32.s32 %v4106_v52  ;;  %v1445_v51 = vadd.s32 %v1444_v29, %v1442_v54  ;;  %v1475_v6 = vcvt.f32.s32 %v4110_v15  ;;  %v6054_v29 = vld [vmem:[#allocation61_spill] sm:$0xff] }
 0x57a   : > { %vm1502_vm13 = vcmp.eq.s32.totalorder %v3165_v37, %v1429_v1  ;;  %vm1503_vm14 = vcmp.eq.s32.totalorder %v3168_v39, %v1429_v1 }
 0x57b   : > { %v4469_v32 = vsel %vm1502_vm13, %v6047_v24, %v1070_v21  ;;  %v4472_v43 = vsel %vm1503_vm14, %v6047_v24, %v1071_v16  ;;  %v4475_v48 = vsel %vm1502_vm13, -1.0, %v6050_v27  ;;  %v4478_v7 = vsel %vm1503_vm14, -1.0, %v6052_v22  ;;  %v6057_v21 = vld [vmem:[#allocation11_spill] sm:$0xff]  ;;  %v6059_v22 = vld [vmem:[#allocation12_spill] sm:$0xff] }
 0x57c   : > { %6048 = vst [vmem:[#allocation28_spill] sm:$0xff] %v4469_v32  ;;  %6049 = vst [vmem:[#allocation47_spill] sm:$0xff] %v4472_v43  ;;  %vm1504_vm0 = vcmp.eq.s32.totalorder %v3165_v37, %v1445_v51  ;;  %vm1505_vm11 = vcmp.eq.s32.totalorder %v3168_v39, %v1445_v51  ;;  %v1610_v52 = vmax.f32 %v4475_v48, %v4478_v7  ;;  %v1457_v16 = vpop.xlane.xlu0 %1456  ;;  %v1460_v15 = vshll.u32 %v1459_v30, 16 }
 0x57d   : > { %6051 = vst [vmem:[#allocation58_spill] sm:$0xff] %v4475_v48  ;;  %6053 = vst [vmem:[#allocation5_spill] sm:$0xff] %v4478_v7  ;;  %v4486_v54 = vsel %vm1504_vm0, %v6054_v29, %v1072_v9  ;;  %v4489_v1 = vsel %vm1505_vm11, %v6054_v29, %v1073_v59  ;;  %v4492_v56 = vsel %vm1504_vm0, -1.0, %v6057_v21  ;;  %v4495_v24 = vsel %vm1505_vm11, -1.0, %v6059_v22  ;;  %v6061_v59 = vld [vmem:[#allocation31_spill] sm:$0xff]  ;;  %v6062_v29 = vld [vmem:[#allocation50_spill] sm:$0xff] }
 0x57e   : > { %6055 = vst [vmem:[#allocation6_spill] sm:$0xff] %v4486_v54  ;;  %6056 = vst [vmem:[#allocation59_spill] sm:$0xff] %v4489_v1  ;;  %v1458_v27 = vcvt.f32.s32 %v1457_v16  ;;  %1611 = vmax.xlane.f32.xlu0 %v1610_v52  ;;  %v1613_v51 = vmax.f32 %v4492_v56, %v4495_v24  ;;  %v1473_v43 = vpop.xlane.xlu1 %1472  ;;  %v1476_v32 = vshll.u32 %v1475_v6, 16  ;;  %vm6063_vm12 = vcmp.eq.s32.totalorder %v3168_v39, %v6062_v29  ;;  %v6065_v16 = vld [vmem:[#allocation32_spill] sm:$0xff]  ;;  %v6066_v52 = vld [vmem:[#allocation51_spill] sm:$0xff] }
 0x57f   : > { %6058 = vst [vmem:[#allocation7_spill] sm:$0xff] %v4492_v56  ;;  %6060 = vst [vmem:[#allocation8_spill] sm:$0xff] %v4495_v24  ;;  %v1474_v54 = vcvt.f32.s32 %v1473_v43  ;;  %v1075_v21 = vsel %vm6063_vm12, %v6061_v59, 0.0  ;;  %vm6064_vm15 = vcmp.eq.s32.totalorder %v3165_v37, %v6062_v29  ;;  %vm6067_vm1 = vcmp.eq.s32.totalorder %v3168_v39, %v6066_v52  ;;  %v6068_v6 = vld [vmem:[#allocation62_spill] sm:$0xff] }
 0x580   : > { %v1461_v9 = vadd.s32 %v1460_v15, %v1458_v27  ;;  %1614 = vmax.xlane.f32.xlu1 %v1613_v51  ;;  %v1074_v30 = vsel %vm6064_vm15, %v6061_v59, 0.0  ;;  %v1077_v22 = vsel %vm6067_vm1, %v6065_v16, 0.0  ;;  %v6071_v51 = vld [vmem:[#allocation13_spill] sm:$0xff]  ;;  %v6073_v59 = vld [vmem:[#allocation14_spill] sm:$0xff]  ;;  %vm6075_vm4 = vcmp.eq.s32.totalorder %v3165_v37, %v6066_v52 }
 0x581   : > { %v1477_v43 = vadd.s32 %v1476_v32, %v1474_v54  ;;  %v1076_v46 = vsel %vm6075_vm4, %v6065_v16, 0.0  ;;  %v6076_v54 = vld [vmem:[#allocation63_spill] sm:$0xff] }
 0x582   : > { %vm1506_vm2 = vcmp.eq.s32.totalorder %v3165_v37, %v1461_v9  ;;  %vm1507_vm3 = vcmp.eq.s32.totalorder %v3168_v39, %v1461_v9 }
 0x583   : > { %v4514_v15 = vsel %vm1506_vm2, %v6068_v6, %v1074_v30  ;;  %v4517_v27 = vsel %vm1507_vm3, %v6068_v6, %v1075_v21  ;;  %v4520_v1 = vsel %vm1506_vm2, -1.0, %v6071_v51  ;;  %v4523_v29 = vsel %vm1507_vm3, -1.0, %v6073_v59  ;;  %v6079_v30 = vld [vmem:[#allocation15_spill] sm:$0xff]  ;;  %v6081_v51 = vld [vmem:[#allocation16_spill] sm:$0xff] }
 0x584   : > { %6069 = vst [vmem:[#allocation29_spill] sm:$0xff] %v4514_v15  ;;  %6070 = vst [vmem:[#allocation48_spill] sm:$0xff] %v4517_v27  ;;  %vm1508_vm5 = vcmp.eq.s32.totalorder %v3165_v37, %v1477_v43  ;;  %vm1509_vm6 = vcmp.eq.s32.totalorder %v3168_v39, %v1477_v43  ;;  %v1616_v32 = vmax.f32 %v4520_v1, %v4523_v29 }
 0x585   : > { %6072 = vst [vmem:[#allocation30_spill] sm:$0xff] %v4520_v1  ;;  %6074 = vst [vmem:[#allocation49_spill] sm:$0xff] %v4523_v29  ;;  %v4534_v9 = vsel %vm1508_vm5, %v6076_v54, %v1076_v46  ;;  %v4537_v21 = vsel %vm1509_vm6, %v6076_v54, %v1077_v22  ;;  %v4540_v6 = vsel %vm1508_vm5, -1.0, %v6079_v30  ;;  %v4543_v59 = vsel %vm1509_vm6, -1.0, %v6081_v51 }
 0x586   : > { %6077 = vst [vmem:[#allocation60_spill] sm:$0xff] %v4534_v9  ;;  %6078 = vst [vmem:[#allocation9_spill] sm:$0xff] %v4537_v21  ;;  %1617 = vmax.xlane.f32.xlu0 %v1616_v32  ;;  %v1619_v16 = vmax.f32 %v4540_v6, %v4543_v59 }
 0x587   : > { %6080 = vst [vmem:[#allocation10_spill] sm:$0xff] %v4540_v6  ;;  %6082 = vst [vmem:[#allocation61_spill] sm:$0xff] %v4543_v59 }
 0x588   : > { %1620 = vmax.xlane.f32.xlu1 %v1619_v16 }
 0x5e2   : > { %v4547_v52 = vpop.xlane.xlu0 %1575 }
 0x5e3   : > { %vm1622_vm7 = vcmp.eq.f32.partialorder %v4171_v28, %v4547_v52  ;;  %vm1623_vm8 = vcmp.eq.f32.partialorder %v4174_v2, %v4547_v52 }
 0x5e4   : > { %v1654_v46 = vsel %vm1622_vm7, %v3165_v37, 256  ;;  %v1655_v22 = vsel %vm1623_vm8, %v3168_v39, 256 }
 0x5e5   : > { %vm1686_vm9 = vcmp.lt.s32.totalorder %v1654_v46, %v1655_v22 }
 0x5e6   : > { %v4555_v43 = vpop.xlane.xlu1 %1578  ;;  %v4557_v32 = vsel %vm1686_vm9, %v1654_v46, %v1655_v22 }
 0x5e7   : > { %vm1624_vm10 = vcmp.eq.f32.partialorder %v4218_v50, %v4555_v43  ;;  %vm1625_vm13 = vcmp.eq.f32.partialorder %v4221_v44, %v4555_v43  ;;  %v1689_v54 = vshra.s32 %v4557_v32, 16 }
 0x5e8   : > { %v1656_v30 = vsel %vm1624_vm10, %v3165_v37, 256  ;;  %v1657_v51 = vsel %vm1625_vm13, %v3168_v39, 256 }
 0x5e9   : > { %v4566_v16 = vcvt.s32.f32 %v1689_v54  ;;  %vm1702_vm14 = vcmp.lt.s32.totalorder %v1656_v30, %v1657_v51 }
 0x5ea   : > { %v4568_v21 = vpop.xlane.xlu0 %1581  ;;  %v4570_v9 = vsel %vm1702_vm14, %v1656_v30, %v1657_v51 }
 0x5eb   : > { %vm1626_vm0 = vcmp.eq.f32.partialorder %v4253_v20, %v4568_v21  ;;  %vm1627_vm11 = vcmp.eq.f32.partialorder %v4256_v58, %v4568_v21  ;;  %1692 = vmin.xlane.f32.xlu0 %v4566_v16  ;;  %v1705_v46 = vshra.s32 %v4570_v9, 16 }
 0x5ec   : > { %v1658_v22 = vsel %vm1626_vm0, %v3165_v37, 256  ;;  %v1659_v54 = vsel %vm1627_vm11, %v3168_v39, 256 }
 0x5ed   : > { %v4580_v27 = vcvt.s32.f32 %v1705_v46  ;;  %vm1718_vm12 = vcmp.lt.s32.totalorder %v1658_v22, %v1659_v54 }
 0x5ee   : > { %v4582_v15 = vpop.xlane.xlu0 %1587  ;;  %v4584_v30 = vsel %vm1718_vm12, %v1658_v22, %v1659_v54 }
 0x5ef   : > { %vm1630_vm15 = vcmp.eq.f32.partialorder %v4272_v42, %v4582_v15  ;;  %vm1631_vm1 = vcmp.eq.f32.partialorder %v4275_v0, %v4582_v15  ;;  %1708 = vmin.xlane.f32.xlu1 %v4580_v27  ;;  %v1721_v51 = vshra.s32 %v4584_v30, 16 }
 0x5f0   : > { %v1662_v55 = vsel %vm1630_vm15, %v3165_v37, 256  ;;  %v1663_v46 = vsel %vm1631_vm1, %v3168_v39, 256 }
 0x5f1   : > { %v4594_v57 = vpop.xlane.xlu1 %1584  ;;  %v4596_v3 = vcvt.s32.f32 %v1721_v51  ;;  %vm1750_vm2 = vcmp.lt.s32.totalorder %v1662_v55, %v1663_v46 }
 0x5f2   : > { %6083 = vst [vmem:[#allocation11_spill] sm:$0xff] %v4594_v57  ;;  %vm1628_vm3 = vcmp.eq.f32.partialorder %v4290_v35, %v4594_v57  ;;  %vm1629_vm4 = vcmp.eq.f32.partialorder %v4295_v40, %v4594_v57  ;;  %v4602_v22 = vsel %vm1750_vm2, %v1662_v55, %v1663_v46 }
 0x5f3   : > { %v1660_v54 = vsel %vm1628_vm3, %v3165_v37, 256  ;;  %v1661_v45 = vsel %vm1629_vm4, %v3168_v39, 256  ;;  %v4606_v8 = vpop.xlane.xlu0 %1593  ;;  %1724 = vmin.xlane.f32.xlu0 %v4596_v3  ;;  %v1753_v51 = vshra.s32 %v4602_v22, 16 }
 0x5f4   : > { %6084 = vst [vmem:[#allocation12_spill] sm:$0xff] %v4606_v8  ;;  %vm1634_vm5 = vcmp.eq.f32.partialorder %v4310_v36, %v4606_v8  ;;  %vm1635_vm6 = vcmp.eq.f32.partialorder %v4313_v61, %v4606_v8  ;;  %vm1734_vm7 = vcmp.lt.s32.totalorder %v1660_v54, %v1661_v45 }
 0x5f5   : > { %v1666_v55 = vsel %vm1634_vm5, %v3165_v37, 256  ;;  %v1667_v46 = vsel %vm1635_vm6, %v3168_v39, 256  ;;  %v4616_v17 = vcvt.s32.f32 %v1753_v51  ;;  %v4618_v38 = vsel %vm1734_vm7, %v1660_v54, %v1661_v45 }
 0x5f6   : > { %v4620_v40 = vpop.xlane.xlu1 %1590  ;;  %v1737_v35 = vshra.s32 %v4618_v38, 16  ;;  %vm1782_vm8 = vcmp.lt.s32.totalorder %v1666_v55, %v1667_v46 }
 0x5f7   : > { %6085 = vst [vmem:[#allocation31_spill] sm:$0xff] %v4620_v40  ;;  %vm1632_vm9 = vcmp.eq.f32.partialorder %v4328_v53, %v4620_v40  ;;  %vm1633_vm10 = vcmp.eq.f32.partialorder %v4339_v19, %v4620_v40  ;;  %1756 = vmin.xlane.f32.xlu0 %v4616_v17  ;;  %v4628_v61 = vsel %vm1782_vm8, %v1666_v55, %v1667_v46 }
 0x5f8   : > { %v1664_v51 = vsel %vm1632_vm9, %v3165_v37, 256  ;;  %v1665_v45 = vsel %vm1633_vm10, %v3168_v39, 256  ;;  %v4632_v54 = vcvt.s32.f32 %v1737_v35  ;;  %v1785_v36 = vshra.s32 %v4628_v61, 16 }
 0x5f9   : > { %vm1766_vm13 = vcmp.lt.s32.totalorder %v1664_v51, %v1665_v45 }
 0x5fa   : > { %1740 = vmin.xlane.f32.xlu1 %v4632_v54  ;;  %v4636_v8 = vcvt.s32.f32 %v1785_v36  ;;  %v4638_v53 = vsel %vm1766_vm13, %v1664_v51, %v1665_v45 }
 0x5fb   : > { %v4640_v19 = vpop.xlane.xlu1 %1596  ;;  %v1769_v55 = vshra.s32 %v4638_v53, 16 }
 0x5fc   : > { %6086 = vst [vmem:[#allocation50_spill] sm:$0xff] %v4640_v19  ;;  %v4642_v40 = vpop.xlane.xlu0 %1599  ;;  %vm1636_vm14 = vcmp.eq.f32.partialorder %v4367_v4, %v4640_v19  ;;  %vm1637_vm0 = vcmp.eq.f32.partialorder %v4371_v5, %v4640_v19  ;;  %1788 = vmin.xlane.f32.xlu0 %v4636_v8 }
 0x5fd   : > { %6087 = vst [vmem:[#allocation32_spill] sm:$0xff] %v4642_v40  ;;  %vm1638_vm11 = vcmp.eq.f32.partialorder %v4374_v41, %v4642_v40  ;;  %vm1639_vm12 = vcmp.eq.f32.partialorder %v4377_v33, %v4642_v40  ;;  %v1668_v35 = vsel %vm1636_vm14, %v3165_v37, 256  ;;  %v1669_v36 = vsel %vm1637_vm0, %v3168_v39, 256 }
 0x5fe   : > { %v1670_v46 = vsel %vm1638_vm11, %v3165_v37, 256  ;;  %v1671_v51 = vsel %vm1639_vm12, %v3168_v39, 256  ;;  %v4658_v45 = vcvt.s32.f32 %v1769_v55  ;;  %vm1798_vm15 = vcmp.lt.s32.totalorder %v1668_v35, %v1669_v36 }
 0x5ff   : > { %vm1814_vm1 = vcmp.lt.s32.totalorder %v1670_v46, %v1671_v51  ;;  %v4660_v5 = vpop.xlane.xlu1 %1602  ;;  %v4662_v41 = vsel %vm1798_vm15, %v1668_v35, %v1669_v36 }
 0x600   : > { %6088 = vst [vmem:[#allocation51_spill] sm:$0xff] %v4660_v5  ;;  %v4664_v4 = vsel %vm1814_vm1, %v1670_v46, %v1671_v51  ;;  %1772 = vmin.xlane.f32.xlu1 %v4658_v45  ;;  %vm1640_vm2 = vcmp.eq.f32.partialorder %v4392_v12, %v4660_v5  ;;  %vm1641_vm3 = vcmp.eq.f32.partialorder %v4395_v47, %v4660_v5  ;;  %v1801_v33 = vshra.s32 %v4662_v41, 16 }
 0x601   : > { %v1817_v55 = vshra.s32 %v4664_v4, 16  ;;  %v1672_v40 = vsel %vm1640_vm2, %v3165_v37, 256  ;;  %v1673_v19 = vsel %vm1641_vm3, %v3168_v39, 256 }
 0x602   : > { %v4675_v35 = vcvt.s32.f32 %v1801_v33  ;;  %vm1830_vm4 = vcmp.lt.s32.totalorder %v1672_v40, %v1673_v19 }
 0x603   : > { %v4677_v36 = vpop.xlane.xlu0 %1605  ;;  %v4679_v46 = vcvt.s32.f32 %v1817_v55  ;;  %v4685_v51 = vsel %vm1830_vm4, %v1672_v40, %v1673_v19 }
 0x604   : > { %6089 = vst [vmem:[#allocation62_spill] sm:$0xff] %v4677_v36  ;;  %vm1642_vm5 = vcmp.eq.f32.partialorder %v4425_v18, %v4677_v36  ;;  %vm1643_vm6 = vcmp.eq.f32.partialorder %v4428_v25, %v4677_v36  ;;  %1804 = vmin.xlane.f32.xlu1 %v4675_v35  ;;  %v1833_v55 = vshra.s32 %v4685_v51, 16 }
 0x605   : > { %v1674_v47 = vsel %vm1642_vm5, %v3165_v37, 256  ;;  %v1675_v33 = vsel %vm1643_vm6, %v3168_v39, 256  ;;  %1820 = vmin.xlane.f32.xlu0 %v4679_v46  ;;  %v4691_v12 = vpop.xlane.xlu1 %1608 }
 0x606   : > { %6090 = vst [vmem:[#allocation13_spill] sm:$0xff] %v4691_v12  ;;  %vm1644_vm7 = vcmp.eq.f32.partialorder %v4442_v11, %v4691_v12  ;;  %vm1645_vm8 = vcmp.eq.f32.partialorder %v4445_v10, %v4691_v12  ;;  %vm1846_vm9 = vcmp.lt.s32.totalorder %v1674_v47, %v1675_v33  ;;  %v4700_v25 = vcvt.s32.f32 %v1833_v55 }
 0x607   : > { %v1676_v40 = vsel %vm1644_vm7, %v3165_v37, 256  ;;  %v1677_v19 = vsel %vm1645_vm8, %v3168_v39, 256  ;;  %v4702_v18 = vsel %vm1846_vm9, %v1674_v47, %v1675_v33 }
 0x608   : > { %v1849_v36 = vshra.s32 %v4702_v18, 16  ;;  %vm1862_vm10 = vcmp.lt.s32.totalorder %v1676_v40, %v1677_v19  ;;  %1836 = vmin.xlane.f32.xlu1 %v4700_v25 }
 0x609   : > { %v4706_v5 = vsel %vm1862_vm10, %v1676_v40, %v1677_v19 }
 0x60a   : > { %v4708_v11 = vcvt.s32.f32 %v1849_v36  ;;  %v1865_v10 = vshra.s32 %v4706_v5, 16 }
 0x60b   : > { %v4711_v12 = vpop.xlane.xlu0 %1611 }
 0x60c   : > { %6091 = vst [vmem:[#allocation14_spill] sm:$0xff] %v4711_v12  ;;  %vm1646_vm13 = vcmp.eq.f32.partialorder %v4475_v48, %v4711_v12  ;;  %vm1647_vm14 = vcmp.eq.f32.partialorder %v4478_v7, %v4711_v12  ;;  %1852 = vmin.xlane.f32.xlu0 %v4708_v11  ;;  %v4718_v47 = vcvt.s32.f32 %v1865_v10 }
 0x60d   : > { %v1678_v33 = vsel %vm1646_vm13, %v3165_v37, 256  ;;  %v1679_v55 = vsel %vm1647_vm14, %v3168_v39, 256  ;;  %v4722_v36 = vpop.xlane.xlu1 %1614 }
 0x60e   : > { %6092 = vst [vmem:[#allocation63_spill] sm:$0xff] %v4722_v36  ;;  %vm1648_vm0 = vcmp.eq.f32.partialorder %v4492_v56, %v4722_v36  ;;  %vm1649_vm11 = vcmp.eq.f32.partialorder %v4495_v24, %v4722_v36  ;;  %1868 = vmin.xlane.f32.xlu1 %v4718_v47  ;;  %vm1878_vm12 = vcmp.lt.s32.totalorder %v1678_v33, %v1679_v55 }
 0x60f   : > { %v1680_v40 = vsel %vm1648_vm0, %v3165_v37, 256  ;;  %v1681_v10 = vsel %vm1649_vm11, %v3168_v39, 256  ;;  %v4731_v19 = vsel %vm1878_vm12, %v1678_v33, %v1679_v55 }
 0x610   : > { %v1881_v7 = vshra.s32 %v4731_v19, 16  ;;  %vm1894_vm15 = vcmp.lt.s32.totalorder %v1680_v40, %v1681_v10 }
 0x611   : > { %v4734_v48 = vsel %vm1894_vm15, %v1680_v40, %v1681_v10 }
 0x612   : > { %v4736_v12 = vcvt.s32.f32 %v1881_v7  ;;  %v1897_v56 = vshra.s32 %v4734_v48, 16 }
 0x613   : > { %v4739_v14 = vpop.xlane.xlu0 %1617 }
 0x614   : > { %6093 = vst [vmem:[#allocation15_spill] sm:$0xff] %v4739_v14  ;;  %vm1650_vm1 = vcmp.eq.f32.partialorder %v4520_v1, %v4739_v14  ;;  %vm1651_vm2 = vcmp.eq.f32.partialorder %v4523_v29, %v4739_v14  ;;  %1884 = vmin.xlane.f32.xlu0 %v4736_v12  ;;  %v4746_v33 = vcvt.s32.f32 %v1897_v56 }
 0x615   : > { %v1682_v55 = vsel %vm1650_vm1, %v3165_v37, 256  ;;  %v1683_v40 = vsel %vm1651_vm2, %v3168_v39, 256  ;;  %v4750_v7 = vpop.xlane.xlu1 %1620 }
 0x616   : > { %6094 = vst [vmem:[#allocation16_spill] sm:$0xff] %v4750_v7  ;;  %vm1652_vm3 = vcmp.eq.f32.partialorder %v4540_v6, %v4750_v7  ;;  %vm1653_vm4 = vcmp.eq.f32.partialorder %v4543_v59, %v4750_v7  ;;  %1900 = vmin.xlane.f32.xlu1 %v4746_v33  ;;  %vm1910_vm5 = vcmp.lt.s32.totalorder %v1682_v55, %v1683_v40  ;;  %v1688_v7 = vand.u32 65535, %v4557_v32 }
 0x617   : > { %v1684_v10 = vsel %vm1652_vm3, %v3165_v37, 256  ;;  %v1685_v56 = vsel %vm1653_vm4, %v3168_v39, 256  ;;  %v4759_v29 = vsel %vm1910_vm5, %v1682_v55, %v1683_v40  ;;  %v1704_v40 = vand.u32 65535, %v4570_v9 }
 0x618   : > { %v1913_v1 = vshra.s32 %v4759_v29, 16  ;;  %vm1926_vm6 = vcmp.lt.s32.totalorder %v1684_v10, %v1685_v56  ;;  %v1690_v55 = vcvt.s32.f32 %v1688_v7  ;;  %v1752_v9 = vand.u32 65535, %v4602_v22 }
 0x619   : > { %v4762_v14 = vsel %vm1926_vm6, %v1684_v10, %v1685_v56  ;;  %v1706_v56 = vcvt.s32.f32 %v1704_v40 }
 0x61a   : > { %v4764_v24 = vcvt.s32.f32 %v1913_v1  ;;  %v1929_v6 = vshra.s32 %v4762_v14, 16 }
 0x61c   : > { %1916 = vmin.xlane.f32.xlu0 %v4764_v24  ;;  %v4768_v59 = vcvt.s32.f32 %v1929_v6  ;;  %v1720_v6 = vand.u32 65535, %v4584_v30  ;;  %v1754_v30 = vcvt.s32.f32 %v1752_v9  ;;  %v1800_v9 = vand.u32 65535, %v4662_v41 }
 0x61e   : > { %1932 = vmin.xlane.f32.xlu1 %v4768_v59  ;;  %v1722_v7 = vcvt.s32.f32 %v1720_v6  ;;  %v1768_v6 = vand.u32 65535, %v4638_v53  ;;  %v1802_v53 = vcvt.s32.f32 %v1800_v9 }
 0x678   : > { %v4772_v36 = vpop.xlane.xlu0 %1692 }
 0x679   : > { %vm1694_vm7 = vcmp.eq.f32.partialorder %v4566_v16, %v4772_v36 }
 0x67a   : > { %v1695_v1 = vsel %vm1694_vm7, %v1690_v55, inf  ;;  %v1736_v55 = vand.u32 65535, %v4618_v38 }
 0x67b   : > { %1696 = vmin.xlane.f32.xlu0 %v1695_v1 }
 0x67c   : > { %v4777_v10 = vpop.xlane.xlu1 %1708  ;;  %v1738_v22 = vcvt.s32.f32 %v1736_v55 }
 0x67d   : > { %vm1710_vm8 = vcmp.eq.f32.partialorder %v4580_v27, %v4777_v10 }
 0x67e   : > { %v1711_v57 = vsel %vm1710_vm8, %v1706_v56, inf }
 0x67f   : > { %1712 = vmin.xlane.f32.xlu1 %v1711_v57  ;;  %v1784_v57 = vand.u32 65535, %v4628_v61 }
 0x680   : > { %v4782_v32 = vpop.xlane.xlu0 %1724 }
 0x681   : > { %vm1726_vm9 = vcmp.eq.f32.partialorder %v4596_v3, %v4782_v32  ;;  %v1786_v38 = vcvt.s32.f32 %v1784_v57  ;;  %v1832_v57 = vand.u32 65535, %v4685_v51  ;;  %v1864_v51 = vand.u32 65535, %v4706_v5 }
 0x682   : > { %v1727_v16 = vsel %vm1726_vm9, %v1722_v7, inf  ;;  %v1770_v7 = vcvt.s32.f32 %v1768_v6  ;;  %v1896_v5 = vand.u32 65535, %v4734_v48  ;;  %v1928_v48 = vand.u32 65535, %v4762_v14 }
 0x683   : > { %1728 = vmin.xlane.f32.xlu0 %v1727_v16  ;;  %v1816_v16 = vand.u32 65535, %v4664_v4  ;;  %v1715_v14 = vcvt.f32.s32 %v4777_v10 }
 0x684   : > { %v4788_v40 = vpop.xlane.xlu0 %1756 }
 0x685   : > { %vm1758_vm10 = vcmp.eq.f32.partialorder %v4616_v17, %v4788_v40 }
 0x686   : > { %v1759_v27 = vsel %vm1758_vm10, %v1754_v30, inf }
 0x687   : > { %v4793_v1 = vpop.xlane.xlu1 %1740  ;;  %1760 = vmin.xlane.f32.xlu0 %v1759_v27 }
 0x688   : > { %vm1742_vm13 = vcmp.eq.f32.partialorder %v4632_v54, %v4793_v1 }
 0x689   : > { %v1743_v3 = vsel %vm1742_vm13, %v1738_v22, inf  ;;  %v4797_v56 = vpop.xlane.xlu0 %1788  ;;  %v1834_v22 = vcvt.s32.f32 %v1832_v57 }
 0x68a   : > { %1744 = vmin.xlane.f32.xlu1 %v1743_v3  ;;  %vm1790_vm14 = vcmp.eq.f32.partialorder %v4636_v8, %v4797_v56  ;;  %v1818_v8 = vcvt.s32.f32 %v1816_v16 }
 0x68b   : > { %v1791_v17 = vsel %vm1790_vm14, %v1786_v38, inf }
 0x68c   : > { %1792 = vmin.xlane.f32.xlu0 %v1791_v17 }
 0x68d   : > { %v4802_v61 = vpop.xlane.xlu1 %1772 }
 0x68e   : > { %vm1774_vm0 = vcmp.eq.f32.partialorder %v4658_v45, %v4802_v61  ;;  %v1848_v45 = vand.u32 65535, %v4702_v18  ;;  %v1866_v18 = vcvt.s32.f32 %v1864_v51 }
 0x68f   : > { %v1775_v54 = vsel %vm1774_vm0, %v1770_v7, inf }
 0x690   : > { %1776 = vmin.xlane.f32.xlu1 %v1775_v54  ;;  %v1850_v38 = vcvt.s32.f32 %v1848_v45  ;;  %v1898_v54 = vcvt.s32.f32 %v1896_v5 }
 0x691   : > { %v4808_v55 = vpop.xlane.xlu1 %1804 }
 0x692   : > { %v4810_v30 = vpop.xlane.xlu0 %1820  ;;  %vm1806_vm11 = vcmp.eq.f32.partialorder %v4675_v35, %v4808_v55 }
 0x693   : > { %vm1822_vm12 = vcmp.eq.f32.partialorder %v4679_v46, %v4810_v30  ;;  %v1807_v4 = vsel %vm1806_vm11, %v1802_v53, inf }
 0x694   : > { %v1823_v41 = vsel %vm1822_vm12, %v1818_v8, inf  ;;  %1808 = vmin.xlane.f32.xlu1 %v1807_v4  ;;  %v1930_v4 = vcvt.s32.f32 %v1928_v48  ;;  %v1779_v48 = vcvt.f32.s32 %v4802_v61 }
 0x695   : > { %1824 = vmin.xlane.f32.xlu0 %v1823_v41  ;;  %v4818_v27 = vpop.xlane.xlu1 %1836 }
 0x696   : > { %vm1838_vm15 = vcmp.eq.f32.partialorder %v4700_v25, %v4818_v27  ;;  %v1880_v25 = vand.u32 65535, %v4731_v19  ;;  %v1912_v19 = vand.u32 65535, %v4759_v29  ;;  %v1699_v29 = vcvt.f32.s32 %v4772_v36 }
 0x697   : > { %v1839_v3 = vsel %vm1838_vm15, %v1834_v22, inf }
 0x698   : > { %1840 = vmin.xlane.f32.xlu1 %v1839_v3  ;;  %v1882_v9 = vcvt.s32.f32 %v1880_v25  ;;  %v1914_v8 = vcvt.s32.f32 %v1912_v19  ;;  %v1700_v45 = vshll.u32 %v1699_v29, 16  ;;  %v1716_v3 = vshll.u32 %v1715_v14, 16 }
 0x699   : > { %v4823_v35 = vpop.xlane.xlu0 %1852  ;;  %v1763_v25 = vcvt.f32.s32 %v4788_v40  ;;  %v1811_v14 = vcvt.f32.s32 %v4808_v55  ;;  %v6096_v55 = vld [vmem:[#allocation17_spill] sm:$0xff] }
 0x69a   : > { %vm1854_vm1 = vcmp.eq.f32.partialorder %v4708_v11, %v4823_v35 }
 0x69b   : > { %v4827_v46 = vpop.xlane.xlu1 %1868  ;;  %v1855_v6 = vsel %vm1854_vm1, %v1850_v38, inf  ;;  %v1731_v38 = vcvt.f32.s32 %v4782_v32 }
 0x69c   : > { %vm1870_vm2 = vcmp.eq.f32.partialorder %v4718_v47, %v4827_v46  ;;  %1856 = vmin.xlane.f32.xlu0 %v1855_v6 }
 0x69d   : > { %v1871_v17 = vsel %vm1870_vm2, %v1866_v18, inf }
 0x69e   : > { %1872 = vmin.xlane.f32.xlu1 %v1871_v17 }
 0x6a1   : > { %v4833_v7 = vpop.xlane.xlu0 %1884 }
 0x6a2   : > { %vm1886_vm3 = vcmp.eq.f32.partialorder %v4736_v12, %v4833_v7 }
 0x6a3   : > { %v4837_v11 = vpop.xlane.xlu1 %1900  ;;  %v1887_v16 = vsel %vm1886_vm3, %v1882_v9, inf  ;;  %v1732_v9 = vshll.u32 %v1731_v38, 16 }
 0x6a4   : > { %vm1902_vm4 = vcmp.eq.f32.partialorder %v4746_v33, %v4837_v11  ;;  %1888 = vmin.xlane.f32.xlu0 %v1887_v16 }
 0x6a5   : > { %v1903_v47 = vsel %vm1902_vm4, %v1898_v54, inf  ;;  %v1764_v54 = vshll.u32 %v1763_v25, 16 }
 0x6a6   : > { %1904 = vmin.xlane.f32.xlu1 %v1903_v47  ;;  %v1747_v47 = vcvt.f32.s32 %v4793_v1 }
 0x6a9   : > { %v4843_v53 = vpop.xlane.xlu0 %1916 }
 0x6aa   : > { %vm1918_vm5 = vcmp.eq.f32.partialorder %v4764_v24, %v4843_v53 }
 0x6ab   : > { %v4847_v12 = vpop.xlane.xlu1 %1932  ;;  %v1919_v57 = vsel %vm1918_vm5, %v1914_v8, inf }
 0x6ac   : > { %vm1934_vm6 = vcmp.eq.f32.partialorder %v4768_v59, %v4847_v12  ;;  %1920 = vmin.xlane.f32.xlu0 %v1919_v57  ;;  %v1748_v57 = vshll.u32 %v1747_v47, 16 }
 0x6ad   : > { %v1935_v33 = vsel %vm1934_vm6, %v1930_v4, inf }
 0x6ae   : > { %1936 = vmin.xlane.f32.xlu1 %v1935_v33 }
 0x708   : > { %v1697_v41 = vpop.xlane.xlu0 %1696 }
 0x709   : > { %v1698_v22 = vcvt.f32.s32 %v1697_v41  ;;  %v1827_v41 = vcvt.f32.s32 %v4810_v30 }
 0x70b   : > { %v1701_v51 = vadd.s32 %v1700_v45, %v1698_v22 }
 0x70c   : > { %v1713_v24 = vpop.xlane.xlu1 %1712 }
 0x70d   : > { %vm1942_vm7 = vcmp.eq.s32.totalorder %v3165_v37, %v1701_v51  ;;  %vm1943_vm8 = vcmp.eq.s32.totalorder %v3168_v39, %v1701_v51  ;;  %v1714_v59 = vcvt.f32.s32 %v1713_v24  ;;  %v6098_v24 = vld [vmem:[#allocation20_spill] sm:$0xff] }
 0x70e   : > { %v4858_v6 = vsel %vm1942_vm7, %v4547_v52, %v4177_v26  ;;  %v4862_v36 = vsel %vm1943_vm8, %v4547_v52, %v4168_v13  ;;  %v4865_v10 = vsel %vm1942_vm7, -1.0, %v4171_v28  ;;  %v4868_v18 = vsel %vm1943_vm8, -1.0, %v4174_v2 }
 0x70f   : > { %v1717_v32 = vadd.s32 %v1716_v3, %v1714_v59  ;;  %v2038_v17 = vmax.f32 %v4865_v10, %v4868_v18  ;;  %v6097_v3 = vld [vmem:[#allocation18_spill] sm:$0xff] }
 0x710   : > { %v1729_v5 = vpop.xlane.xlu0 %1728 }
 0x711   : > { %vm1944_vm9 = vcmp.eq.s32.totalorder %v3165_v37, %v1717_v32  ;;  %vm1945_vm10 = vcmp.eq.s32.totalorder %v3168_v39, %v1717_v32  ;;  %v1730_v13 = vcvt.f32.s32 %v1729_v5  ;;  %2039 = vmax.xlane.f32.xlu0 %v2038_v17  ;;  %v6099_v32 = vld [vmem:[#allocation19_spill] sm:$0xff]  ;;  %v6100_v17 = vld [vmem:[#allocation12_spill] sm:$0xff]  ;;  %v6101_v5 = vld [vmem:[#allocation21_spill] sm:$0xff] }
 0x712   : > { %v4877_v28 = vsel %vm1944_vm9, %v4555_v43, %v4224_v23  ;;  %v4881_v2 = vsel %vm1945_vm10, %v4555_v43, %v4215_v60  ;;  %v4884_v26 = vsel %vm1944_vm9, -1.0, %v4218_v50  ;;  %v4887_v52 = vsel %vm1945_vm10, -1.0, %v4221_v44 }
 0x713   : > { %v1733_v40 = vadd.s32 %v1732_v9, %v1730_v13  ;;  %v2041_v16 = vmax.f32 %v4884_v26, %v4887_v52  ;;  %v1795_v23 = vcvt.f32.s32 %v4797_v56  ;;  %v6102_v13 = vld [vmem:[#allocation22_spill] sm:$0xff] }
 0x714   : > { %v1761_v19 = vpop.xlane.xlu0 %1760 }
 0x715   : > { %vm1946_vm13 = vcmp.eq.s32.totalorder %v3165_v37, %v1733_v40  ;;  %vm1947_vm14 = vcmp.eq.s32.totalorder %v3168_v39, %v1733_v40  ;;  %v1762_v60 = vcvt.f32.s32 %v1761_v19  ;;  %2042 = vmax.xlane.f32.xlu1 %v2041_v16  ;;  %v1796_v33 = vshll.u32 %v1795_v23, 16  ;;  %v6103_v16 = vld [vmem:[#allocation23_spill] sm:$0xff] }
 0x716   : > { %v4898_v50 = vsel %vm1946_vm13, %v4568_v21, %v4247_v62  ;;  %v4902_v44 = vsel %vm1947_vm14, %v4568_v21, %v4250_v49  ;;  %v4905_v43 = vsel %vm1946_vm13, -1.0, %v4253_v20  ;;  %v4908_v1 = vsel %vm1947_vm14, -1.0, %v4256_v58 }
 0x717   : > { %v1765_v56 = vadd.s32 %v1764_v54, %v1762_v60  ;;  %v1745_v61 = vpop.xlane.xlu1 %1744  ;;  %v2044_v8 = vmax.f32 %v4905_v43, %v4908_v1  ;;  %v1780_v62 = vshll.u32 %v1779_v48, 16  ;;  %v1812_v19 = vshll.u32 %v1811_v14, 16 }
 0x718   : > { %v1746_v4 = vcvt.f32.s32 %v1745_v61  ;;  %v1828_v48 = vshll.u32 %v1827_v41, 16  ;;  %v1843_v60 = vcvt.f32.s32 %v4818_v27  ;;  %v6108_v27 = vld [vmem:[#allocation33_spill] sm:$0xff] }
 0x719   : > { %vm1950_vm0 = vcmp.eq.s32.totalorder %v3165_v37, %v1765_v56  ;;  %vm1951_vm11 = vcmp.eq.s32.totalorder %v3168_v39, %v1765_v56  ;;  %v1793_v49 = vpop.xlane.xlu0 %1792  ;;  %2045 = vmax.xlane.f32.xlu0 %v2044_v8 }
 0x71a   : > { %v4916_v20 = vsel %vm1950_vm0, %v4582_v15, %v4265_v63  ;;  %v4920_v58 = vsel %vm1951_vm11, %v4582_v15, %v4269_v34  ;;  %v1749_v21 = vadd.s32 %v1748_v57, %v1746_v4  ;;  %v1794_v29 = vcvt.f32.s32 %v1793_v49  ;;  %v6095_v15 = vld [vmem:[#allocation11_spill] sm:$0xff]  ;;  %v6104_v4 = vld [vmem:[#allocation24_spill] sm:$0xff]  ;;  %v6106_v49 = vld [vmem:[#allocation25_spill] sm:$0xff] }
 0x71b   : > { %v4925_v45 = vsel %vm1950_vm0, -1.0, %v4272_v42  ;;  %v4928_v22 = vsel %vm1951_vm11, -1.0, %v4275_v0 }
 0x71c   : > { %vm1948_vm12 = vcmp.eq.s32.totalorder %v3165_v37, %v1749_v21  ;;  %vm1949_vm15 = vcmp.eq.s32.totalorder %v3168_v39, %v1749_v21  ;;  %v1797_v63 = vadd.s32 %v1796_v33, %v1794_v29  ;;  %v2050_v34 = vmax.f32 %v4925_v45, %v4928_v22  ;;  %v6105_v33 = vld [vmem:[#allocation31_spill] sm:$0xff]  ;;  %v6107_v29 = vld [vmem:[#allocation52_spill] sm:$0xff] }
 0x71d   : > { %v4936_v51 = vsel %vm1948_vm12, %v6095_v15, %v4283_v31  ;;  %v4940_v30 = vsel %vm1949_vm15, %v6095_v15, %v6096_v55  ;;  %v1777_v42 = vpop.xlane.xlu1 %1776  ;;  %v4943_v0 = vsel %vm1948_vm12, -1.0, %v6097_v3  ;;  %v4946_v38 = vsel %vm1949_vm15, -1.0, %v6098_v24 }
 0x71e   : > { %vm1954_vm1 = vcmp.eq.s32.totalorder %v3165_v37, %v1797_v63  ;;  %vm1955_vm2 = vcmp.eq.s32.totalorder %v3168_v39, %v1797_v63  ;;  %v1778_v59 = vcvt.f32.s32 %v1777_v42  ;;  %2051 = vmax.xlane.f32.xlu0 %v2050_v34  ;;  %v2047_v31 = vmax.f32 %v4943_v0, %v4946_v38 }
 0x71f   : > { %v4954_v25 = vsel %vm1954_vm1, %v6100_v17, %v6099_v32  ;;  %v4958_v9 = vsel %vm1955_vm2, %v6100_v17, %v6101_v5  ;;  %v4961_v40 = vsel %vm1954_vm1, -1.0, %v6102_v13  ;;  %v4964_v54 = vsel %vm1955_vm2, -1.0, %v6103_v16  ;;  %v6110_v32 = vld [vmem:[#allocation50_spill] sm:$0xff]  ;;  %v6112_v5 = vld [vmem:[#allocation53_spill] sm:$0xff]  ;;  %v6117_v16 = vld [vmem:[#allocation36_spill] sm:$0xff] }
 0x720   : > { %v1781_v47 = vadd.s32 %v1780_v62, %v1778_v59  ;;  %2048 = vmax.xlane.f32.xlu1 %v2047_v31  ;;  %v2056_v23 = vmax.f32 %v4961_v40, %v4964_v54  ;;  %v1844_v55 = vshll.u32 %v1843_v60, 16  ;;  %v1859_v42 = vcvt.f32.s32 %v4823_v35  ;;  %v6109_v31 = vld [vmem:[#allocation34_spill] sm:$0xff]  ;;  %v6120_v60 = vld [vmem:[#allocation37_spill] sm:$0xff] }
 0x721   : > { %v1809_v56 = vpop.xlane.xlu1 %1808  ;;  %v1875_v3 = vcvt.f32.s32 %v4827_v46  ;;  %v1891_v24 = vcvt.f32.s32 %v4833_v7  ;;  %v6114_v46 = vld [vmem:[#allocation35_spill] sm:$0xff]  ;;  %v6115_v7 = vld [vmem:[#allocation32_spill] sm:$0xff] }
 0x722   : > { %v1825_v61 = vpop.xlane.xlu0 %1824  ;;  %vm1952_vm3 = vcmp.eq.s32.totalorder %v3165_v37, %v1781_v47  ;;  %vm1953_vm4 = vcmp.eq.s32.totalorder %v3168_v39, %v1781_v47  ;;  %v1810_v8 = vcvt.f32.s32 %v1809_v56  ;;  %2057 = vmax.xlane.f32.xlu0 %v2056_v23 }
 0x723   : > { %v1826_v57 = vcvt.f32.s32 %v1825_v61  ;;  %v4973_v62 = vsel %vm1952_vm3, %v6105_v33, %v6104_v4  ;;  %v4977_v21 = vsel %vm1953_vm4, %v6105_v33, %v6106_v49  ;;  %v4980_v14 = vsel %vm1952_vm3, -1.0, %v6107_v29  ;;  %v6122_v29 = vld [vmem:[#allocation41_spill] sm:$0xff] }
 0x724   : > { %v4983_v41 = vsel %vm1953_vm4, -1.0, %v6108_v27  ;;  %v1813_v63 = vadd.s32 %v1812_v19, %v1810_v8  ;;  %v6119_v19 = vld [vmem:[#allocation54_spill] sm:$0xff]  ;;  %v1860_v4 = vshll.u32 %v1859_v42, 16 }
 0x725   : > { %v1829_v34 = vadd.s32 %v1828_v48, %v1826_v57  ;;  %v2053_v15 = vmax.f32 %v4980_v14, %v4983_v41  ;;  %v1841_v59 = vpop.xlane.xlu1 %1840  ;;  %v6121_v8 = vld [vmem:[#allocation26_spill] sm:$0xff] }
 0x726   : > { %vm1956_vm5 = vcmp.eq.s32.totalorder %v3165_v37, %v1813_v63  ;;  %vm1957_vm6 = vcmp.eq.s32.totalorder %v3168_v39, %v1813_v63  ;;  %v1842_v23 = vcvt.f32.s32 %v1841_v59  ;;  %v6123_v42 = vld [vmem:[#allocation38_spill] sm:$0xff] }
 0x727   : > { %vm1958_vm7 = vcmp.eq.s32.totalorder %v3165_v37, %v1829_v34  ;;  %vm1959_vm8 = vcmp.eq.s32.totalorder %v3168_v39, %v1829_v34  ;;  %2054 = vmax.xlane.f32.xlu1 %v2053_v15  ;;  %v4996_v17 = vsel %vm1956_vm5, %v6110_v32, %v6109_v31  ;;  %v5000_v35 = vsel %vm1957_vm6, %v6110_v32, %v6112_v5 }
 0x728   : > { %6111 = vst [vmem:[#allocation11_spill] sm:$0xff] %v4996_v17  ;;  %6113 = vst [vmem:[#allocation17_spill] sm:$0xff] %v5000_v35  ;;  %v5004_v13 = vsel %vm1958_vm7, %v6115_v7, %v6114_v46  ;;  %v5008_v47 = vsel %vm1959_vm8, %v6115_v7, %v6117_v16  ;;  %v5011_v48 = vsel %vm1956_vm5, -1.0, %v6119_v19  ;;  %v5014_v56 = vsel %vm1957_vm6, -1.0, %v6120_v60  ;;  %v6124_v46 = vld [vmem:[#allocation51_spill] sm:$0xff]  ;;  %v6131_v19 = vld [vmem:[#allocation42_spill] sm:$0xff] }
 0x729   : > { %6116 = vst [vmem:[#allocation18_spill] sm:$0xff] %v5004_v13  ;;  %6118 = vst [vmem:[#allocation20_spill] sm:$0xff] %v5008_v47  ;;  %v1857_v61 = vpop.xlane.xlu0 %1856  ;;  %v5017_v57 = vsel %vm1958_vm7, -1.0, %v6121_v8  ;;  %v2059_v33 = vmax.f32 %v5011_v48, %v5014_v56  ;;  %v5022_v27 = vsel %vm1959_vm8, -1.0, %v6122_v29  ;;  %v1845_v63 = vadd.s32 %v1844_v55, %v1842_v23  ;;  %v6126_v16 = vld [vmem:[#allocation55_spill] sm:$0xff]  ;;  %v6128_v23 = vld [vmem:[#allocation40_spill] sm:$0xff] }
 0x72a   : > { %v1858_v49 = vcvt.f32.s32 %v1857_v61  ;;  %v2062_v34 = vmax.f32 %v5017_v57, %v5022_v27  ;;  %v1876_v32 = vshll.u32 %v1875_v3, 16  ;;  %v1892_v5 = vshll.u32 %v1891_v24, 16  ;;  %v6129_v3 = vld [vmem:[#allocation62_spill] sm:$0xff]  ;;  %v6133_v8 = vld [vmem:[#allocation56_spill] sm:$0xff] }
 0x72b   : > { %v1873_v15 = vpop.xlane.xlu1 %1872  ;;  %2060 = vmax.xlane.f32.xlu1 %v2059_v33  ;;  %vm1960_vm9 = vcmp.eq.s32.totalorder %v3165_v37, %v1845_v63  ;;  %vm1961_vm10 = vcmp.eq.s32.totalorder %v3168_v39, %v1845_v63  ;;  %v1907_v33 = vcvt.f32.s32 %v4837_v11  ;;  %v6135_v63 = vld [vmem:[#allocation43_spill] sm:$0xff] }
 0x72c   : > { %v1861_v59 = vadd.s32 %v1860_v4, %v1858_v49  ;;  %v1874_v31 = vcvt.f32.s32 %v1873_v15  ;;  %2063 = vmax.xlane.f32.xlu0 %v2062_v34  ;;  %v5030_v7 = vsel %vm1960_vm9, %v6124_v46, %v6123_v42  ;;  %v5034_v55 = vsel %vm1961_vm10, %v6124_v46, %v6126_v16  ;;  %v6134_v49 = vld [vmem:[#allocation39_spill] sm:$0xff]  ;;  %v6136_v15 = vld [vmem:[#allocation57_spill] sm:$0xff]  ;;  %v6137_v42 = vld [vmem:[#allocation44_spill] sm:$0xff] }
 0x72d   : > { %6125 = vst [vmem:[#allocation19_spill] sm:$0xff] %v5030_v7  ;;  %6127 = vst [vmem:[#allocation12_spill] sm:$0xff] %v5034_v55  ;;  %v5047_v4 = vsel %vm1960_vm9, -1.0, %v6133_v8  ;;  %v5051_v29 = vsel %vm1961_vm10, -1.0, %v6134_v49  ;;  %v6138_v46 = vld [vmem:[#allocation13_spill] sm:$0xff]  ;;  %v6142_v8 = vld [vmem:[#allocation27_spill] sm:$0xff] }
 0x72e   : > { %vm1962_vm13 = vcmp.eq.s32.totalorder %v3165_v37, %v1861_v59  ;;  %vm1963_vm14 = vcmp.eq.s32.totalorder %v3168_v39, %v1861_v59  ;;  %v1877_v61 = vadd.s32 %v1876_v32, %v1874_v31  ;;  %v2065_v31 = vmax.f32 %v5047_v4, %v5051_v29 }
 0x72f   : > { %v5040_v24 = vsel %vm1962_vm13, %v6129_v3, %v6128_v23  ;;  %v5044_v60 = vsel %vm1963_vm14, %v6129_v3, %v6131_v19  ;;  %v5054_v34 = vsel %vm1962_vm13, -1.0, %v6135_v63  ;;  %v5057_v59 = vsel %vm1963_vm14, -1.0, %v6136_v15  ;;  %v6140_v23 = vld [vmem:[#allocation45_spill] sm:$0xff]  ;;  %v6143_v63 = vld [vmem:[#allocation46_spill] sm:$0xff] }
 0x730   : > { %6130 = vst [vmem:[#allocation21_spill] sm:$0xff] %v5040_v24  ;;  %6132 = vst [vmem:[#allocation22_spill] sm:$0xff] %v5044_v60  ;;  %vm1964_vm0 = vcmp.eq.s32.totalorder %v3165_v37, %v1877_v61  ;;  %vm1965_vm11 = vcmp.eq.s32.totalorder %v3168_v39, %v1877_v61  ;;  %v2068_v11 = vmax.f32 %v5054_v34, %v5057_v59  ;;  %2066 = vmax.xlane.f32.xlu1 %v2065_v31  ;;  %v6145_v31 = vld [vmem:[#allocation14_spill] sm:$0xff] }
 0x731   : > { %v1889_v32 = vpop.xlane.xlu0 %1888  ;;  %v5067_v16 = vsel %vm1964_vm0, %v6138_v46, %v6137_v42  ;;  %v5071_v3 = vsel %vm1965_vm11, %v6138_v46, %v6140_v23  ;;  %v5074_v49 = vsel %vm1964_vm0, -1.0, %v6142_v8  ;;  %v5077_v15 = vsel %vm1965_vm11, -1.0, %v6143_v63  ;;  %v6144_v46 = vld [vmem:[#allocation28_spill] sm:$0xff]  ;;  %v6147_v23 = vld [vmem:[#allocation47_spill] sm:$0xff] }
 0x732   : > { %6139 = vst [vmem:[#allocation23_spill] sm:$0xff] %v5067_v16  ;;  %6141 = vst [vmem:[#allocation24_spill] sm:$0xff] %v5071_v3  ;;  %v1890_v19 = vcvt.f32.s32 %v1889_v32  ;;  %2069 = vmax.xlane.f32.xlu0 %v2068_v11  ;;  %v1908_v60 = vshll.u32 %v1907_v33, 16  ;;  %v2071_v42 = vmax.f32 %v5074_v49, %v5077_v15  ;;  %v1923_v16 = vcvt.f32.s32 %v4843_v53 }
 0x733   : > { %v1905_v61 = vpop.xlane.xlu1 %1904  ;;  %v1939_v53 = vcvt.f32.s32 %v4847_v12  ;;  %v6157_v12 = vld [vmem:[#allocation8_spill] sm:$0xff] }
 0x734   : > { %v1893_v24 = vadd.s32 %v1892_v5, %v1890_v19  ;;  %v1906_v55 = vcvt.f32.s32 %v1905_v61  ;;  %2072 = vmax.xlane.f32.xlu1 %v2071_v42  ;;  %v6149_v5 = vld [vmem:[#allocation58_spill] sm:$0xff]  ;;  %v6150_v19 = vld [vmem:[#allocation5_spill] sm:$0xff]  ;;  %v6154_v42 = vld [vmem:[#allocation59_spill] sm:$0xff] }
 0x736   : > { %vm1966_vm12 = vcmp.eq.s32.totalorder %v3165_v37, %v1893_v24  ;;  %vm1967_vm15 = vcmp.eq.s32.totalorder %v3168_v39, %v1893_v24  ;;  %v1909_v32 = vadd.s32 %v1908_v60, %v1906_v55  ;;  %v6151_v24 = vld [vmem:[#allocation6_spill] sm:$0xff]  ;;  %v6152_v60 = vld [vmem:[#allocation63_spill] sm:$0xff] }
 0x737   : > { %v5086_v11 = vsel %vm1966_vm12, %v6145_v31, %v6144_v46  ;;  %v5090_v8 = vsel %vm1967_vm15, %v6145_v31, %v6147_v23  ;;  %v5093_v33 = vsel %vm1966_vm12, -1.0, %v6149_v5  ;;  %v5096_v61 = vsel %vm1967_vm15, -1.0, %v6150_v19  ;;  %v6156_v23 = vld [vmem:[#allocation7_spill] sm:$0xff] }
 0x738   : > { %6146 = vst [vmem:[#allocation31_spill] sm:$0xff] %v5086_v11  ;;  %6148 = vst [vmem:[#allocation25_spill] sm:$0xff] %v5090_v8  ;;  %vm1968_vm1 = vcmp.eq.s32.totalorder %v3165_v37, %v1909_v32  ;;  %vm1969_vm2 = vcmp.eq.s32.totalorder %v3168_v39, %v1909_v32  ;;  %v2074_v55 = vmax.f32 %v5093_v33, %v5096_v61  ;;  %v1924_v8 = vshll.u32 %v1923_v16, 16  ;;  %v6161_v16 = vld [vmem:[#allocation48_spill] sm:$0xff] }
 0x739   : > { %v5105_v63 = vsel %vm1968_vm1, %v6152_v60, %v6151_v24  ;;  %v5109_v46 = vsel %vm1969_vm2, %v6152_v60, %v6154_v42  ;;  %v1921_v31 = vpop.xlane.xlu0 %1920  ;;  %v5112_v5 = vsel %vm1968_vm1, -1.0, %v6156_v23  ;;  %v5115_v19 = vsel %vm1969_vm2, -1.0, %v6157_v12  ;;  %v6158_v42 = vld [vmem:[#allocation29_spill] sm:$0xff]  ;;  %v6159_v23 = vld [vmem:[#allocation15_spill] sm:$0xff] }
 0x73a   : > { %6153 = vst [vmem:[#allocation52_spill] sm:$0xff] %v5105_v63  ;;  %6155 = vst [vmem:[#allocation33_spill] sm:$0xff] %v5109_v46  ;;  %v1922_v32 = vcvt.f32.s32 %v1921_v31  ;;  %2075 = vmax.xlane.f32.xlu0 %v2074_v55  ;;  %v2077_v11 = vmax.f32 %v5112_v5, %v5115_v19  ;;  %v1940_v24 = vshll.u32 %v1939_v53, 16  ;;  %v6163_v31 = vld [vmem:[#allocation30_spill] sm:$0xff]  ;;  %v6164_v53 = vld [vmem:[#allocation49_spill] sm:$0xff] }
 0x73b   : > { %v1937_v3 = vpop.xlane.xlu1 %1936 }
 0x73c   : > { %v1925_v63 = vadd.s32 %v1924_v8, %v1922_v32  ;;  %v1938_v7 = vcvt.f32.s32 %v1937_v3  ;;  %2078 = vmax.xlane.f32.xlu1 %v2077_v11  ;;  %v6165_v3 = vld [vmem:[#allocation60_spill] sm:$0xff]  ;;  %v6168_v32 = vld [vmem:[#allocation9_spill] sm:$0xff] }
 0x73d   : > { %v6166_v11 = vld [vmem:[#allocation16_spill] sm:$0xff] }
 0x73e   : > { %vm1970_vm3 = vcmp.eq.s32.totalorder %v3165_v37, %v1925_v63  ;;  %vm1971_vm4 = vcmp.eq.s32.totalorder %v3168_v39, %v1925_v63  ;;  %v1941_v60 = vadd.s32 %v1940_v24, %v1938_v7 }
 0x73f   : > { %v5123_v12 = vsel %vm1970_vm3, %v6159_v23, %v6158_v42  ;;  %v5127_v55 = vsel %vm1971_vm4, %v6159_v23, %v6161_v16  ;;  %v5130_v46 = vsel %vm1970_vm3, -1.0, %v6163_v31  ;;  %v5133_v8 = vsel %vm1971_vm4, -1.0, %v6164_v53  ;;  %v6170_v42 = vld [vmem:[#allocation10_spill] sm:$0xff]  ;;  %v6171_v16 = vld [vmem:[#allocation61_spill] sm:$0xff] }
 0x740   : > { %6160 = vst [vmem:[#allocation34_spill] sm:$0xff] %v5123_v12  ;;  %6162 = vst [vmem:[#allocation50_spill] sm:$0xff] %v5127_v55  ;;  %vm1972_vm5 = vcmp.eq.s32.totalorder %v3165_v37, %v1941_v60  ;;  %vm1973_vm6 = vcmp.eq.s32.totalorder %v3168_v39, %v1941_v60  ;;  %v2080_v7 = vmax.f32 %v5130_v46, %v5133_v8 }
 0x741   : > { %v5141_v63 = vsel %vm1972_vm5, %v6166_v11, %v6165_v3  ;;  %v5145_v24 = vsel %vm1973_vm6, %v6166_v11, %v6168_v32  ;;  %v5148_v23 = vsel %vm1972_vm5, -1.0, %v6170_v42  ;;  %v5151_v31 = vsel %vm1973_vm6, -1.0, %v6171_v16 }
 0x742   : > { %6167 = vst [vmem:[#allocation53_spill] sm:$0xff] %v5141_v63  ;;  %6169 = vst [vmem:[#allocation35_spill] sm:$0xff] %v5145_v24  ;;  %2081 = vmax.xlane.f32.xlu0 %v2080_v7  ;;  %v2083_v60 = vmax.f32 %v5148_v23, %v5151_v31 }
 0x744   : > { %2084 = vmax.xlane.f32.xlu1 %v2083_v60 }
 0x79e   : > { %v5155_v53 = vpop.xlane.xlu0 %2039 }
 0x79f   : > { %vm2086_vm7 = vcmp.eq.f32.partialorder %v4865_v10, %v5155_v53  ;;  %vm2087_vm8 = vcmp.eq.f32.partialorder %v4868_v18, %v5155_v53 }
 0x7a0   : > { %v2118_v3 = vsel %vm2086_vm7, %v3165_v37, 256  ;;  %v2119_v11 = vsel %vm2087_vm8, %v3168_v39, 256 }
 0x7a1   : > { %vm2150_vm9 = vcmp.lt.s32.totalorder %v2118_v3, %v2119_v11 }
 0x7a2   : > { %v5163_v32 = vpop.xlane.xlu1 %2042  ;;  %v5165_v7 = vsel %vm2150_vm9, %v2118_v3, %v2119_v11 }
 0x7a3   : > { %vm2088_vm10 = vcmp.eq.f32.partialorder %v4884_v26, %v5163_v32  ;;  %vm2089_vm13 = vcmp.eq.f32.partialorder %v4887_v52, %v5163_v32  ;;  %v2153_v10 = vshra.s32 %v5165_v7, 16 }
 0x7a4   : > { %v2120_v42 = vsel %vm2088_vm10, %v3165_v37, 256  ;;  %v2121_v18 = vsel %vm2089_vm13, %v3168_v39, 256 }
 0x7a5   : > { %v5174_v16 = vcvt.s32.f32 %v2153_v10  ;;  %vm2166_vm14 = vcmp.lt.s32.totalorder %v2120_v42, %v2121_v18 }
 0x7a6   : > { %v5176_v60 = vpop.xlane.xlu0 %2045  ;;  %v5178_v24 = vsel %vm2166_vm14, %v2120_v42, %v2121_v18 }
 0x7a7   : > { %vm2090_vm0 = vcmp.eq.f32.partialorder %v4905_v43, %v5176_v60  ;;  %vm2091_vm11 = vcmp.eq.f32.partialorder %v4908_v1, %v5176_v60  ;;  %2156 = vmin.xlane.f32.xlu0 %v5174_v16  ;;  %v2169_v26 = vshra.s32 %v5178_v24, 16 }
 0x7a8   : > { %v2122_v52 = vsel %vm2090_vm0, %v3165_v37, 256  ;;  %v2123_v3 = vsel %vm2091_vm11, %v3168_v39, 256 }
 0x7a9   : > { %v5188_v11 = vcvt.s32.f32 %v2169_v26  ;;  %vm2182_vm12 = vcmp.lt.s32.totalorder %v2122_v52, %v2123_v3 }
 0x7aa   : > { %v5190_v10 = vsel %vm2182_vm12, %v2122_v52, %v2123_v3 }
 0x7ab   : > { %v5192_v42 = vpop.xlane.xlu0 %2051  ;;  %2172 = vmin.xlane.f32.xlu1 %v5188_v11  ;;  %v2185_v43 = vshra.s32 %v5190_v10, 16 }
 0x7ac   : > { %vm2094_vm15 = vcmp.eq.f32.partialorder %v4925_v45, %v5192_v42  ;;  %vm2095_vm1 = vcmp.eq.f32.partialorder %v4928_v22, %v5192_v42 }
 0x7ad   : > { %v2126_v1 = vsel %vm2094_vm15, %v3165_v37, 256  ;;  %v2127_v18 = vsel %vm2095_vm1, %v3168_v39, 256  ;;  %v5202_v26 = vpop.xlane.xlu1 %2048  ;;  %v5204_v52 = vcvt.s32.f32 %v2185_v43 }
 0x7ae   : > { %vm2092_vm2 = vcmp.eq.f32.partialorder %v4943_v0, %v5202_v26  ;;  %vm2093_vm3 = vcmp.eq.f32.partialorder %v4946_v38, %v5202_v26  ;;  %vm2214_vm4 = vcmp.lt.s32.totalorder %v2126_v1, %v2127_v18 }
 0x7af   : > { %v2124_v45 = vsel %vm2092_vm2, %v3165_v37, 256  ;;  %v2125_v3 = vsel %vm2093_vm3, %v3168_v39, 256  ;;  %v5212_v22 = vpop.xlane.xlu0 %2057  ;;  %2188 = vmin.xlane.f32.xlu0 %v5204_v52  ;;  %v5215_v63 = vsel %vm2214_vm4, %v2126_v1, %v2127_v18 }
 0x7b0   : > { %vm2098_vm5 = vcmp.eq.f32.partialorder %v4961_v40, %v5212_v22  ;;  %vm2099_vm6 = vcmp.eq.f32.partialorder %v4964_v54, %v5212_v22  ;;  %v2217_v0 = vshra.s32 %v5215_v63, 16  ;;  %vm2198_vm7 = vcmp.lt.s32.totalorder %v2124_v45, %v2125_v3 }
 0x7b1   : > { %v2130_v38 = vsel %vm2098_vm5, %v3165_v37, 256  ;;  %v2131_v43 = vsel %vm2099_vm6, %v3168_v39, 256  ;;  %v5224_v55 = vsel %vm2198_vm7, %v2124_v45, %v2125_v3 }
 0x7b2   : > { %v5226_v12 = vcvt.s32.f32 %v2217_v0  ;;  %v2201_v1 = vshra.s32 %v5224_v55, 16  ;;  %vm2246_vm8 = vcmp.lt.s32.totalorder %v2130_v38, %v2131_v43 }
 0x7b3   : > { %v5231_v40 = vsel %vm2246_vm8, %v2130_v38, %v2131_v43 }
 0x7b4   : > { %v5229_v18 = vpop.xlane.xlu1 %2054  ;;  %2220 = vmin.xlane.f32.xlu0 %v5226_v12  ;;  %v5238_v54 = vcvt.s32.f32 %v2201_v1  ;;  %v2249_v45 = vshra.s32 %v5231_v40, 16 }
 0x7b5   : > { %vm2096_vm9 = vcmp.eq.f32.partialorder %v4980_v14, %v5229_v18  ;;  %vm2097_vm10 = vcmp.eq.f32.partialorder %v4983_v41, %v5229_v18 }
 0x7b6   : > { %v2128_v3 = vsel %vm2096_vm9, %v3165_v37, 256  ;;  %v2129_v0 = vsel %vm2097_vm10, %v3168_v39, 256  ;;  %2204 = vmin.xlane.f32.xlu1 %v5238_v54  ;;  %v5244_v38 = vcvt.s32.f32 %v2249_v45 }
 0x7b7   : > { %vm2230_vm13 = vcmp.lt.s32.totalorder %v2128_v3, %v2129_v0 }
 0x7b8   : > { %v5246_v43 = vsel %vm2230_vm13, %v2128_v3, %v2129_v0  ;;  %v5248_v14 = vpop.xlane.xlu1 %2060  ;;  %2252 = vmin.xlane.f32.xlu0 %v5244_v38 }
 0x7b9   : > { %6172 = vst [vmem:[#allocation32_spill] sm:$0xff] %v5248_v14  ;;  %v2233_v41 = vshra.s32 %v5246_v43, 16  ;;  %vm2100_vm14 = vcmp.eq.f32.partialorder %v5011_v48, %v5248_v14  ;;  %vm2101_vm0 = vcmp.eq.f32.partialorder %v5014_v56, %v5248_v14  ;;  %v5256_v1 = vpop.xlane.xlu0 %2063 }
 0x7ba   : > { %6173 = vst [vmem:[#allocation36_spill] sm:$0xff] %v5256_v1  ;;  %v2132_v45 = vsel %vm2100_vm14, %v3165_v37, 256  ;;  %v2133_v47 = vsel %vm2101_vm0, %v3168_v39, 256  ;;  %vm2102_vm11 = vcmp.eq.f32.partialorder %v5017_v57, %v5256_v1  ;;  %vm2103_vm12 = vcmp.eq.f32.partialorder %v5022_v27, %v5256_v1 }
 0x7bb   : > { %v2134_v3 = vsel %vm2102_vm11, %v3165_v37, 256  ;;  %v2135_v0 = vsel %vm2103_vm12, %v3168_v39, 256  ;;  %v5266_v48 = vcvt.s32.f32 %v2233_v41  ;;  %vm2262_vm15 = vcmp.lt.s32.totalorder %v2132_v45, %v2133_v47 }
 0x7bc   : > { %v5268_v56 = vsel %vm2262_vm15, %v2132_v45, %v2133_v47  ;;  %vm2278_vm1 = vcmp.lt.s32.totalorder %v2134_v3, %v2135_v0 }
 0x7bd   : > { %2236 = vmin.xlane.f32.xlu1 %v5266_v48  ;;  %v2265_v13 = vshra.s32 %v5268_v56, 16  ;;  %v5272_v35 = vsel %vm2278_vm1, %v2134_v3, %v2135_v0  ;;  %v5275_v14 = vpop.xlane.xlu1 %2066 }
 0x7be   : > { %v2281_v57 = vshra.s32 %v5272_v35, 16  ;;  %6174 = vst [vmem:[#allocation54_spill] sm:$0xff] %v5275_v14  ;;  %vm2104_vm2 = vcmp.eq.f32.partialorder %v5047_v4, %v5275_v14  ;;  %vm2105_vm3 = vcmp.eq.f32.partialorder %v5051_v29, %v5275_v14 }
 0x7bf   : > { %v5277_v27 = vcvt.s32.f32 %v2265_v13  ;;  %v5279_v1 = vpop.xlane.xlu0 %2069  ;;  %v2136_v47 = vsel %vm2104_vm2, %v3165_v37, 256  ;;  %v2137_v41 = vsel %vm2105_vm3, %v3168_v39, 256 }
 0x7c0   : > { %6175 = vst [vmem:[#allocation37_spill] sm:$0xff] %v5279_v1  ;;  %vm2106_vm4 = vcmp.eq.f32.partialorder %v5054_v34, %v5279_v1  ;;  %vm2107_vm5 = vcmp.eq.f32.partialorder %v5057_v59, %v5279_v1  ;;  %v5294_v4 = vcvt.s32.f32 %v2281_v57  ;;  %vm2294_vm6 = vcmp.lt.s32.totalorder %v2136_v47, %v2137_v41 }
 0x7c1   : > { %2268 = vmin.xlane.f32.xlu1 %v5277_v27  ;;  %v2138_v13 = vsel %vm2106_vm4, %v3165_v37, 256  ;;  %v2139_v45 = vsel %vm2107_vm5, %v3168_v39, 256  ;;  %v5296_v29 = vpop.xlane.xlu1 %2072  ;;  %v5298_v34 = vsel %vm2294_vm6, %v2136_v47, %v2137_v41 }
 0x7c2   : > { %vm2310_vm7 = vcmp.lt.s32.totalorder %v2138_v13, %v2139_v45  ;;  %6176 = vst [vmem:[#allocation26_spill] sm:$0xff] %v5296_v29  ;;  %2284 = vmin.xlane.f32.xlu0 %v5294_v4  ;;  %vm2108_vm8 = vcmp.eq.f32.partialorder %v5074_v49, %v5296_v29  ;;  %vm2109_vm9 = vcmp.eq.f32.partialorder %v5077_v15, %v5296_v29  ;;  %v2297_v59 = vshra.s32 %v5298_v34, 16 }
 0x7c3   : > { %v5300_v3 = vsel %vm2310_vm7, %v2138_v13, %v2139_v45  ;;  %v2140_v57 = vsel %vm2108_vm8, %v3165_v37, 256  ;;  %v2141_v1 = vsel %vm2109_vm9, %v3168_v39, 256 }
 0x7c4   : > { %v2313_v0 = vshra.s32 %v5300_v3, 16  ;;  %v5311_v47 = vcvt.s32.f32 %v2297_v59  ;;  %vm2326_vm10 = vcmp.lt.s32.totalorder %v2140_v57, %v2141_v1 }
 0x7c5   : > { %v5321_v49 = vsel %vm2326_vm10, %v2140_v57, %v2141_v1 }
 0x7c6   : > { %v5315_v13 = vcvt.s32.f32 %v2313_v0  ;;  %2300 = vmin.xlane.f32.xlu1 %v5311_v47  ;;  %v2329_v0 = vshra.s32 %v5321_v49, 16 }
 0x7c7   : > { %v5313_v41 = vpop.xlane.xlu0 %2075 }
 0x7c8   : > { %6177 = vst [vmem:[#allocation41_spill] sm:$0xff] %v5313_v41  ;;  %vm2110_vm13 = vcmp.eq.f32.partialorder %v5093_v33, %v5313_v41  ;;  %vm2111_vm14 = vcmp.eq.f32.partialorder %v5096_v61, %v5313_v41  ;;  %2316 = vmin.xlane.f32.xlu0 %v5315_v13  ;;  %v5336_v1 = vcvt.s32.f32 %v2329_v0 }
 0x7c9   : > { %v2142_v15 = vsel %vm2110_vm13, %v3165_v37, 256  ;;  %v2143_v45 = vsel %vm2111_vm14, %v3168_v39, 256  ;;  %v5327_v59 = vpop.xlane.xlu1 %2078 }
 0x7ca   : > { %6178 = vst [vmem:[#allocation38_spill] sm:$0xff] %v5327_v59  ;;  %vm2112_vm0 = vcmp.eq.f32.partialorder %v5112_v5, %v5327_v59  ;;  %vm2113_vm11 = vcmp.eq.f32.partialorder %v5115_v19, %v5327_v59  ;;  %vm2342_vm12 = vcmp.lt.s32.totalorder %v2142_v15, %v2143_v45  ;;  %2332 = vmin.xlane.f32.xlu1 %v5336_v1 }
 0x7cb   : > { %v2144_v33 = vsel %vm2112_vm0, %v3165_v37, 256  ;;  %v2145_v61 = vsel %vm2113_vm11, %v3168_v39, 256  ;;  %v5338_v57 = vsel %vm2342_vm12, %v2142_v15, %v2143_v45 }
 0x7cc   : > { %v2345_v41 = vshra.s32 %v5338_v57, 16  ;;  %vm2358_vm15 = vcmp.lt.s32.totalorder %v2144_v33, %v2145_v61 }
 0x7cd   : > { %v5342_v29 = vsel %vm2358_vm15, %v2144_v33, %v2145_v61 }
 0x7ce   : > { %v5344_v5 = vcvt.s32.f32 %v2345_v41  ;;  %v2361_v19 = vshra.s32 %v5342_v29, 16 }
 0x7cf   : > { %v5347_v59 = vpop.xlane.xlu0 %2081 }
 0x7d0   : > { %6179 = vst [vmem:[#allocation51_spill] sm:$0xff] %v5347_v59  ;;  %vm2114_vm1 = vcmp.eq.f32.partialorder %v5130_v46, %v5347_v59  ;;  %vm2115_vm2 = vcmp.eq.f32.partialorder %v5133_v8, %v5347_v59  ;;  %2348 = vmin.xlane.f32.xlu0 %v5344_v5  ;;  %v5354_v15 = vcvt.s32.f32 %v2361_v19 }
 0x7d1   : > { %v2146_v45 = vsel %vm2114_vm1, %v3165_v37, 256  ;;  %v2147_v0 = vsel %vm2115_vm2, %v3168_v39, 256  ;;  %v5358_v41 = vpop.xlane.xlu1 %2084 }
 0x7d2   : > { %6180 = vst [vmem:[#allocation55_spill] sm:$0xff] %v5358_v41  ;;  %vm2116_vm3 = vcmp.eq.f32.partialorder %v5148_v23, %v5358_v41  ;;  %vm2117_vm4 = vcmp.eq.f32.partialorder %v5151_v31, %v5358_v41  ;;  %2364 = vmin.xlane.f32.xlu1 %v5354_v15  ;;  %vm2374_vm5 = vcmp.lt.s32.totalorder %v2146_v45, %v2147_v0  ;;  %v2152_v41 = vand.u32 65535, %v5165_v7 }
 0x7d3   : > { %v2148_v46 = vsel %vm2116_vm3, %v3165_v37, 256  ;;  %v2149_v8 = vsel %vm2117_vm4, %v3168_v39, 256  ;;  %v5367_v33 = vsel %vm2374_vm5, %v2146_v45, %v2147_v0  ;;  %v2168_v0 = vand.u32 65535, %v5178_v24 }
 0x7d4   : > { %v2377_v61 = vshra.s32 %v5367_v33, 16  ;;  %vm2390_vm6 = vcmp.lt.s32.totalorder %v2148_v46, %v2149_v8  ;;  %v2154_v45 = vcvt.s32.f32 %v2152_v41  ;;  %v2216_v24 = vand.u32 65535, %v5215_v63 }
 0x7d5   : > { %v5370_v19 = vsel %vm2390_vm6, %v2148_v46, %v2149_v8 }
 0x7d6   : > { %v5372_v59 = vcvt.s32.f32 %v2377_v61  ;;  %v2393_v23 = vshra.s32 %v5370_v19, 16  ;;  %v2170_v61 = vcvt.s32.f32 %v2168_v0 }
 0x7d8   : > { %2380 = vmin.xlane.f32.xlu0 %v5372_v59  ;;  %v5376_v31 = vcvt.s32.f32 %v2393_v23  ;;  %v2184_v23 = vand.u32 65535, %v5190_v10  ;;  %v2218_v10 = vcvt.s32.f32 %v2216_v24  ;;  %v2264_v24 = vand.u32 65535, %v5268_v56 }
 0x7d9   : > { %v2296_v56 = vand.u32 65535, %v5298_v34 }
 0x7da   : > { %2396 = vmin.xlane.f32.xlu1 %v5376_v31  ;;  %v2186_v41 = vcvt.s32.f32 %v2184_v23 }
 0x834   : > { %v5380_v14 = vpop.xlane.xlu0 %2156 }
 0x835   : > { %vm2158_vm7 = vcmp.eq.f32.partialorder %v5174_v16, %v5380_v14 }
 0x836   : > { %v2159_v46 = vsel %vm2158_vm7, %v2154_v45, inf  ;;  %v2200_v45 = vand.u32 65535, %v5224_v55 }
 0x837   : > { %2160 = vmin.xlane.f32.xlu0 %v2159_v46  ;;  %v2248_v46 = vand.u32 65535, %v5231_v40  ;;  %v2232_v40 = vand.u32 65535, %v5246_v43 }
 0x838   : > { %v5385_v8 = vpop.xlane.xlu1 %2172 }
 0x839   : > { %vm2174_vm8 = vcmp.eq.f32.partialorder %v5188_v11, %v5385_v8  ;;  %v2250_v55 = vcvt.s32.f32 %v2248_v46 }
 0x83a   : > { %v2175_v17 = vsel %vm2174_vm8, %v2170_v61, inf  ;;  %v2202_v61 = vcvt.s32.f32 %v2200_v45 }
 0x83b   : > { %2176 = vmin.xlane.f32.xlu1 %v2175_v17 }
 0x83c   : > { %v5390_v7 = vpop.xlane.xlu0 %2188 }
 0x83d   : > { %vm2190_vm9 = vcmp.eq.f32.partialorder %v5204_v52, %v5390_v7 }
 0x83e   : > { %v2191_v16 = vsel %vm2190_vm9, %v2186_v41, inf  ;;  %v2234_v41 = vcvt.s32.f32 %v2232_v40 }
 0x83f   : > { %2192 = vmin.xlane.f32.xlu0 %v2191_v16  ;;  %v2280_v16 = vand.u32 65535, %v5272_v35 }
 0x841   : > { %v5396_v0 = vpop.xlane.xlu0 %2220  ;;  %v2282_v46 = vcvt.s32.f32 %v2280_v16 }
 0x842   : > { %vm2222_vm10 = vcmp.eq.f32.partialorder %v5226_v12, %v5396_v0 }
 0x843   : > { %v5401_v17 = vpop.xlane.xlu1 %2204  ;;  %v2223_v11 = vsel %vm2222_vm10, %v2218_v10, inf  ;;  %v2266_v10 = vcvt.s32.f32 %v2264_v24 }
 0x844   : > { %vm2206_vm13 = vcmp.eq.f32.partialorder %v5238_v54, %v5401_v17  ;;  %2224 = vmin.xlane.f32.xlu0 %v2223_v11 }
 0x845   : > { %v2207_v63 = vsel %vm2206_vm13, %v2202_v61, inf  ;;  %v5405_v52 = vpop.xlane.xlu0 %2252  ;;  %v2298_v61 = vcvt.s32.f32 %v2296_v56 }
 0x846   : > { %2208 = vmin.xlane.f32.xlu1 %v2207_v63  ;;  %vm2254_vm14 = vcmp.eq.f32.partialorder %v5244_v38, %v5405_v52 }
 0x847   : > { %v2255_v23 = vsel %vm2254_vm14, %v2250_v55, inf  ;;  %v2328_v55 = vand.u32 65535, %v5321_v49  ;;  %v2360_v49 = vand.u32 65535, %v5342_v29  ;;  %v2392_v29 = vand.u32 65535, %v5370_v19 }
 0x848   : > { %2256 = vmin.xlane.f32.xlu0 %v2255_v23  ;;  %v2179_v19 = vcvt.f32.s32 %v5385_v8 }
 0x849   : > { %v2330_v23 = vcvt.s32.f32 %v2328_v55  ;;  %v2394_v56 = vcvt.s32.f32 %v2392_v29 }
 0x84a   : > { %v5410_v12 = vpop.xlane.xlu1 %2236  ;;  %v2180_v55 = vshll.u32 %v2179_v19, 16 }
 0x84b   : > { %vm2238_vm0 = vcmp.eq.f32.partialorder %v5266_v48, %v5410_v12  ;;  %v2312_v48 = vand.u32 65535, %v5300_v3 }
 0x84c   : > { %v2239_v54 = vsel %vm2238_vm0, %v2234_v41, inf }
 0x84d   : > { %2240 = vmin.xlane.f32.xlu1 %v2239_v54 }
 0x84e   : > { %v5416_v45 = vpop.xlane.xlu1 %2268 }
 0x84f   : > { %vm2270_vm11 = vcmp.eq.f32.partialorder %v5277_v27, %v5416_v45  ;;  %v5420_v43 = vpop.xlane.xlu0 %2284  ;;  %v2314_v27 = vcvt.s32.f32 %v2312_v48 }
 0x850   : > { %v2271_v38 = vsel %vm2270_vm11, %v2266_v10, inf  ;;  %vm2286_vm12 = vcmp.eq.f32.partialorder %v5294_v4, %v5420_v43  ;;  %v2344_v4 = vand.u32 65535, %v5338_v57  ;;  %v2362_v57 = vcvt.s32.f32 %v2360_v49 }
 0x851   : > { %2272 = vmin.xlane.f32.xlu1 %v2271_v38  ;;  %v2287_v35 = vsel %vm2286_vm12, %v2282_v46, inf  ;;  %v2227_v49 = vcvt.f32.s32 %v5396_v0 }
 0x852   : > { %2288 = vmin.xlane.f32.xlu0 %v2287_v35 }
 0x853   : > { %v5426_v11 = vpop.xlane.xlu1 %2300 }
 0x854   : > { %vm2302_vm15 = vcmp.eq.f32.partialorder %v5311_v47, %v5426_v11 }
 0x855   : > { %v5428_v63 = vpop.xlane.xlu0 %2316  ;;  %v2303_v34 = vsel %vm2302_vm15, %v2298_v61, inf }
 0x856   : > { %vm2318_vm1 = vcmp.eq.f32.partialorder %v5315_v13, %v5428_v63  ;;  %2304 = vmin.xlane.f32.xlu1 %v2303_v34  ;;  %v2346_v13 = vcvt.s32.f32 %v2344_v4  ;;  %v2195_v34 = vcvt.f32.s32 %v5390_v7 }
 0x857   : > { %v2319_v3 = vsel %vm2318_vm1, %v2314_v27, inf  ;;  %v5437_v40 = vpop.xlane.xlu1 %2332 }
 0x858   : > { %2320 = vmin.xlane.f32.xlu0 %v2319_v3  ;;  %vm2334_vm2 = vcmp.eq.f32.partialorder %v5336_v1, %v5437_v40  ;;  %v2376_v1 = vand.u32 65535, %v5367_v33  ;;  %v2163_v33 = vcvt.f32.s32 %v5380_v14 }
 0x859   : > { %v2335_v41 = vsel %vm2334_vm2, %v2330_v23, inf  ;;  %v2196_v23 = vshll.u32 %v2195_v34, 16 }
 0x85a   : > { %2336 = vmin.xlane.f32.xlu1 %v2335_v41  ;;  %v2378_v38 = vcvt.s32.f32 %v2376_v1  ;;  %v2164_v35 = vshll.u32 %v2163_v33, 16 }
 0x85d   : > { %v5442_v47 = vpop.xlane.xlu0 %2348 }
 0x85e   : > { %vm2350_vm3 = vcmp.eq.f32.partialorder %v5344_v5, %v5442_v47 }
 0x85f   : > { %v5446_v24 = vpop.xlane.xlu1 %2364  ;;  %v2351_v54 = vsel %vm2350_vm3, %v2346_v13, inf  ;;  %v2259_v13 = vcvt.f32.s32 %v5405_v52 }
 0x860   : > { %vm2366_vm4 = vcmp.eq.f32.partialorder %v5354_v15, %v5446_v24  ;;  %2352 = vmin.xlane.f32.xlu0 %v2351_v54  ;;  %v2228_v54 = vshll.u32 %v2227_v49, 16  ;;  %v6183_v49 = vld [vmem:[#allocation17_spill] sm:$0xff] }
 0x861   : > { %v2367_v16 = vsel %vm2366_vm4, %v2362_v57, inf  ;;  %v2260_v29 = vshll.u32 %v2259_v13, 16 }
 0x862   : > { %2368 = vmin.xlane.f32.xlu1 %v2367_v16 }
 0x865   : > { %v5452_v10 = vpop.xlane.xlu0 %2380 }
 0x866   : > { %vm2382_vm5 = vcmp.eq.f32.partialorder %v5372_v59, %v5452_v10 }
 0x867   : > { %v5456_v5 = vpop.xlane.xlu1 %2396  ;;  %v2383_v46 = vsel %vm2382_vm5, %v2378_v38, inf  ;;  %v2243_v38 = vcvt.f32.s32 %v5410_v12 }
 0x868   : > { %vm2398_vm6 = vcmp.eq.f32.partialorder %v5376_v31, %v5456_v5  ;;  %2384 = vmin.xlane.f32.xlu0 %v2383_v46 }
 0x869   : > { %v2399_v15 = vsel %vm2398_vm6, %v2394_v56, inf  ;;  %v2244_v19 = vshll.u32 %v2243_v38, 16 }
 0x86a   : > { %2400 = vmin.xlane.f32.xlu1 %v2399_v15 }
 0x8c4   : > { %v2161_v48 = vpop.xlane.xlu0 %2160 }
 0x8c5   : > { %v2162_v61 = vcvt.f32.s32 %v2161_v48 }
 0x8c7   : > { %v2165_v27 = vadd.s32 %v2164_v35, %v2162_v61  ;;  %v2275_v61 = vcvt.f32.s32 %v5416_v45 }
 0x8c8   : > { %v2177_v59 = vpop.xlane.xlu1 %2176 }
 0x8c9   : > { %vm2406_vm7 = vcmp.eq.s32.totalorder %v3165_v37, %v2165_v27  ;;  %vm2407_vm8 = vcmp.eq.s32.totalorder %v3168_v39, %v2165_v27  ;;  %v2178_v31 = vcvt.f32.s32 %v2177_v59  ;;  %v2276_v34 = vshll.u32 %v2275_v61, 16 }
 0x8ca   : > { %v2438_v3 = vsel %vm2406_vm7, %v5155_v53, %v4858_v6  ;;  %v2439_v14 = vsel %vm2407_vm8, %v5155_v53, %v4862_v36  ;;  %v2211_v53 = vcvt.f32.s32 %v5401_v17 }
 0x8cb   : > { %2793 = vtanh.f32 %v2438_v3  ;;  %v2181_v8 = vadd.s32 %v2180_v55, %v2178_v31  ;;  %v2291_v55 = vcvt.f32.s32 %v5420_v43  ;;  %v2307_v31 = vcvt.f32.s32 %v5426_v11 }
 0x8cc   : > { %2795 = vtanh.f32 %v2439_v14  ;;  %v2193_v4 = vpop.xlane.xlu0 %2192  ;;  %v2212_v57 = vshll.u32 %v2211_v53, 16 }
 0x8cd   : > { %vm2408_vm9 = vcmp.eq.s32.totalorder %v3165_v37, %v2181_v8  ;;  %vm2409_vm10 = vcmp.eq.s32.totalorder %v3168_v39, %v2181_v8  ;;  %v2194_v7 = vcvt.f32.s32 %v2193_v4  ;;  %v2292_v8 = vshll.u32 %v2291_v55, 16 }
 0x8ce   : > { %v2440_v41 = vsel %vm2408_vm9, %v5163_v32, %v4877_v28  ;;  %v2441_v6 = vsel %vm2409_vm10, %v5163_v32, %v4881_v2  ;;  %v2308_v53 = vshll.u32 %v2307_v31, 16 }
 0x8cf   : > { %2797 = vtanh.f32 %v2440_v41  ;;  %v2197_v36 = vadd.s32 %v2196_v23, %v2194_v7  ;;  %v2323_v7 = vcvt.f32.s32 %v5428_v63  ;;  %v2339_v63 = vcvt.f32.s32 %v5437_v40  ;;  %v6186_v40 = vld [vmem:[#allocation20_spill] sm:$0xff] }
 0x8d0   : > { %2799 = vtanh.f32 %v2441_v6 }
 0x8d1   : > { %vm2410_vm13 = vcmp.eq.s32.totalorder %v3165_v37, %v2197_v36  ;;  %vm2411_vm14 = vcmp.eq.s32.totalorder %v3168_v39, %v2197_v36  ;;  %v2225_v0 = vpop.xlane.xlu0 %2224  ;;  %v2340_v38 = vshll.u32 %v2339_v63, 16 }
 0x8d2   : > { %v2442_v28 = vsel %vm2410_vm13, %v5176_v60, %v4898_v50  ;;  %v2443_v2 = vsel %vm2411_vm14, %v5176_v60, %v4902_v44  ;;  %v2226_v32 = vcvt.f32.s32 %v2225_v0 }
 0x8d3   : > { %2801 = vtanh.f32 %v2442_v28  ;;  %v2209_v17 = vpop.xlane.xlu1 %2208 }
 0x8d4   : > { %2803 = vtanh.f32 %v2443_v2  ;;  %v2229_v16 = vadd.s32 %v2228_v54, %v2226_v32  ;;  %v2210_v1 = vcvt.f32.s32 %v2209_v17  ;;  %v2324_v32 = vshll.u32 %v2323_v7, 16  ;;  %v6184_v17 = vld [vmem:[#allocation18_spill] sm:$0xff]  ;;  %v6197_v7 = vld [vmem:[#allocation41_spill] sm:$0xff] }
 0x8d5   : > { %v2794_v52 = vpop.eup %2793  ;;  %v2257_v46 = vpop.xlane.xlu0 %2256 }
 0x8d6   : > { %v2796_v56 = vpop.eup %2795  ;;  %2502 = vst [vmem:[%s5487_s7] sm:$0xff] %v2794_v52  ;;  %vm2414_vm0 = vcmp.eq.s32.totalorder %v3165_v37, %v2229_v16  ;;  %vm2415_vm11 = vcmp.eq.s32.totalorder %v3168_v39, %v2229_v16  ;;  %v2213_v50 = vadd.s32 %v2212_v57, %v2210_v1  ;;  %v2258_v44 = vcvt.f32.s32 %v2257_v46  ;;  %v6185_v57 = vld [vmem:[#allocation36_spill] sm:$0xff] }
 0x8d7   : > { %2503 = vst [vmem:[%s5487_s7 + $0x8] sm:$0xff] %v2796_v56  ;;  %v2446_v60 = vsel %vm2414_vm0, %v5192_v42, %v4916_v20  ;;  %v2447_v12 = vsel %vm2415_vm11, %v5192_v42, %v4920_v58  ;;  %v2355_v46 = vcvt.f32.s32 %v5442_v47 }
 0x8d8   : > { %2805 = vtanh.f32 %v2446_v60  ;;  %vm2412_vm12 = vcmp.eq.s32.totalorder %v3165_v37, %v2213_v50  ;;  %vm2413_vm15 = vcmp.eq.s32.totalorder %v3168_v39, %v2213_v50  ;;  %v2261_v15 = vadd.s32 %v2260_v29, %v2258_v44 }
 0x8d9   : > { %v2798_v33 = vpop.eup %2797  ;;  %2807 = vtanh.f32 %v2447_v12  ;;  %v2444_v48 = vsel %vm2412_vm12, %v5202_v26, %v4936_v51  ;;  %v2445_v35 = vsel %vm2413_vm15, %v5202_v26, %v4940_v30  ;;  %v2371_v44 = vcvt.f32.s32 %v5446_v24  ;;  %v6190_v24 = vld [vmem:[#allocation21_spill] sm:$0xff] }
 0x8da   : > { %v2800_v20 = vpop.eup %2799  ;;  %2504 = vst [vmem:[%s5487_s7 + $0x10] sm:$0xff] %v2798_v33  ;;  %2809 = vtanh.f32 %v2444_v48  ;;  %vm2418_vm1 = vcmp.eq.s32.totalorder %v3165_v37, %v2261_v15  ;;  %vm2419_vm2 = vcmp.eq.s32.totalorder %v3168_v39, %v2261_v15  ;;  %v2241_v58 = vpop.xlane.xlu1 %2240  ;;  %v6187_v15 = vld [vmem:[#allocation19_spill] sm:$0xff]  ;;  %v6188_v33 = vld [vmem:[#allocation54_spill] sm:$0xff]  ;;  %v6189_v48 = vld [vmem:[#allocation12_spill] sm:$0xff] }
 0x8db   : > { %2505 = vst [vmem:[%s5487_s7 + $0x18] sm:$0xff] %v2800_v20  ;;  %2811 = vtanh.f32 %v2445_v35  ;;  %v2450_v51 = vsel %vm2418_vm1, %v5212_v22, %v4954_v25  ;;  %v2451_v30 = vsel %vm2419_vm2, %v5212_v22, %v4958_v9  ;;  %v2242_v42 = vcvt.f32.s32 %v2241_v58  ;;  %v6191_v20 = vld [vmem:[#allocation37_spill] sm:$0xff]  ;;  %v6192_v58 = vld [vmem:[#allocation22_spill] sm:$0xff] }
 0x8dc   : > { %2813 = vtanh.f32 %v2450_v51 }
 0x8dd   : > { %v2802_v26 = vpop.eup %2801  ;;  %2815 = vtanh.f32 %v2451_v30  ;;  %v2245_v45 = vadd.s32 %v2244_v19, %v2242_v42 }
 0x8de   : > { %v2804_v27 = vpop.eup %2803  ;;  %2506 = vst [vmem:[%s5487_s7 + $0x20] sm:$0xff] %v2802_v26  ;;  %v2273_v59 = vpop.xlane.xlu1 %2272  ;;  %v2356_v26 = vshll.u32 %v2355_v46, 16 }
 0x8df   : > { %2507 = vst [vmem:[%s5487_s7 + $0x28] sm:$0xff] %v2804_v27  ;;  %vm2416_vm3 = vcmp.eq.s32.totalorder %v3165_v37, %v2245_v45  ;;  %vm2417_vm4 = vcmp.eq.s32.totalorder %v3168_v39, %v2245_v45  ;;  %v2274_v25 = vcvt.f32.s32 %v2273_v59  ;;  %v2289_v3 = vpop.xlane.xlu0 %2288  ;;  %v6193_v59 = vld [vmem:[#allocation23_spill] sm:$0xff] }
 0x8e0   : > { %v2448_v9 = vsel %vm2416_vm3, %v5229_v18, %v4973_v62  ;;  %v2449_v22 = vsel %vm2417_vm4, %v5229_v18, %v4977_v21  ;;  %v2290_v4 = vcvt.f32.s32 %v2289_v3  ;;  %v6181_v21 = vld [vmem:[#allocation11_spill] sm:$0xff]  ;;  %v6182_v18 = vld [vmem:[#allocation32_spill] sm:$0xff]  ;;  %v2372_v3 = vshll.u32 %v2371_v44, 16 }
 0x8e1   : > { %2817 = vtanh.f32 %v2448_v9  ;;  %v2277_v43 = vadd.s32 %v2276_v34, %v2274_v25  ;;  %v6194_v34 = vld [vmem:[#allocation26_spill] sm:$0xff]  ;;  %v6195_v9 = vld [vmem:[#allocation24_spill] sm:$0xff] }
 0x8e2   : > { %v2806_v14 = vpop.eup %2805  ;;  %2819 = vtanh.f32 %v2449_v22  ;;  %v2293_v6 = vadd.s32 %v2292_v8, %v2290_v4  ;;  %v2387_v8 = vcvt.f32.s32 %v5452_v10 }
 0x8e3   : > { %v2808_v23 = vpop.eup %2807  ;;  %2510 = vst [vmem:[%s5487_s7 + $0x40] sm:$0xff] %v2806_v14  ;;  %vm2420_vm5 = vcmp.eq.s32.totalorder %v3165_v37, %v2277_v43  ;;  %vm2421_vm6 = vcmp.eq.s32.totalorder %v3168_v39, %v2277_v43  ;;  %v2305_v13 = vpop.xlane.xlu1 %2304 }
 0x8e4   : > { %v2810_v62 = vpop.eup %2809  ;;  %2511 = vst [vmem:[%s5487_s7 + $0x48] sm:$0xff] %v2808_v23  ;;  %v2452_v11 = vsel %vm2420_vm5, %v6182_v18, %v6181_v21  ;;  %v2453_v41 = vsel %vm2421_vm6, %v6182_v18, %v6183_v49  ;;  %vm2422_vm7 = vcmp.eq.s32.totalorder %v3165_v37, %v2293_v6  ;;  %vm2423_vm8 = vcmp.eq.s32.totalorder %v3168_v39, %v2293_v6  ;;  %v6196_v23 = vld [vmem:[#allocation31_spill] sm:$0xff]  ;;  %v6198_v21 = vld [vmem:[#allocation25_spill] sm:$0xff] }
 0x8e5   : > { %v2812_v36 = vpop.eup %2811  ;;  %2508 = vst [vmem:[%s5487_s7 + $0x30] sm:$0xff] %v2810_v62  ;;  %2821 = vtanh.f32 %v2452_v11  ;;  %v2321_v0 = vpop.xlane.xlu0 %2320  ;;  %v2306_v28 = vcvt.f32.s32 %v2305_v13  ;;  %v2454_v16 = vsel %vm2422_vm7, %v6185_v57, %v6184_v17  ;;  %v2455_v1 = vsel %vm2423_vm8, %v6185_v57, %v6186_v40  ;;  %v6201_v13 = vld [vmem:[#allocation33_spill] sm:$0xff] }
 0x8e6   : > { %v2814_v54 = vpop.eup %2813  ;;  %2509 = vst [vmem:[%s5487_s7 + $0x38] sm:$0xff] %v2812_v36  ;;  %2823 = vtanh.f32 %v2453_v41  ;;  %v2322_v52 = vcvt.f32.s32 %v2321_v0  ;;  %v2403_v41 = vcvt.f32.s32 %v5456_v5  ;;  %v2388_v6 = vshll.u32 %v2387_v8, 16  ;;  %v6199_v36 = vld [vmem:[#allocation52_spill] sm:$0xff] }
 0x8e7   : > { %v2816_v2 = vpop.eup %2815  ;;  %2514 = vst [vmem:[%s5487_s7 + $0x60] sm:$0xff] %v2814_v54  ;;  %2825 = vtanh.f32 %v2454_v16  ;;  %v2309_v29 = vadd.s32 %v2308_v53, %v2306_v28  ;;  %v2337_v50 = vpop.xlane.xlu1 %2336  ;;  %v6200_v53 = vld [vmem:[#allocation38_spill] sm:$0xff] }
 0x8e8   : > { %2515 = vst [vmem:[%s5487_s7 + $0x68] sm:$0xff] %v2816_v2  ;;  %2827 = vtanh.f32 %v2455_v1  ;;  %v2325_v56 = vadd.s32 %v2324_v32, %v2322_v52  ;;  %v2338_v60 = vcvt.f32.s32 %v2337_v50  ;;  %v2404_v32 = vshll.u32 %v2403_v41, 16 }
 0x8e9   : > { %vm2424_vm9 = vcmp.eq.s32.totalorder %v3165_v37, %v2309_v29  ;;  %vm2425_vm10 = vcmp.eq.s32.totalorder %v3168_v39, %v2309_v29  ;;  %v6202_v29 = vld [vmem:[#allocation34_spill] sm:$0xff] }
 0x8ea   : > { %v2456_v19 = vsel %vm2424_vm9, %v6188_v33, %v6187_v15  ;;  %v2457_v35 = vsel %vm2425_vm10, %v6188_v33, %v6189_v48  ;;  %vm2426_vm13 = vcmp.eq.s32.totalorder %v3165_v37, %v2325_v56  ;;  %vm2427_vm14 = vcmp.eq.s32.totalorder %v3168_v39, %v2325_v56  ;;  %v6204_v56 = vld [vmem:[#allocation50_spill] sm:$0xff]  ;;  %v6207_v33 = vld [vmem:[#allocation35_spill] sm:$0xff] }
 0x8eb   : > { %v2818_v12 = vpop.eup %2817  ;;  %2829 = vtanh.f32 %v2456_v19  ;;  %v2458_v61 = vsel %vm2426_vm13, %v6191_v20, %v6190_v24  ;;  %v2459_v51 = vsel %vm2427_vm14, %v6191_v20, %v6192_v58  ;;  %v2341_v30 = vadd.s32 %v2340_v38, %v2338_v60  ;;  %v6203_v38 = vld [vmem:[#allocation51_spill] sm:$0xff]  ;;  %v6205_v60 = vld [vmem:[#allocation53_spill] sm:$0xff] }
 0x8ec   : > { %v2820_v47 = vpop.eup %2819  ;;  %2512 = vst [vmem:[%s5487_s7 + $0x50] sm:$0xff] %v2818_v12  ;;  %2831 = vtanh.f32 %v2457_v35  ;;  %v6206_v12 = vld [vmem:[#allocation55_spill] sm:$0xff] }
 0x8ed   : > { %v2353_v42 = vpop.xlane.xlu0 %2352  ;;  %2513 = vst [vmem:[%s5487_s7 + $0x58] sm:$0xff] %v2820_v47  ;;  %2833 = vtanh.f32 %v2458_v61  ;;  %vm2428_vm0 = vcmp.eq.s32.totalorder %v3165_v37, %v2341_v30  ;;  %vm2429_vm11 = vcmp.eq.s32.totalorder %v3168_v39, %v2341_v30 }
 0x8ee   : > { %v2354_v45 = vcvt.f32.s32 %v2353_v42  ;;  %2835 = vtanh.f32 %v2459_v51  ;;  %v2460_v25 = vsel %vm2428_vm0, %v6194_v34, %v6193_v59  ;;  %v2461_v22 = vsel %vm2429_vm11, %v6194_v34, %v6195_v9 }
 0x8ef   : > { %v2369_v27 = vpop.xlane.xlu1 %2368  ;;  %v2822_v55 = vpop.eup %2821  ;;  %2837 = vtanh.f32 %v2460_v25 }
 0x8f0   : > { %v2357_v31 = vadd.s32 %v2356_v26, %v2354_v45  ;;  %v2824_v43 = vpop.eup %2823  ;;  %2516 = vst [vmem:[%s5487_s7 + $0x70] sm:$0xff] %v2822_v55  ;;  %v2370_v14 = vcvt.f32.s32 %v2369_v27  ;;  %2839 = vtanh.f32 %v2461_v22 }
 0x8f1   : > { %2517 = vst [vmem:[%s5487_s7 + $0x78] sm:$0xff] %v2824_v43  ;;  %v2826_v4 = vpop.eup %2825 }
 0x8f2   : > { %vm2430_vm12 = vcmp.eq.s32.totalorder %v3165_v37, %v2357_v31  ;;  %vm2431_vm15 = vcmp.eq.s32.totalorder %v3168_v39, %v2357_v31  ;;  %v2373_v11 = vadd.s32 %v2372_v3, %v2370_v14  ;;  %v2828_v49 = vpop.eup %2827  ;;  %2518 = vst [vmem:[%s5487_s7 + $0x80] sm:$0xff] %v2826_v4 }
 0x8f3   : > { %v2462_v62 = vsel %vm2430_vm12, %v6197_v7, %v6196_v23  ;;  %v2463_v18 = vsel %vm2431_vm15, %v6197_v7, %v6198_v21  ;;  %2519 = vst [vmem:[%s5487_s7 + $0x88] sm:$0xff] %v2828_v49 }
 0x8f4   : > { %2841 = vtanh.f32 %v2462_v62  ;;  %vm2432_vm1 = vcmp.eq.s32.totalorder %v3165_v37, %v2373_v11  ;;  %vm2433_vm2 = vcmp.eq.s32.totalorder %v3168_v39, %v2373_v11 }
 0x8f5   : > { %2843 = vtanh.f32 %v2463_v18  ;;  %v2385_v10 = vpop.xlane.xlu0 %2384  ;;  %v2464_v63 = vsel %vm2432_vm1, %v6200_v53, %v6199_v36  ;;  %v2465_v0 = vsel %vm2433_vm2, %v6200_v53, %v6201_v13  ;;  %v2830_v54 = vpop.eup %2829 }
 0x8f6   : > { %v2386_v5 = vcvt.f32.s32 %v2385_v10  ;;  %2845 = vtanh.f32 %v2464_v63  ;;  %v2832_v2 = vpop.eup %2831  ;;  %2520 = vst [vmem:[%s5487_s7 + $0x90] sm:$0xff] %v2830_v54 }
 0x8f7   : > { %v2401_v28 = vpop.xlane.xlu1 %2400  ;;  %2847 = vtanh.f32 %v2465_v0  ;;  %v2834_v16 = vpop.eup %2833  ;;  %2521 = vst [vmem:[%s5487_s7 + $0x98] sm:$0xff] %v2832_v2 }
 0x8f8   : > { %v2389_v17 = vadd.s32 %v2388_v6, %v2386_v5  ;;  %v2402_v57 = vcvt.f32.s32 %v2401_v28  ;;  %v2836_v40 = vpop.eup %2835  ;;  %2522 = vst [vmem:[%s5487_s7 + $0xa0] sm:$0xff] %v2834_v16 }
 0x8f9   : > { %v2838_v52 = vpop.eup %2837  ;;  %2523 = vst [vmem:[%s5487_s7 + $0xa8] sm:$0xff] %v2836_v40 }
 0x8fa   : > { %vm2434_vm3 = vcmp.eq.s32.totalorder %v3165_v37, %v2389_v17  ;;  %vm2435_vm4 = vcmp.eq.s32.totalorder %v3168_v39, %v2389_v17  ;;  %v2405_v1 = vadd.s32 %v2404_v32, %v2402_v57  ;;  %v2840_v44 = vpop.eup %2839  ;;  %2524 = vst [vmem:[%s5487_s7 + $0xb0] sm:$0xff] %v2838_v52 }
 0x8fb   : > { %v2466_v46 = vsel %vm2434_vm3, %v6203_v38, %v6202_v29  ;;  %v2467_v50 = vsel %vm2435_vm4, %v6203_v38, %v6204_v56  ;;  %2525 = vst [vmem:[%s5487_s7 + $0xb8] sm:$0xff] %v2840_v44 }
 0x8fc   : > { %2849 = vtanh.f32 %v2466_v46  ;;  %vm2436_vm5 = vcmp.eq.s32.totalorder %v3165_v37, %v2405_v1  ;;  %vm2437_vm6 = vcmp.eq.s32.totalorder %v3168_v39, %v2405_v1 }
 0x8fd   : > { %2851 = vtanh.f32 %v2467_v50  ;;  %v2468_v15 = vsel %vm2436_vm5, %v6206_v12, %v6205_v60  ;;  %v2469_v19 = vsel %vm2437_vm6, %v6206_v12, %v6207_v33 }
 0x8fe   : > { %v2842_v48 = vpop.eup %2841  ;;  %2853 = vtanh.f32 %v2468_v15 }
 0x8ff   : > { %v2844_v35 = vpop.eup %2843  ;;  %2526 = vst [vmem:[%s5487_s7 + $0xc0] sm:$0xff] %v2842_v48  ;;  %2855 = vtanh.f32 %v2469_v19 }
 0x900   : > { %2527 = vst [vmem:[%s5487_s7 + $0xc8] sm:$0xff] %v2844_v35  ;;  %v2846_v37 = vpop.eup %2845 }
 0x901   : > { %v2848_v39 = vpop.eup %2847  ;;  %2528 = vst [vmem:[%s5487_s7 + $0xd0] sm:$0xff] %v2846_v37 }
 0x902   : > { %2529 = vst [vmem:[%s5487_s7 + $0xd8] sm:$0xff] %v2848_v39 }
 0x904   : > { %2541 = sbr.rel (!%p2988_p5) target bundleno = 2343 (0x927), region = 40 }
 0x906   : > { %v2850_v47 = vpop.eup %2849 }
 0x907   : > { %v2852_v24 = vpop.eup %2851  ;;  %2530 = vst [vmem:[%s5487_s7 + $0xe0] sm:$0xff] %v2850_v47 }
 0x908   : > { %v2854_v20 = vpop.eup %2853  ;;  %2531 = vst [vmem:[%s5487_s7 + $0xe8] sm:$0xff] %v2852_v24 }
 0x909   : > { %v2856_v61 = vpop.eup %2855  ;;  %2532 = vst [vmem:[%s5487_s7 + $0xf0] sm:$0xff] %v2854_v20 }
 0x90a   : > { %2533 = vst [vmem:[%s5487_s7 + $0xf8] sm:$0xff] %v2856_v61 }
 0x90b   : > { %s6213_s9 = smov (!%p2544_p11, %s2543_s9), 16 }
 0x90c   : > { %s5615_s10 = sshll.u32 %s6213_s9, 8 }
 0x90d   : > { %s2549_s11 = ssub.s32 4096, %s5615_s10 }
 0x90e   : > { %2550 = vsyncadd %s5610_s8, %s2549_s11  ;;  %p2660_p12 = scmp.ne.s32.totalorder %s5615_s10, 0  ;;  %s2669_s12 = sshll.u32 %s2971_s19, 12 }
 0x90f   : > { %s5624_s14 = scalar_lea.hbm %s5675_s4, %s2669_s12  ;;  %s2556_s29 = sshll.u32 %s5487_s7, 4  ;;  %s5627_s29 = int_to_ptr.vmem [resolvable:$true] %s2556_s29 }
 0x910   : > { %s2857_s20 = scalar_lea.vmem %s5627_s29, %s5615_s10  ;;  %s2922_s22 = smov [#allocation2]  }
 0x911   : > { %p2858_p13 = scmp.ne.s32.totalorder %s5627_s29, %s2857_s20  ;;  %s2861_s23 = sshll.u32 %s2922_s22, 4  ;;  %s2862_s23 = int_to_ptr.vmem [resolvable:$false] %s2861_s23 }
 0x912   : > { %s2863_s19 = scalar_lea.vmem %s2862_s23, 8192  ;;  %p2864_p2 = scmp.lt.s32.totalorder %s5627_s29, %s2862_s23 }
 0x913   : > { %p2859_p0 = pnand %p2858_p13, %p2660_p12  ;;  %p2865_p3 = scmp.lt.s32.totalorder %s2863_s19, %s2857_s20 }
 0x915   : > { %p2860_p1 = pneg %p2859_p0  ;;  %p2866_p4 = por %p2865_p3, %p2864_p2 }
 0x917   : > { %p2867_p5 = pnand %p2866_p4, %p2860_p1 }
 0x919   : > { %2870 = shalt.err (!%p2867_p5)
}
 0x91a   : > { %s2871_s27 = scalar_lea.hbm %s5624_s14, %s5615_s10  ;;  %s2875_s5 = scalar_lea.hbm %s5675_s4, 5120 }
 0x91b   : > { %p2872_p7 = scmp.ne.s32.totalorder %s5624_s14, %s2871_s27  ;;  %p2876_p10 = scmp.lt.u32.totalorder %s5624_s14, %s5675_s4 }
 0x91c   : > { %p2877_p11 = scmp.lt.u32.totalorder %s2875_s5, %s2871_s27  ;;  %p2879_p0 = scmp.lt.u32.totalorder %s2871_s27, %s5624_s14 }
 0x91d   : > { %p2873_p8 = pnand %p2872_p7, %p2660_p12 }
 0x91e   : > { %p2878_p13 = por %p2877_p11, %p2876_p10 }
 0x91f   : > { %p2874_p9 = pneg %p2873_p8 }
 0x920   : > { %p2880_p1 = por %p2879_p0, %p2878_p13 }
 0x922   : > { %p2881_p2 = pnand %p2880_p1, %p2874_p9 }
 0x924   : > { %2884 = shalt.err (!%p2881_p2)
}
 0x925   : > { %s2923_s9 = smov 256   ;;  %s2924_s11 = smov 16  }
 0x926   : > { %2562 = dma.vmem_to_hbm [thread:$0]  (%p2660_p12), %s5627_s29, %s5615_s10, %s5624_s14, %s5610_s8, %s2923_s9, %s2923_s9, %s2924_s11  }
 0x927 PF: > { %p2709_p3 = scmp.ge.s32.totalorder %s2919_s18, 2  ;;  %s2571_s12 = sand.u32 1, %s2907_s15  }
 0x928   : > { %s2572_s13 = scalar_lea.sflag [#allocation3], %s2571_s12 }
 0x929   : > { %p2706_p4 = pnand %p2709_p3, %p2992_p6 }
 0x92b   : > { %2902 = dma.done.wait (!%p2706_p4), %s2572_s13, 4096  }
 0x92c   : > { %2904 = vsyncadd (!%p2706_p4), %s2572_s13, 4294963200  ;;  %p14_p5 = scmp.ge.s32.totalorder %s2975_s21, 4   ;;  %s6208_s15 = smov %s2911_s16 }
 0x92d   : > { %s6209_s16 = smov %s2915_s17  ;;  %s6210_s17 = smov %s2986_s24 }
 0x92e   : > { %s6211_s18 = smov %s2975_s21  ;;  %16 = sbr.rel (!%p14_p5) target bundleno = 3 (0x3), region = 71 }
 0x935   :  { %2577 = vsyncpa [#allocation3], 1 }
 0x936   :  { %2579 = vsyncpa [#allocation3 + $0x1], 1 }

</bundles_post_ra>
